<compile_context>
chip_gen: v7x
topology: tpu7x:2x2x1
jax: 0.10.0
libtpu: 0.0.40
codegen_flags: <defaults>
</compile_context>

<pallas_src>
import functools

import jax
import jax.numpy as jnp
from jax.experimental import pallas as pl
from jax.experimental.pallas import tpu as pltpu

LANE = 128      # lane width (last dim alignment)
SUBLANE = 8     # f32 sublane count (second-to-last dim alignment)


def _round_up(x, m):
    return ((x + m - 1) // m) * m


# ----------------------------------------------------------------------------
# Pallas kernel: full multi-layer LSTM stack, whole sequence in one invocation.
# ----------------------------------------------------------------------------
def _encoder_kernel(x_ref,        # (S*Bp, Ep)     bf16  embedded tokens (padded)
                    wih0_ref,     # (Ep, 4Hp)      bf16  layer-0 input weights (transposed)
                    wihr_ref,     # (max(L-1,1), Hp, 4Hp) bf16  layers 1..L-1 input weights
                    whh_ref,      # (L, Hp, 4Hp)   bf16  recurrent weights (transposed)
                    b_ref,        # (L, 1, 4Hp)    f32   b_ih + b_hh (gate-block padded)
                    h0_ref,       # (L, Bp, Hp)    f32
                    c0_ref,       # (L, Bp, Hp)    f32
                    y_ref,        # (S*Bp, Hp)     f32   last-layer hidden states
                    gates_scr,    # (S*Bp, 4Hp)    f32   hoisted input-projection gates
                    act_scr,      # (S*Bp, Hp)     f32   inter-layer activations
                    *, seq_len, batch_p, hidden_p, num_layers):
    S, Bp, Hp = seq_len, batch_p, hidden_p

    def run_layer(layer, x2d_bf16, wih_bf16, is_last):
        # Hoisted non-recurrent projection for the WHOLE sequence: one large
        # bf16 MXU matmul with the bias folded in (computed once per layer).
        gates_scr[...] = (
            jnp.dot(x2d_bf16, wih_bf16, preferred_element_type=jnp.float32)
            + b_ref[layer])

        out_ref = y_ref if is_last else act_scr

        def step(t, carry):
            h, c = carry                                   # f32 (Bp, Hp)
            r0 = pl.multiple_of(t * Bp, Bp)                # sublane-aligned row offset
            # Only the recurrent term stays on the serial critical path.
            g = gates_scr[pl.ds(r0, Bp), :] + jnp.dot(
                h.astype(jnp.bfloat16), whh_ref[layer],
                preferred_element_type=jnp.float32)        # (Bp, 4Hp) f32
            # PyTorch gate order (i, f, g, o); each slice is 128-lane aligned.
            i_g = jax.nn.sigmoid(g[:, 0 * Hp:1 * Hp])
            f_g = jax.nn.sigmoid(g[:, 1 * Hp:2 * Hp])
            g_g = jnp.tanh(g[:, 2 * Hp:3 * Hp])
            o_g = jax.nn.sigmoid(g[:, 3 * Hp:4 * Hp])
            c_new = f_g * c + i_g * g_g                    # f32 carry
            h_new = o_g * jnp.tanh(c_new)
            out_ref[pl.ds(r0, Bp), :] = h_new
            return h_new, c_new

        jax.lax.fori_loop(0, S, step, (h0_ref[layer], c0_ref[layer]),
                          unroll=True)

    # Layer 0 consumes the embedded tokens; layers 1..L-1 consume the previous
    # layer's activations, kept resident in VMEM (no HBM round trips).
    run_layer(0, x_ref[...], wih0_ref[...], num_layers == 1)
    for l in range(1, num_layers):
        run_layer(l, act_scr[...].astype(jnp.bfloat16), wihr_ref[l - 1],
                  l == num_layers - 1)


# ----------------------------------------------------------------------------
# Parameter packing: transpose, gate-block pad (H -> Hp per gate), bf16 weights.
# ----------------------------------------------------------------------------
def _pad_gates_last(w, H, Hp):
    """Pad the trailing 4H dim to 4Hp, padding each gate block (i,f,g,o)
    independently so gate k occupies lanes [k*Hp, k*Hp + H)."""
    pad_width = [(0, 0)] * (w.ndim - 1) + [(0, Hp - H)]
    parts = [jnp.pad(w[..., k * H:(k + 1) * H], pad_width) for k in range(4)]
    return jnp.concatenate(parts, axis=-1)


def _pack_for_kernel(layers, hidden0, cell0, embedding_size, hidden_size):
    E, H, L = embedding_size, hidden_size, len(layers)
    Ep, Hp = _round_up(E, LANE), _round_up(H, LANE)

    def pack_ih(w_ih, d_in, d_in_p):
        wt = jnp.pad(w_ih.T, ((0, d_in_p - d_in), (0, 0)))      # (d_in_p, 4H)
        return _pad_gates_last(wt, H, Hp).astype(jnp.bfloat16)  # (d_in_p, 4Hp)

    def pack_hh(w_hh):
        wt = jnp.pad(w_hh.T, ((0, Hp - H), (0, 0)))
        return _pad_gates_last(wt, H, Hp).astype(jnp.bfloat16)  # (Hp, 4Hp)

    wih0 = pack_ih(layers[0]["w_ih"], E, Ep)
    if L > 1:
        wih_rest = jnp.stack([pack_ih(layers[l]["w_ih"], H, Hp)
                              for l in range(1, L)])
    else:
        wih_rest = jnp.zeros((1, Hp, 4 * Hp), jnp.bfloat16)      # unused dummy
    whh = jnp.stack([pack_hh(layers[l]["w_hh"]) for l in range(L)])
    bias = jnp.stack([
        _pad_gates_last(layers[l]["b_ih"] + layers[l]["b_hh"], H, Hp)[None, :]
        for l in range(L)]).astype(jnp.float32)                  # (L, 1, 4Hp)
    h0 = jnp.pad(hidden0, ((0, 0), (0, 0), (0, Hp - H)))         # (L, 1, Hp)
    c0 = jnp.pad(cell0, ((0, 0), (0, 0), (0, Hp - H)))
    return {"wih0": wih0, "wih_rest": wih_rest, "whh": whh, "bias": bias,
            "h0": h0, "c0": c0}


def init_encoder_params(key, input_size, embedding_size, hidden_size, num_layers):
    params = {}
    keys = jax.random.split(key, 3 + 4 * num_layers)

    # nn.init.xavier_uniform_ on (num_layers, 1, hidden_size)
    fan_in, fan_out = 1 * hidden_size, num_layers * hidden_size
    bound = jnp.sqrt(6.0 / (fan_in + fan_out))
    params["hidden0"] = jax.random.uniform(
        keys[0], (num_layers, 1, hidden_size), jnp.float32, -bound, bound)
    params["cell0"] = jax.random.uniform(
        keys[1], (num_layers, 1, hidden_size), jnp.float32, -bound, bound)

    # nn.Embedding default init: N(0, 1)
    params["embedding"] = jax.random.normal(
        keys[2], (input_size, embedding_size), jnp.float32)

    # nn.LSTM default init: U(-1/sqrt(H), 1/sqrt(H))
    k = 1.0 / jnp.sqrt(hidden_size)
    layers = []
    for l in range(num_layers):
        d_in = embedding_size if l == 0 else hidden_size
        kk = keys[3 + 4 * l: 3 + 4 * (l + 1)]
        layers.append({
            "w_ih": jax.random.uniform(kk[0], (4 * hidden_size, d_in), jnp.float32, -k, k),
            "w_hh": jax.random.uniform(kk[1], (4 * hidden_size, hidden_size), jnp.float32, -k, k),
            "b_ih": jax.random.uniform(kk[2], (4 * hidden_size,), jnp.float32, -k, k),
            "b_hh": jax.random.uniform(kk[3], (4 * hidden_size,), jnp.float32, -k, k),
        })
    params["layers"] = layers
    params["packed"] = _pack_for_kernel(
        layers, params["hidden0"], params["cell0"], embedding_size, hidden_size)
    return params


# ----------------------------------------------------------------------------
# Forward
# ----------------------------------------------------------------------------
def encoder_forward(params, x_tokens):
    """x_tokens: (seq_len, batch) int32 -> (seq_len, batch, hidden_size) f32."""
    pk = params["packed"]
    S, B = x_tokens.shape
    L, Hp = pk["whh"].shape[0], pk["whh"].shape[1]
    Ep = pk["wih0"].shape[0]
    H = params["hidden0"].shape[-1]
    E = params["embedding"].shape[-1]
    Bp = max(SUBLANE, _round_up(B, SUBLANE))

    # Embedding lookup (data-dependent gather) stays in plain JAX glue.
    # TODO(synk): fold the gather into the kernel via scalar-prefetched token ids.
    x = jnp.take(params["embedding"], x_tokens, axis=0)            # (S, B, E) f32
    x = jnp.pad(x, ((0, 0), (0, Bp - B), (0, Ep - E)))
    x2d = x.reshape(S * Bp, Ep).astype(jnp.bfloat16)

    # _init_hidden: repeat learned initial state over the (padded) batch.
    h0 = jnp.broadcast_to(pk["h0"], (L, Bp, Hp))
    c0 = jnp.broadcast_to(pk["c0"], (L, Bp, Hp))

    kernel = functools.partial(_encoder_kernel, seq_len=S, batch_p=Bp,
                               hidden_p=Hp, num_layers=L)
    # TODO(synk): for v7x (2 TCs) at real batch sizes, add a leading "parallel"
    # grid axis over batch shards; at B=2 a single invocation is optimal.
    y2d = pl.pallas_call(
        kernel,
        out_shape=jax.ShapeDtypeStruct((S * Bp, Hp), jnp.float32),
        in_specs=[pl.BlockSpec(memory_space=pltpu.MemorySpace.VMEM)] * 7,
        out_specs=pl.BlockSpec(memory_space=pltpu.MemorySpace.VMEM),
        scratch_shapes=[
            pltpu.VMEM((S * Bp, 4 * Hp), jnp.float32),   # hoisted projection gates
            pltpu.VMEM((S * Bp, Hp), jnp.float32),       # inter-layer activations
        ],
    )(x2d, pk["wih0"], pk["wih_rest"], pk["whh"], pk["bias"], h0, c0)

    return y2d.reshape(S, Bp, Hp)[:, :B, :H]


# ----------------------------------------------------------------------------
# Pure-JAX f32 reference (PyTorch nn.LSTM semantics) for validation.
# ----------------------------------------------------------------------------
def encoder_reference(params, x_tokens):
    L, _, H = params["hidden0"].shape
    S, B = x_tokens.shape
    x = jnp.take(params["embedding"], x_tokens, axis=0)
    for l, lp in enumerate(params["layers"]):
        w_ih, w_hh = lp["w_ih"], lp["w_hh"]
        b = lp["b_ih"] + lp["b_hh"]
        h = jnp.broadcast_to(params["hidden0"][l], (B, H))
        c = jnp.broadcast_to(params["cell0"][l], (B, H))

        def step(carry, x_t):
            h, c = carry
            g = x_t @ w_ih.T + h @ w_hh.T + b
            i = jax.nn.sigmoid(g[:, 0 * H:1 * H])
            f = jax.nn.sigmoid(g[:, 1 * H:2 * H])
            gg = jnp.tanh(g[:, 2 * H:3 * H])
            o = jax.nn.sigmoid(g[:, 3 * H:4 * H])
            c = f * c + i * gg
            h = o * jnp.tanh(c)
            return (h, c), h

        (_, _), x = jax.lax.scan(step, (h, c), x)
    return x


if __name__ == "__main__":
    VOCAB = 16
    EMB = 32
    HID = 32
    NUM_LAYERS = 3
    SEQ = 8
    BATCH = 2

    key = jax.random.PRNGKey(0)
    pkey, xkey = jax.random.split(key)
    params = init_encoder_params(pkey, VOCAB, EMB, HID, NUM_LAYERS)
    x_tokens = jax.random.randint(xkey, (SEQ, BATCH), 0, VOCAB, dtype=jnp.int32)

    out = jax.block_until_ready(jax.jit(encoder_forward)(params, x_tokens))

    assert out.shape == (SEQ, BATCH, HID), out.shape
    assert out.dtype == jnp.float32
    assert bool(jnp.all(jnp.isfinite(out)))

    ref = encoder_reference(params, x_tokens)
    err = float(jnp.max(jnp.abs(out - ref)))
    assert err < 5e-2, f"max abs err vs f32 reference: {err}"
    print("KERNEL_OK")
</pallas_src>

<mosaic_0001>
module attributes {stable_mosaic.version = 11 : i64} {
  func.func @_encoder_kernel(%arg0: memref<64x128xbf16, #tpu.memory_space<vmem>>, %arg1: memref<128x512xbf16, #tpu.memory_space<vmem>>, %arg2: memref<2x128x512xbf16, #tpu.memory_space<vmem>>, %arg3: memref<3x128x512xbf16, #tpu.memory_space<vmem>>, %arg4: memref<3x1x512xf32, #tpu.memory_space<vmem>>, %arg5: memref<3x8x128xf32, #tpu.memory_space<vmem>>, %arg6: memref<3x8x128xf32, #tpu.memory_space<vmem>>, %arg7: memref<64x128xf32, #tpu.memory_space<vmem>>, %arg8: memref<64x512xf32, #tpu.memory_space<vmem>>, %arg9: memref<64x128xf32, #tpu.memory_space<vmem>>) attributes {dimension_semantics = [], scalar_prefetch = 0 : i64, scratch_operands = 2 : i64, tpu.core_type = #tpu.core_type<tc>} {
    %c0 = arith.constant 0 : index
    %c0_0 = arith.constant 0 : index
    %0 = vector.load %arg0[%c0, %c0_0] : memref<64x128xbf16, #tpu.memory_space<vmem>>, vector<64x128xbf16>
    %c0_1 = arith.constant 0 : index
    %c0_2 = arith.constant 0 : index
    %1 = vector.load %arg1[%c0_1, %c0_2] : memref<128x512xbf16, #tpu.memory_space<vmem>>, vector<128x512xbf16>
    %cst = arith.constant dense<0.000000e+00> : vector<64x512xf32>
    %2 = tpu.matmul %0, %1, %cst {dimension_numbers = #tpu.dot_dimension_numbers<[1], [0], [0], [1], [0, 0, 1, 1], [], []>} : vector<64x128xbf16>, vector<128x512xbf16>, vector<64x512xf32> -> vector<64x512xf32>
    %c0_3 = arith.constant 0 : index
    %c0_4 = arith.constant 0 : index
    %c0_5 = arith.constant 0 : index
    %3 = vector.load %arg4[%c0_3, %c0_4, %c0_5] : memref<3x1x512xf32, #tpu.memory_space<vmem>>, vector<1x1x512xf32>
    %4 = vector.shape_cast %3 : vector<1x1x512xf32> to vector<1x512xf32>
    %5 = vector.broadcast %4 : vector<1x512xf32> to vector<64x512xf32>
    %6 = arith.addf %2, %5 : vector<64x512xf32>
    %c0_6 = arith.constant 0 : index
    %c0_7 = arith.constant 0 : index
    %7 = vector.load %arg8[%c0_6, %c0_7] : memref<64x512xf32, #tpu.memory_space<vmem>>, vector<64x512xf32>
    tpu.vector_store %arg8[%c0_6, %c0_7], %6 {strides = array<i32>} : memref<64x512xf32, #tpu.memory_space<vmem>>, vector<64x512xf32>,
    %c0_8 = arith.constant 0 : index
    %c0_9 = arith.constant 0 : index
    %c0_10 = arith.constant 0 : index
    %8 = vector.load %arg5[%c0_8, %c0_9, %c0_10] : memref<3x8x128xf32, #tpu.memory_space<vmem>>, vector<1x8x128xf32>
    %9 = vector.shape_cast %8 : vector<1x8x128xf32> to vector<8x128xf32>
    %c0_11 = arith.constant 0 : index
    %c0_12 = arith.constant 0 : index
    %c0_13 = arith.constant 0 : index
    %10 = vector.load %arg6[%c0_11, %c0_12, %c0_13] : memref<3x8x128xf32, #tpu.memory_space<vmem>>, vector<1x8x128xf32>
    %11 = vector.shape_cast %10 : vector<1x8x128xf32> to vector<8x128xf32>
    %c0_i32 = arith.constant 0 : i32
    %c8_i32 = arith.constant 8 : i32
    %12 = arith.muli %c0_i32, %c8_i32 : i32
    %13 = tpu.assume_multiple %12, 8 : i32
    %14 = arith.index_cast %13 : i32 to index
    %c0_14 = arith.constant 0 : index
    %15 = vector.load %arg8[%14, %c0_14] : memref<64x512xf32, #tpu.memory_space<vmem>>, vector<8x512xf32>
    %16 = arith.truncf %9 : vector<8x128xf32> to vector<8x128xbf16>
    %c0_15 = arith.constant 0 : index
    %c0_16 = arith.constant 0 : index
    %c0_17 = arith.constant 0 : index
    %17 = vector.load %arg3[%c0_15, %c0_16, %c0_17] : memref<3x128x512xbf16, #tpu.memory_space<vmem>>, vector<1x128x512xbf16>
    %18 = vector.shape_cast %17 : vector<1x128x512xbf16> to vector<128x512xbf16>
    %cst_18 = arith.constant dense<0.000000e+00> : vector<8x512xf32>
    %19 = tpu.matmul %16, %18, %cst_18 {dimension_numbers = #tpu.dot_dimension_numbers<[1], [0], [0], [1], [0, 0, 1, 1], [], []>} : vector<8x128xbf16>, vector<128x512xbf16>, vector<8x512xf32> -> vector<8x512xf32>
    %20 = arith.addf %15, %19 : vector<8x512xf32>
    %21 = vector.extract_strided_slice %20 {offsets = [0, 0], sizes = [8, 128], strides = [1, 1]} : vector<8x512xf32> to vector<8x128xf32>
    %22 = arith.negf %21 : vector<8x128xf32>
    %23 = math.exp %22 : vector<8x128xf32>
    %cst_19 = arith.constant 1.000000e+00 : f32
    %24 = vector.broadcast %cst_19 : f32 to vector<8x128xf32>
    %25 = arith.addf %24, %23 : vector<8x128xf32>
    %26 = arith.divf %24, %25 : vector<8x128xf32>
    %27 = vector.extract_strided_slice %20 {offsets = [0, 128], sizes = [8, 128], strides = [1, 1]} : vector<8x512xf32> to vector<8x128xf32>
    %28 = arith.negf %27 : vector<8x128xf32>
    %29 = math.exp %28 : vector<8x128xf32>
    %cst_20 = arith.constant 1.000000e+00 : f32
    %30 = vector.broadcast %cst_20 : f32 to vector<8x128xf32>
    %31 = arith.addf %30, %29 : vector<8x128xf32>
    %32 = arith.divf %30, %31 : vector<8x128xf32>
    %33 = vector.extract_strided_slice %20 {offsets = [0, 256], sizes = [8, 128], strides = [1, 1]} : vector<8x512xf32> to vector<8x128xf32>
    %34 = math.tanh %33 : vector<8x128xf32>
    %35 = vector.extract_strided_slice %20 {offsets = [0, 384], sizes = [8, 128], strides = [1, 1]} : vector<8x512xf32> to vector<8x128xf32>
    %36 = arith.negf %35 : vector<8x128xf32>
    %37 = math.exp %36 : vector<8x128xf32>
    %cst_21 = arith.constant 1.000000e+00 : f32
    %38 = vector.broadcast %cst_21 : f32 to vector<8x128xf32>
    %39 = arith.addf %38, %37 : vector<8x128xf32>
    %40 = arith.divf %38, %39 : vector<8x128xf32>
    %41 = arith.mulf %32, %11 : vector<8x128xf32>
    %42 = arith.mulf %26, %34 : vector<8x128xf32>
    %43 = arith.addf %41, %42 : vector<8x128xf32>
    %44 = math.tanh %43 : vector<8x128xf32>
    %45 = arith.mulf %40, %44 : vector<8x128xf32>
    %46 = arith.index_cast %13 : i32 to index
    %c0_22 = arith.constant 0 : index
    %47 = vector.load %arg9[%46, %c0_22] : memref<64x128xf32, #tpu.memory_space<vmem>>, vector<8x128xf32>
    tpu.vector_store %arg9[%46, %c0_22], %45 {strides = array<i32>} : memref<64x128xf32, #tpu.memory_space<vmem>>, vector<8x128xf32>,
    %c1_i32 = arith.constant 1 : i32
    %c8_i32_23 = arith.constant 8 : i32
    %48 = arith.muli %c1_i32, %c8_i32_23 : i32
    %49 = tpu.assume_multiple %48, 8 : i32
    %50 = arith.index_cast %49 : i32 to index
    %c0_24 = arith.constant 0 : index
    %51 = vector.load %arg8[%50, %c0_24] : memref<64x512xf32, #tpu.memory_space<vmem>>, vector<8x512xf32>
    %52 = arith.truncf %45 : vector<8x128xf32> to vector<8x128xbf16>
    %c0_25 = arith.constant 0 : index
    %c0_26 = arith.constant 0 : index
    %c0_27 = arith.constant 0 : index
    %53 = vector.load %arg3[%c0_25, %c0_26, %c0_27] : memref<3x128x512xbf16, #tpu.memory_space<vmem>>, vector<1x128x512xbf16>
    %54 = vector.shape_cast %53 : vector<1x128x512xbf16> to vector<128x512xbf16>
    %cst_28 = arith.constant dense<0.000000e+00> : vector<8x512xf32>
    %55 = tpu.matmul %52, %54, %cst_28 {dimension_numbers = #tpu.dot_dimension_numbers<[1], [0], [0], [1], [0, 0, 1, 1], [], []>} : vector<8x128xbf16>, vector<128x512xbf16>, vector<8x512xf32> -> vector<8x512xf32>
    %56 = arith.addf %51, %55 : vector<8x512xf32>
    %57 = vector.extract_strided_slice %56 {offsets = [0, 0], sizes = [8, 128], strides = [1, 1]} : vector<8x512xf32> to vector<8x128xf32>
    %58 = arith.negf %57 : vector<8x128xf32>
    %59 = math.exp %58 : vector<8x128xf32>
    %cst_29 = arith.constant 1.000000e+00 : f32
    %60 = vector.broadcast %cst_29 : f32 to vector<8x128xf32>
    %61 = arith.addf %60, %59 : vector<8x128xf32>
    %62 = arith.divf %60, %61 : vector<8x128xf32>
    %63 = vector.extract_strided_slice %56 {offsets = [0, 128], sizes = [8, 128], strides = [1, 1]} : vector<8x512xf32> to vector<8x128xf32>
    %64 = arith.negf %63 : vector<8x128xf32>
    %65 = math.exp %64 : vector<8x128xf32>
    %cst_30 = arith.constant 1.000000e+00 : f32
    %66 = vector.broadcast %cst_30 : f32 to vector<8x128xf32>
    %67 = arith.addf %66, %65 : vector<8x128xf32>
    %68 = arith.divf %66, %67 : vector<8x128xf32>
    %69 = vector.extract_strided_slice %56 {offsets = [0, 256], sizes = [8, 128], strides = [1, 1]} : vector<8x512xf32> to vector<8x128xf32>
    %70 = math.tanh %69 : vector<8x128xf32>
    %71 = vector.extract_strided_slice %56 {offsets = [0, 384], sizes = [8, 128], strides = [1, 1]} : vector<8x512xf32> to vector<8x128xf32>
    %72 = arith.negf %71 : vector<8x128xf32>
    %73 = math.exp %72 : vector<8x128xf32>
    %cst_31 = arith.constant 1.000000e+00 : f32
    %74 = vector.broadcast %cst_31 : f32 to vector<8x128xf32>
    %75 = arith.addf %74, %73 : vector<8x128xf32>
    %76 = arith.divf %74, %75 : vector<8x128xf32>
    %77 = arith.mulf %68, %43 : vector<8x128xf32>
    %78 = arith.mulf %62, %70 : vector<8x128xf32>
    %79 = arith.addf %77, %78 : vector<8x128xf32>
    %80 = math.tanh %79 : vector<8x128xf32>
    %81 = arith.mulf %76, %80 : vector<8x128xf32>
    %82 = arith.index_cast %49 : i32 to index
    %c0_32 = arith.constant 0 : index
    %83 = vector.load %arg9[%82, %c0_32] : memref<64x128xf32, #tpu.memory_space<vmem>>, vector<8x128xf32>
    tpu.vector_store %arg9[%82, %c0_32], %81 {strides = array<i32>} : memref<64x128xf32, #tpu.memory_space<vmem>>, vector<8x128xf32>,
    %c2_i32 = arith.constant 2 : i32
    %c8_i32_33 = arith.constant 8 : i32
    %84 = arith.muli %c2_i32, %c8_i32_33 : i32
    %85 = tpu.assume_multiple %84, 8 : i32
    %86 = arith.index_cast %85 : i32 to index
    %c0_34 = arith.constant 0 : index
    %87 = vector.load %arg8[%86, %c0_34] : memref<64x512xf32, #tpu.memory_space<vmem>>, vector<8x512xf32>
    %88 = arith.truncf %81 : vector<8x128xf32> to vector<8x128xbf16>
    %c0_35 = arith.constant 0 : index
    %c0_36 = arith.constant 0 : index
    %c0_37 = arith.constant 0 : index
    %89 = vector.load %arg3[%c0_35, %c0_36, %c0_37] : memref<3x128x512xbf16, #tpu.memory_space<vmem>>, vector<1x128x512xbf16>
    %90 = vector.shape_cast %89 : vector<1x128x512xbf16> to vector<128x512xbf16>
    %cst_38 = arith.constant dense<0.000000e+00> : vector<8x512xf32>
    %91 = tpu.matmul %88, %90, %cst_38 {dimension_numbers = #tpu.dot_dimension_numbers<[1], [0], [0], [1], [0, 0, 1, 1], [], []>} : vector<8x128xbf16>, vector<128x512xbf16>, vector<8x512xf32> -> vector<8x512xf32>
    %92 = arith.addf %87, %91 : vector<8x512xf32>
    %93 = vector.extract_strided_slice %92 {offsets = [0, 0], sizes = [8, 128], strides = [1, 1]} : vector<8x512xf32> to vector<8x128xf32>
    %94 = arith.negf %93 : vector<8x128xf32>
    %95 = math.exp %94 : vector<8x128xf32>
    %cst_39 = arith.constant 1.000000e+00 : f32
    %96 = vector.broadcast %cst_39 : f32 to vector<8x128xf32>
    %97 = arith.addf %96, %95 : vector<8x128xf32>
    %98 = arith.divf %96, %97 : vector<8x128xf32>
    %99 = vector.extract_strided_slice %92 {offsets = [0, 128], sizes = [8, 128], strides = [1, 1]} : vector<8x512xf32> to vector<8x128xf32>
    %100 = arith.negf %99 : vector<8x128xf32>
    %101 = math.exp %100 : vector<8x128xf32>
    %cst_40 = arith.constant 1.000000e+00 : f32
    %102 = vector.broadcast %cst_40 : f32 to vector<8x128xf32>
    %103 = arith.addf %102, %101 : vector<8x128xf32>
    %104 = arith.divf %102, %103 : vector<8x128xf32>
    %105 = vector.extract_strided_slice %92 {offsets = [0, 256], sizes = [8, 128], strides = [1, 1]} : vector<8x512xf32> to vector<8x128xf32>
    %106 = math.tanh %105 : vector<8x128xf32>
    %107 = vector.extract_strided_slice %92 {offsets = [0, 384], sizes = [8, 128], strides = [1, 1]} : vector<8x512xf32> to vector<8x128xf32>
    %108 = arith.negf %107 : vector<8x128xf32>
    %109 = math.exp %108 : vector<8x128xf32>
    %cst_41 = arith.constant 1.000000e+00 : f32
    %110 = vector.broadcast %cst_41 : f32 to vector<8x128xf32>
    %111 = arith.addf %110, %109 : vector<8x128xf32>
    %112 = arith.divf %110, %111 : vector<8x128xf32>
    %113 = arith.mulf %104, %79 : vector<8x128xf32>
    %114 = arith.mulf %98, %106 : vector<8x128xf32>
    %115 = arith.addf %113, %114 : vector<8x128xf32>
    %116 = math.tanh %115 : vector<8x128xf32>
    %117 = arith.mulf %112, %116 : vector<8x128xf32>
    %118 = arith.index_cast %85 : i32 to index
    %c0_42 = arith.constant 0 : index
    %119 = vector.load %arg9[%118, %c0_42] : memref<64x128xf32, #tpu.memory_space<vmem>>, vector<8x128xf32>
    tpu.vector_store %arg9[%118, %c0_42], %117 {strides = array<i32>} : memref<64x128xf32, #tpu.memory_space<vmem>>, vector<8x128xf32>,
    %c3_i32 = arith.constant 3 : i32
    %c8_i32_43 = arith.constant 8 : i32
    %120 = arith.muli %c3_i32, %c8_i32_43 : i32
    %121 = tpu.assume_multiple %120, 8 : i32
    %122 = arith.index_cast %121 : i32 to index
    %c0_44 = arith.constant 0 : index
    %123 = vector.load %arg8[%122, %c0_44] : memref<64x512xf32, #tpu.memory_space<vmem>>, vector<8x512xf32>
    %124 = arith.truncf %117 : vector<8x128xf32> to vector<8x128xbf16>
    %c0_45 = arith.constant 0 : index
    %c0_46 = arith.constant 0 : index
    %c0_47 = arith.constant 0 : index
    %125 = vector.load %arg3[%c0_45, %c0_46, %c0_47] : memref<3x128x512xbf16, #tpu.memory_space<vmem>>, vector<1x128x512xbf16>
    %126 = vector.shape_cast %125 : vector<1x128x512xbf16> to vector<128x512xbf16>
    %cst_48 = arith.constant dense<0.000000e+00> : vector<8x512xf32>
    %127 = tpu.matmul %124, %126, %cst_48 {dimension_numbers = #tpu.dot_dimension_numbers<[1], [0], [0], [1], [0, 0, 1, 1], [], []>} : vector<8x128xbf16>, vector<128x512xbf16>, vector<8x512xf32> -> vector<8x512xf32>
    %128 = arith.addf %123, %127 : vector<8x512xf32>
    %129 = vector.extract_strided_slice %128 {offsets = [0, 0], sizes = [8, 128], strides = [1, 1]} : vector<8x512xf32> to vector<8x128xf32>
    %130 = arith.negf %129 : vector<8x128xf32>
    %131 = math.exp %130 : vector<8x128xf32>
    %cst_49 = arith.constant 1.000000e+00 : f32
    %132 = vector.broadcast %cst_49 : f32 to vector<8x128xf32>
    %133 = arith.addf %132, %131 : vector<8x128xf32>
    %134 = arith.divf %132, %133 : vector<8x128xf32>
    %135 = vector.extract_strided_slice %128 {offsets = [0, 128], sizes = [8, 128], strides = [1, 1]} : vector<8x512xf32> to vector<8x128xf32>
    %136 = arith.negf %135 : vector<8x128xf32>
    %137 = math.exp %136 : vector<8x128xf32>
    %cst_50 = arith.constant 1.000000e+00 : f32
    %138 = vector.broadcast %cst_50 : f32 to vector<8x128xf32>
    %139 = arith.addf %138, %137 : vector<8x128xf32>
    %140 = arith.divf %138, %139 : vector<8x128xf32>
    %141 = vector.extract_strided_slice %128 {offsets = [0, 256], sizes = [8, 128], strides = [1, 1]} : vector<8x512xf32> to vector<8x128xf32>
    %142 = math.tanh %141 : vector<8x128xf32>
    %143 = vector.extract_strided_slice %128 {offsets = [0, 384], sizes = [8, 128], strides = [1, 1]} : vector<8x512xf32> to vector<8x128xf32>
    %144 = arith.negf %143 : vector<8x128xf32>
    %145 = math.exp %144 : vector<8x128xf32>
    %cst_51 = arith.constant 1.000000e+00 : f32
    %146 = vector.broadcast %cst_51 : f32 to vector<8x128xf32>
    %147 = arith.addf %146, %145 : vector<8x128xf32>
    %148 = arith.divf %146, %147 : vector<8x128xf32>
    %149 = arith.mulf %140, %115 : vector<8x128xf32>
    %150 = arith.mulf %134, %142 : vector<8x128xf32>
    %151 = arith.addf %149, %150 : vector<8x128xf32>
    %152 = math.tanh %151 : vector<8x128xf32>
    %153 = arith.mulf %148, %152 : vector<8x128xf32>
    %154 = arith.index_cast %121 : i32 to index
    %c0_52 = arith.constant 0 : index
    %155 = vector.load %arg9[%154, %c0_52] : memref<64x128xf32, #tpu.memory_space<vmem>>, vector<8x128xf32>
    tpu.vector_store %arg9[%154, %c0_52], %153 {strides = array<i32>} : memref<64x128xf32, #tpu.memory_space<vmem>>, vector<8x128xf32>,
    %c4_i32 = arith.constant 4 : i32
    %c8_i32_53 = arith.constant 8 : i32
    %156 = arith.muli %c4_i32, %c8_i32_53 : i32
    %157 = tpu.assume_multiple %156, 8 : i32
    %158 = arith.index_cast %157 : i32 to index
    %c0_54 = arith.constant 0 : index
    %159 = vector.load %arg8[%158, %c0_54] : memref<64x512xf32, #tpu.memory_space<vmem>>, vector<8x512xf32>
    %160 = arith.truncf %153 : vector<8x128xf32> to vector<8x128xbf16>
    %c0_55 = arith.constant 0 : index
    %c0_56 = arith.constant 0 : index
    %c0_57 = arith.constant 0 : index
    %161 = vector.load %arg3[%c0_55, %c0_56, %c0_57] : memref<3x128x512xbf16, #tpu.memory_space<vmem>>, vector<1x128x512xbf16>
    %162 = vector.shape_cast %161 : vector<1x128x512xbf16> to vector<128x512xbf16>
    %cst_58 = arith.constant dense<0.000000e+00> : vector<8x512xf32>
    %163 = tpu.matmul %160, %162, %cst_58 {dimension_numbers = #tpu.dot_dimension_numbers<[1], [0], [0], [1], [0, 0, 1, 1], [], []>} : vector<8x128xbf16>, vector<128x512xbf16>, vector<8x512xf32> -> vector<8x512xf32>
    %164 = arith.addf %159, %163 : vector<8x512xf32>
    %165 = vector.extract_strided_slice %164 {offsets = [0, 0], sizes = [8, 128], strides = [1, 1]} : vector<8x512xf32> to vector<8x128xf32>
    %166 = arith.negf %165 : vector<8x128xf32>
    %167 = math.exp %166 : vector<8x128xf32>
    %cst_59 = arith.constant 1.000000e+00 : f32
    %168 = vector.broadcast %cst_59 : f32 to vector<8x128xf32>
    %169 = arith.addf %168, %167 : vector<8x128xf32>
    %170 = arith.divf %168, %169 : vector<8x128xf32>
    %171 = vector.extract_strided_slice %164 {offsets = [0, 128], sizes = [8, 128], strides = [1, 1]} : vector<8x512xf32> to vector<8x128xf32>
    %172 = arith.negf %171 : vector<8x128xf32>
    %173 = math.exp %172 : vector<8x128xf32>
    %cst_60 = arith.constant 1.000000e+00 : f32
    %174 = vector.broadcast %cst_60 : f32 to vector<8x128xf32>
    %175 = arith.addf %174, %173 : vector<8x128xf32>
    %176 = arith.divf %174, %175 : vector<8x128xf32>
    %177 = vector.extract_strided_slice %164 {offsets = [0, 256], sizes = [8, 128], strides = [1, 1]} : vector<8x512xf32> to vector<8x128xf32>
    %178 = math.tanh %177 : vector<8x128xf32>
    %179 = vector.extract_strided_slice %164 {offsets = [0, 384], sizes = [8, 128], strides = [1, 1]} : vector<8x512xf32> to vector<8x128xf32>
    %180 = arith.negf %179 : vector<8x128xf32>
    %181 = math.exp %180 : vector<8x128xf32>
    %cst_61 = arith.constant 1.000000e+00 : f32
    %182 = vector.broadcast %cst_61 : f32 to vector<8x128xf32>
    %183 = arith.addf %182, %181 : vector<8x128xf32>
    %184 = arith.divf %182, %183 : vector<8x128xf32>
    %185 = arith.mulf %176, %151 : vector<8x128xf32>
    %186 = arith.mulf %170, %178 : vector<8x128xf32>
    %187 = arith.addf %185, %186 : vector<8x128xf32>
    %188 = math.tanh %187 : vector<8x128xf32>
    %189 = arith.mulf %184, %188 : vector<8x128xf32>
    %190 = arith.index_cast %157 : i32 to index
    %c0_62 = arith.constant 0 : index
    %191 = vector.load %arg9[%190, %c0_62] : memref<64x128xf32, #tpu.memory_space<vmem>>, vector<8x128xf32>
    tpu.vector_store %arg9[%190, %c0_62], %189 {strides = array<i32>} : memref<64x128xf32, #tpu.memory_space<vmem>>, vector<8x128xf32>,
    %c5_i32 = arith.constant 5 : i32
    %c8_i32_63 = arith.constant 8 : i32
    %192 = arith.muli %c5_i32, %c8_i32_63 : i32
    %193 = tpu.assume_multiple %192, 8 : i32
    %194 = arith.index_cast %193 : i32 to index
    %c0_64 = arith.constant 0 : index
    %195 = vector.load %arg8[%194, %c0_64] : memref<64x512xf32, #tpu.memory_space<vmem>>, vector<8x512xf32>
    %196 = arith.truncf %189 : vector<8x128xf32> to vector<8x128xbf16>
    %c0_65 = arith.constant 0 : index
    %c0_66 = arith.constant 0 : index
    %c0_67 = arith.constant 0 : index
    %197 = vector.load %arg3[%c0_65, %c0_66, %c0_67] : memref<3x128x512xbf16, #tpu.memory_space<vmem>>, vector<1x128x512xbf16>
    %198 = vector.shape_cast %197 : vector<1x128x512xbf16> to vector<128x512xbf16>
    %cst_68 = arith.constant dense<0.000000e+00> : vector<8x512xf32>
    %199 = tpu.matmul %196, %198, %cst_68 {dimension_numbers = #tpu.dot_dimension_numbers<[1], [0], [0], [1], [0, 0, 1, 1], [], []>} : vector<8x128xbf16>, vector<128x512xbf16>, vector<8x512xf32> -> vector<8x512xf32>
    %200 = arith.addf %195, %199 : vector<8x512xf32>
    %201 = vector.extract_strided_slice %200 {offsets = [0, 0], sizes = [8, 128], strides = [1, 1]} : vector<8x512xf32> to vector<8x128xf32>
    %202 = arith.negf %201 : vector<8x128xf32>
    %203 = math.exp %202 : vector<8x128xf32>
    %cst_69 = arith.constant 1.000000e+00 : f32
    %204 = vector.broadcast %cst_69 : f32 to vector<8x128xf32>
    %205 = arith.addf %204, %203 : vector<8x128xf32>
    %206 = arith.divf %204, %205 : vector<8x128xf32>
    %207 = vector.extract_strided_slice %200 {offsets = [0, 128], sizes = [8, 128], strides = [1, 1]} : vector<8x512xf32> to vector<8x128xf32>
    %208 = arith.negf %207 : vector<8x128xf32>
    %209 = math.exp %208 : vector<8x128xf32>
    %cst_70 = arith.constant 1.000000e+00 : f32
    %210 = vector.broadcast %cst_70 : f32 to vector<8x128xf32>
    %211 = arith.addf %210, %209 : vector<8x128xf32>
    %212 = arith.divf %210, %211 : vector<8x128xf32>
    %213 = vector.extract_strided_slice %200 {offsets = [0, 256], sizes = [8, 128], strides = [1, 1]} : vector<8x512xf32> to vector<8x128xf32>
    %214 = math.tanh %213 : vector<8x128xf32>
    %215 = vector.extract_strided_slice %200 {offsets = [0, 384], sizes = [8, 128], strides = [1, 1]} : vector<8x512xf32> to vector<8x128xf32>
    %216 = arith.negf %215 : vector<8x128xf32>
    %217 = math.exp %216 : vector<8x128xf32>
    %cst_71 = arith.constant 1.000000e+00 : f32
    %218 = vector.broadcast %cst_71 : f32 to vector<8x128xf32>
    %219 = arith.addf %218, %217 : vector<8x128xf32>
    %220 = arith.divf %218, %219 : vector<8x128xf32>
    %221 = arith.mulf %212, %187 : vector<8x128xf32>
    %222 = arith.mulf %206, %214 : vector<8x128xf32>
    %223 = arith.addf %221, %222 : vector<8x128xf32>
    %224 = math.tanh %223 : vector<8x128xf32>
    %225 = arith.mulf %220, %224 : vector<8x128xf32>
    %226 = arith.index_cast %193 : i32 to index
    %c0_72 = arith.constant 0 : index
    %227 = vector.load %arg9[%226, %c0_72] : memref<64x128xf32, #tpu.memory_space<vmem>>, vector<8x128xf32>
    tpu.vector_store %arg9[%226, %c0_72], %225 {strides = array<i32>} : memref<64x128xf32, #tpu.memory_space<vmem>>, vector<8x128xf32>,
    %c6_i32 = arith.constant 6 : i32
    %c8_i32_73 = arith.constant 8 : i32
    %228 = arith.muli %c6_i32, %c8_i32_73 : i32
    %229 = tpu.assume_multiple %228, 8 : i32
    %230 = arith.index_cast %229 : i32 to index
    %c0_74 = arith.constant 0 : index
    %231 = vector.load %arg8[%230, %c0_74] : memref<64x512xf32, #tpu.memory_space<vmem>>, vector<8x512xf32>
    %232 = arith.truncf %225 : vector<8x128xf32> to vector<8x128xbf16>
    %c0_75 = arith.constant 0 : index
    %c0_76 = arith.constant 0 : index
    %c0_77 = arith.constant 0 : index
    %233 = vector.load %arg3[%c0_75, %c0_76, %c0_77] : memref<3x128x512xbf16, #tpu.memory_space<vmem>>, vector<1x128x512xbf16>
    %234 = vector.shape_cast %233 : vector<1x128x512xbf16> to vector<128x512xbf16>
    %cst_78 = arith.constant dense<0.000000e+00> : vector<8x512xf32>
    %235 = tpu.matmul %232, %234, %cst_78 {dimension_numbers = #tpu.dot_dimension_numbers<[1], [0], [0], [1], [0, 0, 1, 1], [], []>} : vector<8x128xbf16>, vector<128x512xbf16>, vector<8x512xf32> -> vector<8x512xf32>
    %236 = arith.addf %231, %235 : vector<8x512xf32>
    %237 = vector.extract_strided_slice %236 {offsets = [0, 0], sizes = [8, 128], strides = [1, 1]} : vector<8x512xf32> to vector<8x128xf32>
    %238 = arith.negf %237 : vector<8x128xf32>
    %239 = math.exp %238 : vector<8x128xf32>
    %cst_79 = arith.constant 1.000000e+00 : f32
    %240 = vector.broadcast %cst_79 : f32 to vector<8x128xf32>
    %241 = arith.addf %240, %239 : vector<8x128xf32>
    %242 = arith.divf %240, %241 : vector<8x128xf32>
    %243 = vector.extract_strided_slice %236 {offsets = [0, 128], sizes = [8, 128], strides = [1, 1]} : vector<8x512xf32> to vector<8x128xf32>
    %244 = arith.negf %243 : vector<8x128xf32>
    %245 = math.exp %244 : vector<8x128xf32>
    %cst_80 = arith.constant 1.000000e+00 : f32
    %246 = vector.broadcast %cst_80 : f32 to vector<8x128xf32>
    %247 = arith.addf %246, %245 : vector<8x128xf32>
    %248 = arith.divf %246, %247 : vector<8x128xf32>
    %249 = vector.extract_strided_slice %236 {offsets = [0, 256], sizes = [8, 128], strides = [1, 1]} : vector<8x512xf32> to vector<8x128xf32>
    %250 = math.tanh %249 : vector<8x128xf32>
    %251 = vector.extract_strided_slice %236 {offsets = [0, 384], sizes = [8, 128], strides = [1, 1]} : vector<8x512xf32> to vector<8x128xf32>
    %252 = arith.negf %251 : vector<8x128xf32>
    %253 = math.exp %252 : vector<8x128xf32>
    %cst_81 = arith.constant 1.000000e+00 : f32
    %254 = vector.broadcast %cst_81 : f32 to vector<8x128xf32>
    %255 = arith.addf %254, %253 : vector<8x128xf32>
    %256 = arith.divf %254, %255 : vector<8x128xf32>
    %257 = arith.mulf %248, %223 : vector<8x128xf32>
    %258 = arith.mulf %242, %250 : vector<8x128xf32>
    %259 = arith.addf %257, %258 : vector<8x128xf32>
    %260 = math.tanh %259 : vector<8x128xf32>
    %261 = arith.mulf %256, %260 : vector<8x128xf32>
    %262 = arith.index_cast %229 : i32 to index
    %c0_82 = arith.constant 0 : index
    %263 = vector.load %arg9[%262, %c0_82] : memref<64x128xf32, #tpu.memory_space<vmem>>, vector<8x128xf32>
    tpu.vector_store %arg9[%262, %c0_82], %261 {strides = array<i32>} : memref<64x128xf32, #tpu.memory_space<vmem>>, vector<8x128xf32>,
    %c7_i32 = arith.constant 7 : i32
    %c8_i32_83 = arith.constant 8 : i32
    %264 = arith.muli %c7_i32, %c8_i32_83 : i32
    %265 = tpu.assume_multiple %264, 8 : i32
    %266 = arith.index_cast %265 : i32 to index
    %c0_84 = arith.constant 0 : index
    %267 = vector.load %arg8[%266, %c0_84] : memref<64x512xf32, #tpu.memory_space<vmem>>, vector<8x512xf32>
    %268 = arith.truncf %261 : vector<8x128xf32> to vector<8x128xbf16>
    %c0_85 = arith.constant 0 : index
    %c0_86 = arith.constant 0 : index
    %c0_87 = arith.constant 0 : index
    %269 = vector.load %arg3[%c0_85, %c0_86, %c0_87] : memref<3x128x512xbf16, #tpu.memory_space<vmem>>, vector<1x128x512xbf16>
    %270 = vector.shape_cast %269 : vector<1x128x512xbf16> to vector<128x512xbf16>
    %cst_88 = arith.constant dense<0.000000e+00> : vector<8x512xf32>
    %271 = tpu.matmul %268, %270, %cst_88 {dimension_numbers = #tpu.dot_dimension_numbers<[1], [0], [0], [1], [0, 0, 1, 1], [], []>} : vector<8x128xbf16>, vector<128x512xbf16>, vector<8x512xf32> -> vector<8x512xf32>
    %272 = arith.addf %267, %271 : vector<8x512xf32>
    %273 = vector.extract_strided_slice %272 {offsets = [0, 0], sizes = [8, 128], strides = [1, 1]} : vector<8x512xf32> to vector<8x128xf32>
    %274 = arith.negf %273 : vector<8x128xf32>
    %275 = math.exp %274 : vector<8x128xf32>
    %cst_89 = arith.constant 1.000000e+00 : f32
    %276 = vector.broadcast %cst_89 : f32 to vector<8x128xf32>
    %277 = arith.addf %276, %275 : vector<8x128xf32>
    %278 = arith.divf %276, %277 : vector<8x128xf32>
    %279 = vector.extract_strided_slice %272 {offsets = [0, 128], sizes = [8, 128], strides = [1, 1]} : vector<8x512xf32> to vector<8x128xf32>
    %280 = arith.negf %279 : vector<8x128xf32>
    %281 = math.exp %280 : vector<8x128xf32>
    %cst_90 = arith.constant 1.000000e+00 : f32
    %282 = vector.broadcast %cst_90 : f32 to vector<8x128xf32>
    %283 = arith.addf %282, %281 : vector<8x128xf32>
    %284 = arith.divf %282, %283 : vector<8x128xf32>
    %285 = vector.extract_strided_slice %272 {offsets = [0, 256], sizes = [8, 128], strides = [1, 1]} : vector<8x512xf32> to vector<8x128xf32>
    %286 = math.tanh %285 : vector<8x128xf32>
    %287 = vector.extract_strided_slice %272 {offsets = [0, 384], sizes = [8, 128], strides = [1, 1]} : vector<8x512xf32> to vector<8x128xf32>
    %288 = arith.negf %287 : vector<8x128xf32>
    %289 = math.exp %288 : vector<8x128xf32>
    %cst_91 = arith.constant 1.000000e+00 : f32
    %290 = vector.broadcast %cst_91 : f32 to vector<8x128xf32>
    %291 = arith.addf %290, %289 : vector<8x128xf32>
    %292 = arith.divf %290, %291 : vector<8x128xf32>
    %293 = arith.mulf %284, %259 : vector<8x128xf32>
    %294 = arith.mulf %278, %286 : vector<8x128xf32>
    %295 = arith.addf %293, %294 : vector<8x128xf32>
    %296 = math.tanh %295 : vector<8x128xf32>
    %297 = arith.mulf %292, %296 : vector<8x128xf32>
    %298 = arith.index_cast %265 : i32 to index
    %c0_92 = arith.constant 0 : index
    %299 = vector.load %arg9[%298, %c0_92] : memref<64x128xf32, #tpu.memory_space<vmem>>, vector<8x128xf32>
    tpu.vector_store %arg9[%298, %c0_92], %297 {strides = array<i32>} : memref<64x128xf32, #tpu.memory_space<vmem>>, vector<8x128xf32>,
    %c8_i32_93 = arith.constant 8 : i32
    %c0_94 = arith.constant 0 : index
    %c0_95 = arith.constant 0 : index
    %300 = vector.load %arg9[%c0_94, %c0_95] : memref<64x128xf32, #tpu.memory_space<vmem>>, vector<64x128xf32>
    %301 = arith.truncf %300 : vector<64x128xf32> to vector<64x128xbf16>
    %c0_96 = arith.constant 0 : index
    %c0_97 = arith.constant 0 : index
    %c0_98 = arith.constant 0 : index
    %302 = vector.load %arg2[%c0_96, %c0_97, %c0_98] : memref<2x128x512xbf16, #tpu.memory_space<vmem>>, vector<1x128x512xbf16>
    %303 = vector.shape_cast %302 : vector<1x128x512xbf16> to vector<128x512xbf16>
    %cst_99 = arith.constant dense<0.000000e+00> : vector<64x512xf32>
    %304 = tpu.matmul %301, %303, %cst_99 {dimension_numbers = #tpu.dot_dimension_numbers<[1], [0], [0], [1], [0, 0, 1, 1], [], []>} : vector<64x128xbf16>, vector<128x512xbf16>, vector<64x512xf32> -> vector<64x512xf32>
    %c1 = arith.constant 1 : index
    %c0_100 = arith.constant 0 : index
    %c0_101 = arith.constant 0 : index
    %305 = vector.load %arg4[%c1, %c0_100, %c0_101] : memref<3x1x512xf32, #tpu.memory_space<vmem>>, vector<1x1x512xf32>
    %306 = vector.shape_cast %305 : vector<1x1x512xf32> to vector<1x512xf32>
    %307 = vector.broadcast %306 : vector<1x512xf32> to vector<64x512xf32>
    %308 = arith.addf %304, %307 : vector<64x512xf32>
    %c0_102 = arith.constant 0 : index
    %c0_103 = arith.constant 0 : index
    %309 = vector.load %arg8[%c0_102, %c0_103] : memref<64x512xf32, #tpu.memory_space<vmem>>, vector<64x512xf32>
    tpu.vector_store %arg8[%c0_102, %c0_103], %308 {strides = array<i32>} : memref<64x512xf32, #tpu.memory_space<vmem>>, vector<64x512xf32>,
    %c1_104 = arith.constant 1 : index
    %c0_105 = arith.constant 0 : index
    %c0_106 = arith.constant 0 : index
    %310 = vector.load %arg5[%c1_104, %c0_105, %c0_106] : memref<3x8x128xf32, #tpu.memory_space<vmem>>, vector<1x8x128xf32>
    %311 = vector.shape_cast %310 : vector<1x8x128xf32> to vector<8x128xf32>
    %c1_107 = arith.constant 1 : index
    %c0_108 = arith.constant 0 : index
    %c0_109 = arith.constant 0 : index
    %312 = vector.load %arg6[%c1_107, %c0_108, %c0_109] : memref<3x8x128xf32, #tpu.memory_space<vmem>>, vector<1x8x128xf32>
    %313 = vector.shape_cast %312 : vector<1x8x128xf32> to vector<8x128xf32>
    %c0_i32_110 = arith.constant 0 : i32
    %c8_i32_111 = arith.constant 8 : i32
    %314 = arith.muli %c0_i32_110, %c8_i32_111 : i32
    %315 = tpu.assume_multiple %314, 8 : i32
    %316 = arith.index_cast %315 : i32 to index
    %c0_112 = arith.constant 0 : index
    %317 = vector.load %arg8[%316, %c0_112] : memref<64x512xf32, #tpu.memory_space<vmem>>, vector<8x512xf32>
    %318 = arith.truncf %311 : vector<8x128xf32> to vector<8x128xbf16>
    %c1_113 = arith.constant 1 : index
    %c0_114 = arith.constant 0 : index
    %c0_115 = arith.constant 0 : index
    %319 = vector.load %arg3[%c1_113, %c0_114, %c0_115] : memref<3x128x512xbf16, #tpu.memory_space<vmem>>, vector<1x128x512xbf16>
    %320 = vector.shape_cast %319 : vector<1x128x512xbf16> to vector<128x512xbf16>
    %cst_116 = arith.constant dense<0.000000e+00> : vector<8x512xf32>
    %321 = tpu.matmul %318, %320, %cst_116 {dimension_numbers = #tpu.dot_dimension_numbers<[1], [0], [0], [1], [0, 0, 1, 1], [], []>} : vector<8x128xbf16>, vector<128x512xbf16>, vector<8x512xf32> -> vector<8x512xf32>
    %322 = arith.addf %317, %321 : vector<8x512xf32>
    %323 = vector.extract_strided_slice %322 {offsets = [0, 0], sizes = [8, 128], strides = [1, 1]} : vector<8x512xf32> to vector<8x128xf32>
    %324 = arith.negf %323 : vector<8x128xf32>
    %325 = math.exp %324 : vector<8x128xf32>
    %cst_117 = arith.constant 1.000000e+00 : f32
    %326 = vector.broadcast %cst_117 : f32 to vector<8x128xf32>
    %327 = arith.addf %326, %325 : vector<8x128xf32>
    %328 = arith.divf %326, %327 : vector<8x128xf32>
    %329 = vector.extract_strided_slice %322 {offsets = [0, 128], sizes = [8, 128], strides = [1, 1]} : vector<8x512xf32> to vector<8x128xf32>
    %330 = arith.negf %329 : vector<8x128xf32>
    %331 = math.exp %330 : vector<8x128xf32>
    %cst_118 = arith.constant 1.000000e+00 : f32
    %332 = vector.broadcast %cst_118 : f32 to vector<8x128xf32>
    %333 = arith.addf %332, %331 : vector<8x128xf32>
    %334 = arith.divf %332, %333 : vector<8x128xf32>
    %335 = vector.extract_strided_slice %322 {offsets = [0, 256], sizes = [8, 128], strides = [1, 1]} : vector<8x512xf32> to vector<8x128xf32>
    %336 = math.tanh %335 : vector<8x128xf32>
    %337 = vector.extract_strided_slice %322 {offsets = [0, 384], sizes = [8, 128], strides = [1, 1]} : vector<8x512xf32> to vector<8x128xf32>
    %338 = arith.negf %337 : vector<8x128xf32>
    %339 = math.exp %338 : vector<8x128xf32>
    %cst_119 = arith.constant 1.000000e+00 : f32
    %340 = vector.broadcast %cst_119 : f32 to vector<8x128xf32>
    %341 = arith.addf %340, %339 : vector<8x128xf32>
    %342 = arith.divf %340, %341 : vector<8x128xf32>
    %343 = arith.mulf %334, %313 : vector<8x128xf32>
    %344 = arith.mulf %328, %336 : vector<8x128xf32>
    %345 = arith.addf %343, %344 : vector<8x128xf32>
    %346 = math.tanh %345 : vector<8x128xf32>
    %347 = arith.mulf %342, %346 : vector<8x128xf32>
    %348 = arith.index_cast %315 : i32 to index
    %c0_120 = arith.constant 0 : index
    %349 = vector.load %arg9[%348, %c0_120] : memref<64x128xf32, #tpu.memory_space<vmem>>, vector<8x128xf32>
    tpu.vector_store %arg9[%348, %c0_120], %347 {strides = array<i32>} : memref<64x128xf32, #tpu.memory_space<vmem>>, vector<8x128xf32>,
    %c1_i32_121 = arith.constant 1 : i32
    %c8_i32_122 = arith.constant 8 : i32
    %350 = arith.muli %c1_i32_121, %c8_i32_122 : i32
    %351 = tpu.assume_multiple %350, 8 : i32
    %352 = arith.index_cast %351 : i32 to index
    %c0_123 = arith.constant 0 : index
    %353 = vector.load %arg8[%352, %c0_123] : memref<64x512xf32, #tpu.memory_space<vmem>>, vector<8x512xf32>
    %354 = arith.truncf %347 : vector<8x128xf32> to vector<8x128xbf16>
    %c1_124 = arith.constant 1 : index
    %c0_125 = arith.constant 0 : index
    %c0_126 = arith.constant 0 : index
    %355 = vector.load %arg3[%c1_124, %c0_125, %c0_126] : memref<3x128x512xbf16, #tpu.memory_space<vmem>>, vector<1x128x512xbf16>
    %356 = vector.shape_cast %355 : vector<1x128x512xbf16> to vector<128x512xbf16>
    %cst_127 = arith.constant dense<0.000000e+00> : vector<8x512xf32>
    %357 = tpu.matmul %354, %356, %cst_127 {dimension_numbers = #tpu.dot_dimension_numbers<[1], [0], [0], [1], [0, 0, 1, 1], [], []>} : vector<8x128xbf16>, vector<128x512xbf16>, vector<8x512xf32> -> vector<8x512xf32>
    %358 = arith.addf %353, %357 : vector<8x512xf32>
    %359 = vector.extract_strided_slice %358 {offsets = [0, 0], sizes = [8, 128], strides = [1, 1]} : vector<8x512xf32> to vector<8x128xf32>
    %360 = arith.negf %359 : vector<8x128xf32>
    %361 = math.exp %360 : vector<8x128xf32>
    %cst_128 = arith.constant 1.000000e+00 : f32
    %362 = vector.broadcast %cst_128 : f32 to vector<8x128xf32>
    %363 = arith.addf %362, %361 : vector<8x128xf32>
    %364 = arith.divf %362, %363 : vector<8x128xf32>
    %365 = vector.extract_strided_slice %358 {offsets = [0, 128], sizes = [8, 128], strides = [1, 1]} : vector<8x512xf32> to vector<8x128xf32>
    %366 = arith.negf %365 : vector<8x128xf32>
    %367 = math.exp %366 : vector<8x128xf32>
    %cst_129 = arith.constant 1.000000e+00 : f32
    %368 = vector.broadcast %cst_129 : f32 to vector<8x128xf32>
    %369 = arith.addf %368, %367 : vector<8x128xf32>
    %370 = arith.divf %368, %369 : vector<8x128xf32>
    %371 = vector.extract_strided_slice %358 {offsets = [0, 256], sizes = [8, 128], strides = [1, 1]} : vector<8x512xf32> to vector<8x128xf32>
    %372 = math.tanh %371 : vector<8x128xf32>
    %373 = vector.extract_strided_slice %358 {offsets = [0, 384], sizes = [8, 128], strides = [1, 1]} : vector<8x512xf32> to vector<8x128xf32>
    %374 = arith.negf %373 : vector<8x128xf32>
    %375 = math.exp %374 : vector<8x128xf32>
    %cst_130 = arith.constant 1.000000e+00 : f32
    %376 = vector.broadcast %cst_130 : f32 to vector<8x128xf32>
    %377 = arith.addf %376, %375 : vector<8x128xf32>
    %378 = arith.divf %376, %377 : vector<8x128xf32>
    %379 = arith.mulf %370, %345 : vector<8x128xf32>
    %380 = arith.mulf %364, %372 : vector<8x128xf32>
    %381 = arith.addf %379, %380 : vector<8x128xf32>
    %382 = math.tanh %381 : vector<8x128xf32>
    %383 = arith.mulf %378, %382 : vector<8x128xf32>
    %384 = arith.index_cast %351 : i32 to index
    %c0_131 = arith.constant 0 : index
    %385 = vector.load %arg9[%384, %c0_131] : memref<64x128xf32, #tpu.memory_space<vmem>>, vector<8x128xf32>
    tpu.vector_store %arg9[%384, %c0_131], %383 {strides = array<i32>} : memref<64x128xf32, #tpu.memory_space<vmem>>, vector<8x128xf32>,
    %c2_i32_132 = arith.constant 2 : i32
    %c8_i32_133 = arith.constant 8 : i32
    %386 = arith.muli %c2_i32_132, %c8_i32_133 : i32
    %387 = tpu.assume_multiple %386, 8 : i32
    %388 = arith.index_cast %387 : i32 to index
    %c0_134 = arith.constant 0 : index
    %389 = vector.load %arg8[%388, %c0_134] : memref<64x512xf32, #tpu.memory_space<vmem>>, vector<8x512xf32>
    %390 = arith.truncf %383 : vector<8x128xf32> to vector<8x128xbf16>
    %c1_135 = arith.constant 1 : index
    %c0_136 = arith.constant 0 : index
    %c0_137 = arith.constant 0 : index
    %391 = vector.load %arg3[%c1_135, %c0_136, %c0_137] : memref<3x128x512xbf16, #tpu.memory_space<vmem>>, vector<1x128x512xbf16>
    %392 = vector.shape_cast %391 : vector<1x128x512xbf16> to vector<128x512xbf16>
    %cst_138 = arith.constant dense<0.000000e+00> : vector<8x512xf32>
    %393 = tpu.matmul %390, %392, %cst_138 {dimension_numbers = #tpu.dot_dimension_numbers<[1], [0], [0], [1], [0, 0, 1, 1], [], []>} : vector<8x128xbf16>, vector<128x512xbf16>, vector<8x512xf32> -> vector<8x512xf32>
    %394 = arith.addf %389, %393 : vector<8x512xf32>
    %395 = vector.extract_strided_slice %394 {offsets = [0, 0], sizes = [8, 128], strides = [1, 1]} : vector<8x512xf32> to vector<8x128xf32>
    %396 = arith.negf %395 : vector<8x128xf32>
    %397 = math.exp %396 : vector<8x128xf32>
    %cst_139 = arith.constant 1.000000e+00 : f32
    %398 = vector.broadcast %cst_139 : f32 to vector<8x128xf32>
    %399 = arith.addf %398, %397 : vector<8x128xf32>
    %400 = arith.divf %398, %399 : vector<8x128xf32>
    %401 = vector.extract_strided_slice %394 {offsets = [0, 128], sizes = [8, 128], strides = [1, 1]} : vector<8x512xf32> to vector<8x128xf32>
    %402 = arith.negf %401 : vector<8x128xf32>
    %403 = math.exp %402 : vector<8x128xf32>
    %cst_140 = arith.constant 1.000000e+00 : f32
    %404 = vector.broadcast %cst_140 : f32 to vector<8x128xf32>
    %405 = arith.addf %404, %403 : vector<8x128xf32>
    %406 = arith.divf %404, %405 : vector<8x128xf32>
    %407 = vector.extract_strided_slice %394 {offsets = [0, 256], sizes = [8, 128], strides = [1, 1]} : vector<8x512xf32> to vector<8x128xf32>
    %408 = math.tanh %407 : vector<8x128xf32>
    %409 = vector.extract_strided_slice %394 {offsets = [0, 384], sizes = [8, 128], strides = [1, 1]} : vector<8x512xf32> to vector<8x128xf32>
    %410 = arith.negf %409 : vector<8x128xf32>
    %411 = math.exp %410 : vector<8x128xf32>
    %cst_141 = arith.constant 1.000000e+00 : f32
    %412 = vector.broadcast %cst_141 : f32 to vector<8x128xf32>
    %413 = arith.addf %412, %411 : vector<8x128xf32>
    %414 = arith.divf %412, %413 : vector<8x128xf32>
    %415 = arith.mulf %406, %381 : vector<8x128xf32>
    %416 = arith.mulf %400, %408 : vector<8x128xf32>
    %417 = arith.addf %415, %416 : vector<8x128xf32>
    %418 = math.tanh %417 : vector<8x128xf32>
    %419 = arith.mulf %414, %418 : vector<8x128xf32>
    %420 = arith.index_cast %387 : i32 to index
    %c0_142 = arith.constant 0 : index
    %421 = vector.load %arg9[%420, %c0_142] : memref<64x128xf32, #tpu.memory_space<vmem>>, vector<8x128xf32>
    tpu.vector_store %arg9[%420, %c0_142], %419 {strides = array<i32>} : memref<64x128xf32, #tpu.memory_space<vmem>>, vector<8x128xf32>,
    %c3_i32_143 = arith.constant 3 : i32
    %c8_i32_144 = arith.constant 8 : i32
    %422 = arith.muli %c3_i32_143, %c8_i32_144 : i32
    %423 = tpu.assume_multiple %422, 8 : i32
    %424 = arith.index_cast %423 : i32 to index
    %c0_145 = arith.constant 0 : index
    %425 = vector.load %arg8[%424, %c0_145] : memref<64x512xf32, #tpu.memory_space<vmem>>, vector<8x512xf32>
    %426 = arith.truncf %419 : vector<8x128xf32> to vector<8x128xbf16>
    %c1_146 = arith.constant 1 : index
    %c0_147 = arith.constant 0 : index
    %c0_148 = arith.constant 0 : index
    %427 = vector.load %arg3[%c1_146, %c0_147, %c0_148] : memref<3x128x512xbf16, #tpu.memory_space<vmem>>, vector<1x128x512xbf16>
    %428 = vector.shape_cast %427 : vector<1x128x512xbf16> to vector<128x512xbf16>
    %cst_149 = arith.constant dense<0.000000e+00> : vector<8x512xf32>
    %429 = tpu.matmul %426, %428, %cst_149 {dimension_numbers = #tpu.dot_dimension_numbers<[1], [0], [0], [1], [0, 0, 1, 1], [], []>} : vector<8x128xbf16>, vector<128x512xbf16>, vector<8x512xf32> -> vector<8x512xf32>
    %430 = arith.addf %425, %429 : vector<8x512xf32>
    %431 = vector.extract_strided_slice %430 {offsets = [0, 0], sizes = [8, 128], strides = [1, 1]} : vector<8x512xf32> to vector<8x128xf32>
    %432 = arith.negf %431 : vector<8x128xf32>
    %433 = math.exp %432 : vector<8x128xf32>
    %cst_150 = arith.constant 1.000000e+00 : f32
    %434 = vector.broadcast %cst_150 : f32 to vector<8x128xf32>
    %435 = arith.addf %434, %433 : vector<8x128xf32>
    %436 = arith.divf %434, %435 : vector<8x128xf32>
    %437 = vector.extract_strided_slice %430 {offsets = [0, 128], sizes = [8, 128], strides = [1, 1]} : vector<8x512xf32> to vector<8x128xf32>
    %438 = arith.negf %437 : vector<8x128xf32>
    %439 = math.exp %438 : vector<8x128xf32>
    %cst_151 = arith.constant 1.000000e+00 : f32
    %440 = vector.broadcast %cst_151 : f32 to vector<8x128xf32>
    %441 = arith.addf %440, %439 : vector<8x128xf32>
    %442 = arith.divf %440, %441 : vector<8x128xf32>
    %443 = vector.extract_strided_slice %430 {offsets = [0, 256], sizes = [8, 128], strides = [1, 1]} : vector<8x512xf32> to vector<8x128xf32>
    %444 = math.tanh %443 : vector<8x128xf32>
    %445 = vector.extract_strided_slice %430 {offsets = [0, 384], sizes = [8, 128], strides = [1, 1]} : vector<8x512xf32> to vector<8x128xf32>
    %446 = arith.negf %445 : vector<8x128xf32>
    %447 = math.exp %446 : vector<8x128xf32>
    %cst_152 = arith.constant 1.000000e+00 : f32
    %448 = vector.broadcast %cst_152 : f32 to vector<8x128xf32>
    %449 = arith.addf %448, %447 : vector<8x128xf32>
    %450 = arith.divf %448, %449 : vector<8x128xf32>
    %451 = arith.mulf %442, %417 : vector<8x128xf32>
    %452 = arith.mulf %436, %444 : vector<8x128xf32>
    %453 = arith.addf %451, %452 : vector<8x128xf32>
    %454 = math.tanh %453 : vector<8x128xf32>
    %455 = arith.mulf %450, %454 : vector<8x128xf32>
    %456 = arith.index_cast %423 : i32 to index
    %c0_153 = arith.constant 0 : index
    %457 = vector.load %arg9[%456, %c0_153] : memref<64x128xf32, #tpu.memory_space<vmem>>, vector<8x128xf32>
    tpu.vector_store %arg9[%456, %c0_153], %455 {strides = array<i32>} : memref<64x128xf32, #tpu.memory_space<vmem>>, vector<8x128xf32>,
    %c4_i32_154 = arith.constant 4 : i32
    %c8_i32_155 = arith.constant 8 : i32
    %458 = arith.muli %c4_i32_154, %c8_i32_155 : i32
    %459 = tpu.assume_multiple %458, 8 : i32
    %460 = arith.index_cast %459 : i32 to index
    %c0_156 = arith.constant 0 : index
    %461 = vector.load %arg8[%460, %c0_156] : memref<64x512xf32, #tpu.memory_space<vmem>>, vector<8x512xf32>
    %462 = arith.truncf %455 : vector<8x128xf32> to vector<8x128xbf16>
    %c1_157 = arith.constant 1 : index
    %c0_158 = arith.constant 0 : index
    %c0_159 = arith.constant 0 : index
    %463 = vector.load %arg3[%c1_157, %c0_158, %c0_159] : memref<3x128x512xbf16, #tpu.memory_space<vmem>>, vector<1x128x512xbf16>
    %464 = vector.shape_cast %463 : vector<1x128x512xbf16> to vector<128x512xbf16>
    %cst_160 = arith.constant dense<0.000000e+00> : vector<8x512xf32>
    %465 = tpu.matmul %462, %464, %cst_160 {dimension_numbers = #tpu.dot_dimension_numbers<[1], [0], [0], [1], [0, 0, 1, 1], [], []>} : vector<8x128xbf16>, vector<128x512xbf16>, vector<8x512xf32> -> vector<8x512xf32>
    %466 = arith.addf %461, %465 : vector<8x512xf32>
    %467 = vector.extract_strided_slice %466 {offsets = [0, 0], sizes = [8, 128], strides = [1, 1]} : vector<8x512xf32> to vector<8x128xf32>
    %468 = arith.negf %467 : vector<8x128xf32>
    %469 = math.exp %468 : vector<8x128xf32>
    %cst_161 = arith.constant 1.000000e+00 : f32
    %470 = vector.broadcast %cst_161 : f32 to vector<8x128xf32>
    %471 = arith.addf %470, %469 : vector<8x128xf32>
    %472 = arith.divf %470, %471 : vector<8x128xf32>
    %473 = vector.extract_strided_slice %466 {offsets = [0, 128], sizes = [8, 128], strides = [1, 1]} : vector<8x512xf32> to vector<8x128xf32>
    %474 = arith.negf %473 : vector<8x128xf32>
    %475 = math.exp %474 : vector<8x128xf32>
    %cst_162 = arith.constant 1.000000e+00 : f32
    %476 = vector.broadcast %cst_162 : f32 to vector<8x128xf32>
    %477 = arith.addf %476, %475 : vector<8x128xf32>
    %478 = arith.divf %476, %477 : vector<8x128xf32>
    %479 = vector.extract_strided_slice %466 {offsets = [0, 256], sizes = [8, 128], strides = [1, 1]} : vector<8x512xf32> to vector<8x128xf32>
    %480 = math.tanh %479 : vector<8x128xf32>
    %481 = vector.extract_strided_slice %466 {offsets = [0, 384], sizes = [8, 128], strides = [1, 1]} : vector<8x512xf32> to vector<8x128xf32>
    %482 = arith.negf %481 : vector<8x128xf32>
    %483 = math.exp %482 : vector<8x128xf32>
    %cst_163 = arith.constant 1.000000e+00 : f32
    %484 = vector.broadcast %cst_163 : f32 to vector<8x128xf32>
    %485 = arith.addf %484, %483 : vector<8x128xf32>
    %486 = arith.divf %484, %485 : vector<8x128xf32>
    %487 = arith.mulf %478, %453 : vector<8x128xf32>
    %488 = arith.mulf %472, %480 : vector<8x128xf32>
    %489 = arith.addf %487, %488 : vector<8x128xf32>
    %490 = math.tanh %489 : vector<8x128xf32>
    %491 = arith.mulf %486, %490 : vector<8x128xf32>
    %492 = arith.index_cast %459 : i32 to index
    %c0_164 = arith.constant 0 : index
    %493 = vector.load %arg9[%492, %c0_164] : memref<64x128xf32, #tpu.memory_space<vmem>>, vector<8x128xf32>
    tpu.vector_store %arg9[%492, %c0_164], %491 {strides = array<i32>} : memref<64x128xf32, #tpu.memory_space<vmem>>, vector<8x128xf32>,
    %c5_i32_165 = arith.constant 5 : i32
    %c8_i32_166 = arith.constant 8 : i32
    %494 = arith.muli %c5_i32_165, %c8_i32_166 : i32
    %495 = tpu.assume_multiple %494, 8 : i32
    %496 = arith.index_cast %495 : i32 to index
    %c0_167 = arith.constant 0 : index
    %497 = vector.load %arg8[%496, %c0_167] : memref<64x512xf32, #tpu.memory_space<vmem>>, vector<8x512xf32>
    %498 = arith.truncf %491 : vector<8x128xf32> to vector<8x128xbf16>
    %c1_168 = arith.constant 1 : index
    %c0_169 = arith.constant 0 : index
    %c0_170 = arith.constant 0 : index
    %499 = vector.load %arg3[%c1_168, %c0_169, %c0_170] : memref<3x128x512xbf16, #tpu.memory_space<vmem>>, vector<1x128x512xbf16>
    %500 = vector.shape_cast %499 : vector<1x128x512xbf16> to vector<128x512xbf16>
    %cst_171 = arith.constant dense<0.000000e+00> : vector<8x512xf32>
    %501 = tpu.matmul %498, %500, %cst_171 {dimension_numbers = #tpu.dot_dimension_numbers<[1], [0], [0], [1], [0, 0, 1, 1], [], []>} : vector<8x128xbf16>, vector<128x512xbf16>, vector<8x512xf32> -> vector<8x512xf32>
    %502 = arith.addf %497, %501 : vector<8x512xf32>
    %503 = vector.extract_strided_slice %502 {offsets = [0, 0], sizes = [8, 128], strides = [1, 1]} : vector<8x512xf32> to vector<8x128xf32>
    %504 = arith.negf %503 : vector<8x128xf32>
    %505 = math.exp %504 : vector<8x128xf32>
    %cst_172 = arith.constant 1.000000e+00 : f32
    %506 = vector.broadcast %cst_172 : f32 to vector<8x128xf32>
    %507 = arith.addf %506, %505 : vector<8x128xf32>
    %508 = arith.divf %506, %507 : vector<8x128xf32>
    %509 = vector.extract_strided_slice %502 {offsets = [0, 128], sizes = [8, 128], strides = [1, 1]} : vector<8x512xf32> to vector<8x128xf32>
    %510 = arith.negf %509 : vector<8x128xf32>
    %511 = math.exp %510 : vector<8x128xf32>
    %cst_173 = arith.constant 1.000000e+00 : f32
    %512 = vector.broadcast %cst_173 : f32 to vector<8x128xf32>
    %513 = arith.addf %512, %511 : vector<8x128xf32>
    %514 = arith.divf %512, %513 : vector<8x128xf32>
    %515 = vector.extract_strided_slice %502 {offsets = [0, 256], sizes = [8, 128], strides = [1, 1]} : vector<8x512xf32> to vector<8x128xf32>
    %516 = math.tanh %515 : vector<8x128xf32>
    %517 = vector.extract_strided_slice %502 {offsets = [0, 384], sizes = [8, 128], strides = [1, 1]} : vector<8x512xf32> to vector<8x128xf32>
    %518 = arith.negf %517 : vector<8x128xf32>
    %519 = math.exp %518 : vector<8x128xf32>
    %cst_174 = arith.constant 1.000000e+00 : f32
    %520 = vector.broadcast %cst_174 : f32 to vector<8x128xf32>
    %521 = arith.addf %520, %519 : vector<8x128xf32>
    %522 = arith.divf %520, %521 : vector<8x128xf32>
    %523 = arith.mulf %514, %489 : vector<8x128xf32>
    %524 = arith.mulf %508, %516 : vector<8x128xf32>
    %525 = arith.addf %523, %524 : vector<8x128xf32>
    %526 = math.tanh %525 : vector<8x128xf32>
    %527 = arith.mulf %522, %526 : vector<8x128xf32>
    %528 = arith.index_cast %495 : i32 to index
    %c0_175 = arith.constant 0 : index
    %529 = vector.load %arg9[%528, %c0_175] : memref<64x128xf32, #tpu.memory_space<vmem>>, vector<8x128xf32>
    tpu.vector_store %arg9[%528, %c0_175], %527 {strides = array<i32>} : memref<64x128xf32, #tpu.memory_space<vmem>>, vector<8x128xf32>,
    %c6_i32_176 = arith.constant 6 : i32
    %c8_i32_177 = arith.constant 8 : i32
    %530 = arith.muli %c6_i32_176, %c8_i32_177 : i32
    %531 = tpu.assume_multiple %530, 8 : i32
    %532 = arith.index_cast %531 : i32 to index
    %c0_178 = arith.constant 0 : index
    %533 = vector.load %arg8[%532, %c0_178] : memref<64x512xf32, #tpu.memory_space<vmem>>, vector<8x512xf32>
    %534 = arith.truncf %527 : vector<8x128xf32> to vector<8x128xbf16>
    %c1_179 = arith.constant 1 : index
    %c0_180 = arith.constant 0 : index
    %c0_181 = arith.constant 0 : index
    %535 = vector.load %arg3[%c1_179, %c0_180, %c0_181] : memref<3x128x512xbf16, #tpu.memory_space<vmem>>, vector<1x128x512xbf16>
    %536 = vector.shape_cast %535 : vector<1x128x512xbf16> to vector<128x512xbf16>
    %cst_182 = arith.constant dense<0.000000e+00> : vector<8x512xf32>
    %537 = tpu.matmul %534, %536, %cst_182 {dimension_numbers = #tpu.dot_dimension_numbers<[1], [0], [0], [1], [0, 0, 1, 1], [], []>} : vector<8x128xbf16>, vector<128x512xbf16>, vector<8x512xf32> -> vector<8x512xf32>
    %538 = arith.addf %533, %537 : vector<8x512xf32>
    %539 = vector.extract_strided_slice %538 {offsets = [0, 0], sizes = [8, 128], strides = [1, 1]} : vector<8x512xf32> to vector<8x128xf32>
    %540 = arith.negf %539 : vector<8x128xf32>
    %541 = math.exp %540 : vector<8x128xf32>
    %cst_183 = arith.constant 1.000000e+00 : f32
    %542 = vector.broadcast %cst_183 : f32 to vector<8x128xf32>
    %543 = arith.addf %542, %541 : vector<8x128xf32>
    %544 = arith.divf %542, %543 : vector<8x128xf32>
    %545 = vector.extract_strided_slice %538 {offsets = [0, 128], sizes = [8, 128], strides = [1, 1]} : vector<8x512xf32> to vector<8x128xf32>
    %546 = arith.negf %545 : vector<8x128xf32>
    %547 = math.exp %546 : vector<8x128xf32>
    %cst_184 = arith.constant 1.000000e+00 : f32
    %548 = vector.broadcast %cst_184 : f32 to vector<8x128xf32>
    %549 = arith.addf %548, %547 : vector<8x128xf32>
    %550 = arith.divf %548, %549 : vector<8x128xf32>
    %551 = vector.extract_strided_slice %538 {offsets = [0, 256], sizes = [8, 128], strides = [1, 1]} : vector<8x512xf32> to vector<8x128xf32>
    %552 = math.tanh %551 : vector<8x128xf32>
    %553 = vector.extract_strided_slice %538 {offsets = [0, 384], sizes = [8, 128], strides = [1, 1]} : vector<8x512xf32> to vector<8x128xf32>
    %554 = arith.negf %553 : vector<8x128xf32>
    %555 = math.exp %554 : vector<8x128xf32>
    %cst_185 = arith.constant 1.000000e+00 : f32
    %556 = vector.broadcast %cst_185 : f32 to vector<8x128xf32>
    %557 = arith.addf %556, %555 : vector<8x128xf32>
    %558 = arith.divf %556, %557 : vector<8x128xf32>
    %559 = arith.mulf %550, %525 : vector<8x128xf32>
    %560 = arith.mulf %544, %552 : vector<8x128xf32>
    %561 = arith.addf %559, %560 : vector<8x128xf32>
    %562 = math.tanh %561 : vector<8x128xf32>
    %563 = arith.mulf %558, %562 : vector<8x128xf32>
    %564 = arith.index_cast %531 : i32 to index
    %c0_186 = arith.constant 0 : index
    %565 = vector.load %arg9[%564, %c0_186] : memref<64x128xf32, #tpu.memory_space<vmem>>, vector<8x128xf32>
    tpu.vector_store %arg9[%564, %c0_186], %563 {strides = array<i32>} : memref<64x128xf32, #tpu.memory_space<vmem>>, vector<8x128xf32>,
    %c7_i32_187 = arith.constant 7 : i32
    %c8_i32_188 = arith.constant 8 : i32
    %566 = arith.muli %c7_i32_187, %c8_i32_188 : i32
    %567 = tpu.assume_multiple %566, 8 : i32
    %568 = arith.index_cast %567 : i32 to index
    %c0_189 = arith.constant 0 : index
    %569 = vector.load %arg8[%568, %c0_189] : memref<64x512xf32, #tpu.memory_space<vmem>>, vector<8x512xf32>
    %570 = arith.truncf %563 : vector<8x128xf32> to vector<8x128xbf16>
    %c1_190 = arith.constant 1 : index
    %c0_191 = arith.constant 0 : index
    %c0_192 = arith.constant 0 : index
    %571 = vector.load %arg3[%c1_190, %c0_191, %c0_192] : memref<3x128x512xbf16, #tpu.memory_space<vmem>>, vector<1x128x512xbf16>
    %572 = vector.shape_cast %571 : vector<1x128x512xbf16> to vector<128x512xbf16>
    %cst_193 = arith.constant dense<0.000000e+00> : vector<8x512xf32>
    %573 = tpu.matmul %570, %572, %cst_193 {dimension_numbers = #tpu.dot_dimension_numbers<[1], [0], [0], [1], [0, 0, 1, 1], [], []>} : vector<8x128xbf16>, vector<128x512xbf16>, vector<8x512xf32> -> vector<8x512xf32>
    %574 = arith.addf %569, %573 : vector<8x512xf32>
    %575 = vector.extract_strided_slice %574 {offsets = [0, 0], sizes = [8, 128], strides = [1, 1]} : vector<8x512xf32> to vector<8x128xf32>
    %576 = arith.negf %575 : vector<8x128xf32>
    %577 = math.exp %576 : vector<8x128xf32>
    %cst_194 = arith.constant 1.000000e+00 : f32
    %578 = vector.broadcast %cst_194 : f32 to vector<8x128xf32>
    %579 = arith.addf %578, %577 : vector<8x128xf32>
    %580 = arith.divf %578, %579 : vector<8x128xf32>
    %581 = vector.extract_strided_slice %574 {offsets = [0, 128], sizes = [8, 128], strides = [1, 1]} : vector<8x512xf32> to vector<8x128xf32>
    %582 = arith.negf %581 : vector<8x128xf32>
    %583 = math.exp %582 : vector<8x128xf32>
    %cst_195 = arith.constant 1.000000e+00 : f32
    %584 = vector.broadcast %cst_195 : f32 to vector<8x128xf32>
    %585 = arith.addf %584, %583 : vector<8x128xf32>
    %586 = arith.divf %584, %585 : vector<8x128xf32>
    %587 = vector.extract_strided_slice %574 {offsets = [0, 256], sizes = [8, 128], strides = [1, 1]} : vector<8x512xf32> to vector<8x128xf32>
    %588 = math.tanh %587 : vector<8x128xf32>
    %589 = vector.extract_strided_slice %574 {offsets = [0, 384], sizes = [8, 128], strides = [1, 1]} : vector<8x512xf32> to vector<8x128xf32>
    %590 = arith.negf %589 : vector<8x128xf32>
    %591 = math.exp %590 : vector<8x128xf32>
    %cst_196 = arith.constant 1.000000e+00 : f32
    %592 = vector.broadcast %cst_196 : f32 to vector<8x128xf32>
    %593 = arith.addf %592, %591 : vector<8x128xf32>
    %594 = arith.divf %592, %593 : vector<8x128xf32>
    %595 = arith.mulf %586, %561 : vector<8x128xf32>
    %596 = arith.mulf %580, %588 : vector<8x128xf32>
    %597 = arith.addf %595, %596 : vector<8x128xf32>
    %598 = math.tanh %597 : vector<8x128xf32>
    %599 = arith.mulf %594, %598 : vector<8x128xf32>
    %600 = arith.index_cast %567 : i32 to index
    %c0_197 = arith.constant 0 : index
    %601 = vector.load %arg9[%600, %c0_197] : memref<64x128xf32, #tpu.memory_space<vmem>>, vector<8x128xf32>
    tpu.vector_store %arg9[%600, %c0_197], %599 {strides = array<i32>} : memref<64x128xf32, #tpu.memory_space<vmem>>, vector<8x128xf32>,
    %c8_i32_198 = arith.constant 8 : i32
    %c0_199 = arith.constant 0 : index
    %c0_200 = arith.constant 0 : index
    %602 = vector.load %arg9[%c0_199, %c0_200] : memref<64x128xf32, #tpu.memory_space<vmem>>, vector<64x128xf32>
    %603 = arith.truncf %602 : vector<64x128xf32> to vector<64x128xbf16>
    %c1_201 = arith.constant 1 : index
    %c0_202 = arith.constant 0 : index
    %c0_203 = arith.constant 0 : index
    %604 = vector.load %arg2[%c1_201, %c0_202, %c0_203] : memref<2x128x512xbf16, #tpu.memory_space<vmem>>, vector<1x128x512xbf16>
    %605 = vector.shape_cast %604 : vector<1x128x512xbf16> to vector<128x512xbf16>
    %cst_204 = arith.constant dense<0.000000e+00> : vector<64x512xf32>
    %606 = tpu.matmul %603, %605, %cst_204 {dimension_numbers = #tpu.dot_dimension_numbers<[1], [0], [0], [1], [0, 0, 1, 1], [], []>} : vector<64x128xbf16>, vector<128x512xbf16>, vector<64x512xf32> -> vector<64x512xf32>
    %c2 = arith.constant 2 : index
    %c0_205 = arith.constant 0 : index
    %c0_206 = arith.constant 0 : index
    %607 = vector.load %arg4[%c2, %c0_205, %c0_206] : memref<3x1x512xf32, #tpu.memory_space<vmem>>, vector<1x1x512xf32>
    %608 = vector.shape_cast %607 : vector<1x1x512xf32> to vector<1x512xf32>
    %609 = vector.broadcast %608 : vector<1x512xf32> to vector<64x512xf32>
    %610 = arith.addf %606, %609 : vector<64x512xf32>
    %c0_207 = arith.constant 0 : index
    %c0_208 = arith.constant 0 : index
    %611 = vector.load %arg8[%c0_207, %c0_208] : memref<64x512xf32, #tpu.memory_space<vmem>>, vector<64x512xf32>
    tpu.vector_store %arg8[%c0_207, %c0_208], %610 {strides = array<i32>} : memref<64x512xf32, #tpu.memory_space<vmem>>, vector<64x512xf32>,
    %c2_209 = arith.constant 2 : index
    %c0_210 = arith.constant 0 : index
    %c0_211 = arith.constant 0 : index
    %612 = vector.load %arg5[%c2_209, %c0_210, %c0_211] : memref<3x8x128xf32, #tpu.memory_space<vmem>>, vector<1x8x128xf32>
    %613 = vector.shape_cast %612 : vector<1x8x128xf32> to vector<8x128xf32>
    %c2_212 = arith.constant 2 : index
    %c0_213 = arith.constant 0 : index
    %c0_214 = arith.constant 0 : index
    %614 = vector.load %arg6[%c2_212, %c0_213, %c0_214] : memref<3x8x128xf32, #tpu.memory_space<vmem>>, vector<1x8x128xf32>
    %615 = vector.shape_cast %614 : vector<1x8x128xf32> to vector<8x128xf32>
    %c0_i32_215 = arith.constant 0 : i32
    %c8_i32_216 = arith.constant 8 : i32
    %616 = arith.muli %c0_i32_215, %c8_i32_216 : i32
    %617 = tpu.assume_multiple %616, 8 : i32
    %618 = arith.index_cast %617 : i32 to index
    %c0_217 = arith.constant 0 : index
    %619 = vector.load %arg8[%618, %c0_217] : memref<64x512xf32, #tpu.memory_space<vmem>>, vector<8x512xf32>
    %620 = arith.truncf %613 : vector<8x128xf32> to vector<8x128xbf16>
    %c2_218 = arith.constant 2 : index
    %c0_219 = arith.constant 0 : index
    %c0_220 = arith.constant 0 : index
    %621 = vector.load %arg3[%c2_218, %c0_219, %c0_220] : memref<3x128x512xbf16, #tpu.memory_space<vmem>>, vector<1x128x512xbf16>
    %622 = vector.shape_cast %621 : vector<1x128x512xbf16> to vector<128x512xbf16>
    %cst_221 = arith.constant dense<0.000000e+00> : vector<8x512xf32>
    %623 = tpu.matmul %620, %622, %cst_221 {dimension_numbers = #tpu.dot_dimension_numbers<[1], [0], [0], [1], [0, 0, 1, 1], [], []>} : vector<8x128xbf16>, vector<128x512xbf16>, vector<8x512xf32> -> vector<8x512xf32>
    %624 = arith.addf %619, %623 : vector<8x512xf32>
    %625 = vector.extract_strided_slice %624 {offsets = [0, 0], sizes = [8, 128], strides = [1, 1]} : vector<8x512xf32> to vector<8x128xf32>
    %626 = arith.negf %625 : vector<8x128xf32>
    %627 = math.exp %626 : vector<8x128xf32>
    %cst_222 = arith.constant 1.000000e+00 : f32
    %628 = vector.broadcast %cst_222 : f32 to vector<8x128xf32>
    %629 = arith.addf %628, %627 : vector<8x128xf32>
    %630 = arith.divf %628, %629 : vector<8x128xf32>
    %631 = vector.extract_strided_slice %624 {offsets = [0, 128], sizes = [8, 128], strides = [1, 1]} : vector<8x512xf32> to vector<8x128xf32>
    %632 = arith.negf %631 : vector<8x128xf32>
    %633 = math.exp %632 : vector<8x128xf32>
    %cst_223 = arith.constant 1.000000e+00 : f32
    %634 = vector.broadcast %cst_223 : f32 to vector<8x128xf32>
    %635 = arith.addf %634, %633 : vector<8x128xf32>
    %636 = arith.divf %634, %635 : vector<8x128xf32>
    %637 = vector.extract_strided_slice %624 {offsets = [0, 256], sizes = [8, 128], strides = [1, 1]} : vector<8x512xf32> to vector<8x128xf32>
    %638 = math.tanh %637 : vector<8x128xf32>
    %639 = vector.extract_strided_slice %624 {offsets = [0, 384], sizes = [8, 128], strides = [1, 1]} : vector<8x512xf32> to vector<8x128xf32>
    %640 = arith.negf %639 : vector<8x128xf32>
    %641 = math.exp %640 : vector<8x128xf32>
    %cst_224 = arith.constant 1.000000e+00 : f32
    %642 = vector.broadcast %cst_224 : f32 to vector<8x128xf32>
    %643 = arith.addf %642, %641 : vector<8x128xf32>
    %644 = arith.divf %642, %643 : vector<8x128xf32>
    %645 = arith.mulf %636, %615 : vector<8x128xf32>
    %646 = arith.mulf %630, %638 : vector<8x128xf32>
    %647 = arith.addf %645, %646 : vector<8x128xf32>
    %648 = math.tanh %647 : vector<8x128xf32>
    %649 = arith.mulf %644, %648 : vector<8x128xf32>
    %650 = arith.index_cast %617 : i32 to index
    %c0_225 = arith.constant 0 : index
    %651 = vector.load %arg7[%650, %c0_225] : memref<64x128xf32, #tpu.memory_space<vmem>>, vector<8x128xf32>
    tpu.vector_store %arg7[%650, %c0_225], %649 {strides = array<i32>} : memref<64x128xf32, #tpu.memory_space<vmem>>, vector<8x128xf32>,
    %c1_i32_226 = arith.constant 1 : i32
    %c8_i32_227 = arith.constant 8 : i32
    %652 = arith.muli %c1_i32_226, %c8_i32_227 : i32
    %653 = tpu.assume_multiple %652, 8 : i32
    %654 = arith.index_cast %653 : i32 to index
    %c0_228 = arith.constant 0 : index
    %655 = vector.load %arg8[%654, %c0_228] : memref<64x512xf32, #tpu.memory_space<vmem>>, vector<8x512xf32>
    %656 = arith.truncf %649 : vector<8x128xf32> to vector<8x128xbf16>
    %c2_229 = arith.constant 2 : index
    %c0_230 = arith.constant 0 : index
    %c0_231 = arith.constant 0 : index
    %657 = vector.load %arg3[%c2_229, %c0_230, %c0_231] : memref<3x128x512xbf16, #tpu.memory_space<vmem>>, vector<1x128x512xbf16>
    %658 = vector.shape_cast %657 : vector<1x128x512xbf16> to vector<128x512xbf16>
    %cst_232 = arith.constant dense<0.000000e+00> : vector<8x512xf32>
    %659 = tpu.matmul %656, %658, %cst_232 {dimension_numbers = #tpu.dot_dimension_numbers<[1], [0], [0], [1], [0, 0, 1, 1], [], []>} : vector<8x128xbf16>, vector<128x512xbf16>, vector<8x512xf32> -> vector<8x512xf32>
    %660 = arith.addf %655, %659 : vector<8x512xf32>
    %661 = vector.extract_strided_slice %660 {offsets = [0, 0], sizes = [8, 128], strides = [1, 1]} : vector<8x512xf32> to vector<8x128xf32>
    %662 = arith.negf %661 : vector<8x128xf32>
    %663 = math.exp %662 : vector<8x128xf32>
    %cst_233 = arith.constant 1.000000e+00 : f32
    %664 = vector.broadcast %cst_233 : f32 to vector<8x128xf32>
    %665 = arith.addf %664, %663 : vector<8x128xf32>
    %666 = arith.divf %664, %665 : vector<8x128xf32>
    %667 = vector.extract_strided_slice %660 {offsets = [0, 128], sizes = [8, 128], strides = [1, 1]} : vector<8x512xf32> to vector<8x128xf32>
    %668 = arith.negf %667 : vector<8x128xf32>
    %669 = math.exp %668 : vector<8x128xf32>
    %cst_234 = arith.constant 1.000000e+00 : f32
    %670 = vector.broadcast %cst_234 : f32 to vector<8x128xf32>
    %671 = arith.addf %670, %669 : vector<8x128xf32>
    %672 = arith.divf %670, %671 : vector<8x128xf32>
    %673 = vector.extract_strided_slice %660 {offsets = [0, 256], sizes = [8, 128], strides = [1, 1]} : vector<8x512xf32> to vector<8x128xf32>
    %674 = math.tanh %673 : vector<8x128xf32>
    %675 = vector.extract_strided_slice %660 {offsets = [0, 384], sizes = [8, 128], strides = [1, 1]} : vector<8x512xf32> to vector<8x128xf32>
    %676 = arith.negf %675 : vector<8x128xf32>
    %677 = math.exp %676 : vector<8x128xf32>
    %cst_235 = arith.constant 1.000000e+00 : f32
    %678 = vector.broadcast %cst_235 : f32 to vector<8x128xf32>
    %679 = arith.addf %678, %677 : vector<8x128xf32>
    %680 = arith.divf %678, %679 : vector<8x128xf32>
    %681 = arith.mulf %672, %647 : vector<8x128xf32>
    %682 = arith.mulf %666, %674 : vector<8x128xf32>
    %683 = arith.addf %681, %682 : vector<8x128xf32>
    %684 = math.tanh %683 : vector<8x128xf32>
    %685 = arith.mulf %680, %684 : vector<8x128xf32>
    %686 = arith.index_cast %653 : i32 to index
    %c0_236 = arith.constant 0 : index
    %687 = vector.load %arg7[%686, %c0_236] : memref<64x128xf32, #tpu.memory_space<vmem>>, vector<8x128xf32>
    tpu.vector_store %arg7[%686, %c0_236], %685 {strides = array<i32>} : memref<64x128xf32, #tpu.memory_space<vmem>>, vector<8x128xf32>,
    %c2_i32_237 = arith.constant 2 : i32
    %c8_i32_238 = arith.constant 8 : i32
    %688 = arith.muli %c2_i32_237, %c8_i32_238 : i32
    %689 = tpu.assume_multiple %688, 8 : i32
    %690 = arith.index_cast %689 : i32 to index
    %c0_239 = arith.constant 0 : index
    %691 = vector.load %arg8[%690, %c0_239] : memref<64x512xf32, #tpu.memory_space<vmem>>, vector<8x512xf32>
    %692 = arith.truncf %685 : vector<8x128xf32> to vector<8x128xbf16>
    %c2_240 = arith.constant 2 : index
    %c0_241 = arith.constant 0 : index
    %c0_242 = arith.constant 0 : index
    %693 = vector.load %arg3[%c2_240, %c0_241, %c0_242] : memref<3x128x512xbf16, #tpu.memory_space<vmem>>, vector<1x128x512xbf16>
    %694 = vector.shape_cast %693 : vector<1x128x512xbf16> to vector<128x512xbf16>
    %cst_243 = arith.constant dense<0.000000e+00> : vector<8x512xf32>
    %695 = tpu.matmul %692, %694, %cst_243 {dimension_numbers = #tpu.dot_dimension_numbers<[1], [0], [0], [1], [0, 0, 1, 1], [], []>} : vector<8x128xbf16>, vector<128x512xbf16>, vector<8x512xf32> -> vector<8x512xf32>
    %696 = arith.addf %691, %695 : vector<8x512xf32>
    %697 = vector.extract_strided_slice %696 {offsets = [0, 0], sizes = [8, 128], strides = [1, 1]} : vector<8x512xf32> to vector<8x128xf32>
    %698 = arith.negf %697 : vector<8x128xf32>
    %699 = math.exp %698 : vector<8x128xf32>
    %cst_244 = arith.constant 1.000000e+00 : f32
    %700 = vector.broadcast %cst_244 : f32 to vector<8x128xf32>
    %701 = arith.addf %700, %699 : vector<8x128xf32>
    %702 = arith.divf %700, %701 : vector<8x128xf32>
    %703 = vector.extract_strided_slice %696 {offsets = [0, 128], sizes = [8, 128], strides = [1, 1]} : vector<8x512xf32> to vector<8x128xf32>
    %704 = arith.negf %703 : vector<8x128xf32>
    %705 = math.exp %704 : vector<8x128xf32>
    %cst_245 = arith.constant 1.000000e+00 : f32
    %706 = vector.broadcast %cst_245 : f32 to vector<8x128xf32>
    %707 = arith.addf %706, %705 : vector<8x128xf32>
    %708 = arith.divf %706, %707 : vector<8x128xf32>
    %709 = vector.extract_strided_slice %696 {offsets = [0, 256], sizes = [8, 128], strides = [1, 1]} : vector<8x512xf32> to vector<8x128xf32>
    %710 = math.tanh %709 : vector<8x128xf32>
    %711 = vector.extract_strided_slice %696 {offsets = [0, 384], sizes = [8, 128], strides = [1, 1]} : vector<8x512xf32> to vector<8x128xf32>
    %712 = arith.negf %711 : vector<8x128xf32>
    %713 = math.exp %712 : vector<8x128xf32>
    %cst_246 = arith.constant 1.000000e+00 : f32
    %714 = vector.broadcast %cst_246 : f32 to vector<8x128xf32>
    %715 = arith.addf %714, %713 : vector<8x128xf32>
    %716 = arith.divf %714, %715 : vector<8x128xf32>
    %717 = arith.mulf %708, %683 : vector<8x128xf32>
    %718 = arith.mulf %702, %710 : vector<8x128xf32>
    %719 = arith.addf %717, %718 : vector<8x128xf32>
    %720 = math.tanh %719 : vector<8x128xf32>
    %721 = arith.mulf %716, %720 : vector<8x128xf32>
    %722 = arith.index_cast %689 : i32 to index
    %c0_247 = arith.constant 0 : index
    %723 = vector.load %arg7[%722, %c0_247] : memref<64x128xf32, #tpu.memory_space<vmem>>, vector<8x128xf32>
    tpu.vector_store %arg7[%722, %c0_247], %721 {strides = array<i32>} : memref<64x128xf32, #tpu.memory_space<vmem>>, vector<8x128xf32>,
    %c3_i32_248 = arith.constant 3 : i32
    %c8_i32_249 = arith.constant 8 : i32
    %724 = arith.muli %c3_i32_248, %c8_i32_249 : i32
    %725 = tpu.assume_multiple %724, 8 : i32
    %726 = arith.index_cast %725 : i32 to index
    %c0_250 = arith.constant 0 : index
    %727 = vector.load %arg8[%726, %c0_250] : memref<64x512xf32, #tpu.memory_space<vmem>>, vector<8x512xf32>
    %728 = arith.truncf %721 : vector<8x128xf32> to vector<8x128xbf16>
    %c2_251 = arith.constant 2 : index
    %c0_252 = arith.constant 0 : index
    %c0_253 = arith.constant 0 : index
    %729 = vector.load %arg3[%c2_251, %c0_252, %c0_253] : memref<3x128x512xbf16, #tpu.memory_space<vmem>>, vector<1x128x512xbf16>
    %730 = vector.shape_cast %729 : vector<1x128x512xbf16> to vector<128x512xbf16>
    %cst_254 = arith.constant dense<0.000000e+00> : vector<8x512xf32>
    %731 = tpu.matmul %728, %730, %cst_254 {dimension_numbers = #tpu.dot_dimension_numbers<[1], [0], [0], [1], [0, 0, 1, 1], [], []>} : vector<8x128xbf16>, vector<128x512xbf16>, vector<8x512xf32> -> vector<8x512xf32>
    %732 = arith.addf %727, %731 : vector<8x512xf32>
    %733 = vector.extract_strided_slice %732 {offsets = [0, 0], sizes = [8, 128], strides = [1, 1]} : vector<8x512xf32> to vector<8x128xf32>
    %734 = arith.negf %733 : vector<8x128xf32>
    %735 = math.exp %734 : vector<8x128xf32>
    %cst_255 = arith.constant 1.000000e+00 : f32
    %736 = vector.broadcast %cst_255 : f32 to vector<8x128xf32>
    %737 = arith.addf %736, %735 : vector<8x128xf32>
    %738 = arith.divf %736, %737 : vector<8x128xf32>
    %739 = vector.extract_strided_slice %732 {offsets = [0, 128], sizes = [8, 128], strides = [1, 1]} : vector<8x512xf32> to vector<8x128xf32>
    %740 = arith.negf %739 : vector<8x128xf32>
    %741 = math.exp %740 : vector<8x128xf32>
    %cst_256 = arith.constant 1.000000e+00 : f32
    %742 = vector.broadcast %cst_256 : f32 to vector<8x128xf32>
    %743 = arith.addf %742, %741 : vector<8x128xf32>
    %744 = arith.divf %742, %743 : vector<8x128xf32>
    %745 = vector.extract_strided_slice %732 {offsets = [0, 256], sizes = [8, 128], strides = [1, 1]} : vector<8x512xf32> to vector<8x128xf32>
    %746 = math.tanh %745 : vector<8x128xf32>
    %747 = vector.extract_strided_slice %732 {offsets = [0, 384], sizes = [8, 128], strides = [1, 1]} : vector<8x512xf32> to vector<8x128xf32>
    %748 = arith.negf %747 : vector<8x128xf32>
    %749 = math.exp %748 : vector<8x128xf32>
    %cst_257 = arith.constant 1.000000e+00 : f32
    %750 = vector.broadcast %cst_257 : f32 to vector<8x128xf32>
    %751 = arith.addf %750, %749 : vector<8x128xf32>
    %752 = arith.divf %750, %751 : vector<8x128xf32>
    %753 = arith.mulf %744, %719 : vector<8x128xf32>
    %754 = arith.mulf %738, %746 : vector<8x128xf32>
    %755 = arith.addf %753, %754 : vector<8x128xf32>
    %756 = math.tanh %755 : vector<8x128xf32>
    %757 = arith.mulf %752, %756 : vector<8x128xf32>
    %758 = arith.index_cast %725 : i32 to index
    %c0_258 = arith.constant 0 : index
    %759 = vector.load %arg7[%758, %c0_258] : memref<64x128xf32, #tpu.memory_space<vmem>>, vector<8x128xf32>
    tpu.vector_store %arg7[%758, %c0_258], %757 {strides = array<i32>} : memref<64x128xf32, #tpu.memory_space<vmem>>, vector<8x128xf32>,
    %c4_i32_259 = arith.constant 4 : i32
    %c8_i32_260 = arith.constant 8 : i32
    %760 = arith.muli %c4_i32_259, %c8_i32_260 : i32
    %761 = tpu.assume_multiple %760, 8 : i32
    %762 = arith.index_cast %761 : i32 to index
    %c0_261 = arith.constant 0 : index
    %763 = vector.load %arg8[%762, %c0_261] : memref<64x512xf32, #tpu.memory_space<vmem>>, vector<8x512xf32>
    %764 = arith.truncf %757 : vector<8x128xf32> to vector<8x128xbf16>
    %c2_262 = arith.constant 2 : index
    %c0_263 = arith.constant 0 : index
    %c0_264 = arith.constant 0 : index
    %765 = vector.load %arg3[%c2_262, %c0_263, %c0_264] : memref<3x128x512xbf16, #tpu.memory_space<vmem>>, vector<1x128x512xbf16>
    %766 = vector.shape_cast %765 : vector<1x128x512xbf16> to vector<128x512xbf16>
    %cst_265 = arith.constant dense<0.000000e+00> : vector<8x512xf32>
    %767 = tpu.matmul %764, %766, %cst_265 {dimension_numbers = #tpu.dot_dimension_numbers<[1], [0], [0], [1], [0, 0, 1, 1], [], []>} : vector<8x128xbf16>, vector<128x512xbf16>, vector<8x512xf32> -> vector<8x512xf32>
    %768 = arith.addf %763, %767 : vector<8x512xf32>
    %769 = vector.extract_strided_slice %768 {offsets = [0, 0], sizes = [8, 128], strides = [1, 1]} : vector<8x512xf32> to vector<8x128xf32>
    %770 = arith.negf %769 : vector<8x128xf32>
    %771 = math.exp %770 : vector<8x128xf32>
    %cst_266 = arith.constant 1.000000e+00 : f32
    %772 = vector.broadcast %cst_266 : f32 to vector<8x128xf32>
    %773 = arith.addf %772, %771 : vector<8x128xf32>
    %774 = arith.divf %772, %773 : vector<8x128xf32>
    %775 = vector.extract_strided_slice %768 {offsets = [0, 128], sizes = [8, 128], strides = [1, 1]} : vector<8x512xf32> to vector<8x128xf32>
    %776 = arith.negf %775 : vector<8x128xf32>
    %777 = math.exp %776 : vector<8x128xf32>
    %cst_267 = arith.constant 1.000000e+00 : f32
    %778 = vector.broadcast %cst_267 : f32 to vector<8x128xf32>
    %779 = arith.addf %778, %777 : vector<8x128xf32>
    %780 = arith.divf %778, %779 : vector<8x128xf32>
    %781 = vector.extract_strided_slice %768 {offsets = [0, 256], sizes = [8, 128], strides = [1, 1]} : vector<8x512xf32> to vector<8x128xf32>
    %782 = math.tanh %781 : vector<8x128xf32>
    %783 = vector.extract_strided_slice %768 {offsets = [0, 384], sizes = [8, 128], strides = [1, 1]} : vector<8x512xf32> to vector<8x128xf32>
    %784 = arith.negf %783 : vector<8x128xf32>
    %785 = math.exp %784 : vector<8x128xf32>
    %cst_268 = arith.constant 1.000000e+00 : f32
    %786 = vector.broadcast %cst_268 : f32 to vector<8x128xf32>
    %787 = arith.addf %786, %785 : vector<8x128xf32>
    %788 = arith.divf %786, %787 : vector<8x128xf32>
    %789 = arith.mulf %780, %755 : vector<8x128xf32>
    %790 = arith.mulf %774, %782 : vector<8x128xf32>
    %791 = arith.addf %789, %790 : vector<8x128xf32>
    %792 = math.tanh %791 : vector<8x128xf32>
    %793 = arith.mulf %788, %792 : vector<8x128xf32>
    %794 = arith.index_cast %761 : i32 to index
    %c0_269 = arith.constant 0 : index
    %795 = vector.load %arg7[%794, %c0_269] : memref<64x128xf32, #tpu.memory_space<vmem>>, vector<8x128xf32>
    tpu.vector_store %arg7[%794, %c0_269], %793 {strides = array<i32>} : memref<64x128xf32, #tpu.memory_space<vmem>>, vector<8x128xf32>,
    %c5_i32_270 = arith.constant 5 : i32
    %c8_i32_271 = arith.constant 8 : i32
    %796 = arith.muli %c5_i32_270, %c8_i32_271 : i32
    %797 = tpu.assume_multiple %796, 8 : i32
    %798 = arith.index_cast %797 : i32 to index
    %c0_272 = arith.constant 0 : index
    %799 = vector.load %arg8[%798, %c0_272] : memref<64x512xf32, #tpu.memory_space<vmem>>, vector<8x512xf32>
    %800 = arith.truncf %793 : vector<8x128xf32> to vector<8x128xbf16>
    %c2_273 = arith.constant 2 : index
    %c0_274 = arith.constant 0 : index
    %c0_275 = arith.constant 0 : index
    %801 = vector.load %arg3[%c2_273, %c0_274, %c0_275] : memref<3x128x512xbf16, #tpu.memory_space<vmem>>, vector<1x128x512xbf16>
    %802 = vector.shape_cast %801 : vector<1x128x512xbf16> to vector<128x512xbf16>
    %cst_276 = arith.constant dense<0.000000e+00> : vector<8x512xf32>
    %803 = tpu.matmul %800, %802, %cst_276 {dimension_numbers = #tpu.dot_dimension_numbers<[1], [0], [0], [1], [0, 0, 1, 1], [], []>} : vector<8x128xbf16>, vector<128x512xbf16>, vector<8x512xf32> -> vector<8x512xf32>
    %804 = arith.addf %799, %803 : vector<8x512xf32>
    %805 = vector.extract_strided_slice %804 {offsets = [0, 0], sizes = [8, 128], strides = [1, 1]} : vector<8x512xf32> to vector<8x128xf32>
    %806 = arith.negf %805 : vector<8x128xf32>
    %807 = math.exp %806 : vector<8x128xf32>
    %cst_277 = arith.constant 1.000000e+00 : f32
    %808 = vector.broadcast %cst_277 : f32 to vector<8x128xf32>
    %809 = arith.addf %808, %807 : vector<8x128xf32>
    %810 = arith.divf %808, %809 : vector<8x128xf32>
    %811 = vector.extract_strided_slice %804 {offsets = [0, 128], sizes = [8, 128], strides = [1, 1]} : vector<8x512xf32> to vector<8x128xf32>
    %812 = arith.negf %811 : vector<8x128xf32>
    %813 = math.exp %812 : vector<8x128xf32>
    %cst_278 = arith.constant 1.000000e+00 : f32
    %814 = vector.broadcast %cst_278 : f32 to vector<8x128xf32>
    %815 = arith.addf %814, %813 : vector<8x128xf32>
    %816 = arith.divf %814, %815 : vector<8x128xf32>
    %817 = vector.extract_strided_slice %804 {offsets = [0, 256], sizes = [8, 128], strides = [1, 1]} : vector<8x512xf32> to vector<8x128xf32>
    %818 = math.tanh %817 : vector<8x128xf32>
    %819 = vector.extract_strided_slice %804 {offsets = [0, 384], sizes = [8, 128], strides = [1, 1]} : vector<8x512xf32> to vector<8x128xf32>
    %820 = arith.negf %819 : vector<8x128xf32>
    %821 = math.exp %820 : vector<8x128xf32>
    %cst_279 = arith.constant 1.000000e+00 : f32
    %822 = vector.broadcast %cst_279 : f32 to vector<8x128xf32>
    %823 = arith.addf %822, %821 : vector<8x128xf32>
    %824 = arith.divf %822, %823 : vector<8x128xf32>
    %825 = arith.mulf %816, %791 : vector<8x128xf32>
    %826 = arith.mulf %810, %818 : vector<8x128xf32>
    %827 = arith.addf %825, %826 : vector<8x128xf32>
    %828 = math.tanh %827 : vector<8x128xf32>
    %829 = arith.mulf %824, %828 : vector<8x128xf32>
    %830 = arith.index_cast %797 : i32 to index
    %c0_280 = arith.constant 0 : index
    %831 = vector.load %arg7[%830, %c0_280] : memref<64x128xf32, #tpu.memory_space<vmem>>, vector<8x128xf32>
    tpu.vector_store %arg7[%830, %c0_280], %829 {strides = array<i32>} : memref<64x128xf32, #tpu.memory_space<vmem>>, vector<8x128xf32>,
    %c6_i32_281 = arith.constant 6 : i32
    %c8_i32_282 = arith.constant 8 : i32
    %832 = arith.muli %c6_i32_281, %c8_i32_282 : i32
    %833 = tpu.assume_multiple %832, 8 : i32
    %834 = arith.index_cast %833 : i32 to index
    %c0_283 = arith.constant 0 : index
    %835 = vector.load %arg8[%834, %c0_283] : memref<64x512xf32, #tpu.memory_space<vmem>>, vector<8x512xf32>
    %836 = arith.truncf %829 : vector<8x128xf32> to vector<8x128xbf16>
    %c2_284 = arith.constant 2 : index
    %c0_285 = arith.constant 0 : index
    %c0_286 = arith.constant 0 : index
    %837 = vector.load %arg3[%c2_284, %c0_285, %c0_286] : memref<3x128x512xbf16, #tpu.memory_space<vmem>>, vector<1x128x512xbf16>
    %838 = vector.shape_cast %837 : vector<1x128x512xbf16> to vector<128x512xbf16>
    %cst_287 = arith.constant dense<0.000000e+00> : vector<8x512xf32>
    %839 = tpu.matmul %836, %838, %cst_287 {dimension_numbers = #tpu.dot_dimension_numbers<[1], [0], [0], [1], [0, 0, 1, 1], [], []>} : vector<8x128xbf16>, vector<128x512xbf16>, vector<8x512xf32> -> vector<8x512xf32>
    %840 = arith.addf %835, %839 : vector<8x512xf32>
    %841 = vector.extract_strided_slice %840 {offsets = [0, 0], sizes = [8, 128], strides = [1, 1]} : vector<8x512xf32> to vector<8x128xf32>
    %842 = arith.negf %841 : vector<8x128xf32>
    %843 = math.exp %842 : vector<8x128xf32>
    %cst_288 = arith.constant 1.000000e+00 : f32
    %844 = vector.broadcast %cst_288 : f32 to vector<8x128xf32>
    %845 = arith.addf %844, %843 : vector<8x128xf32>
    %846 = arith.divf %844, %845 : vector<8x128xf32>
    %847 = vector.extract_strided_slice %840 {offsets = [0, 128], sizes = [8, 128], strides = [1, 1]} : vector<8x512xf32> to vector<8x128xf32>
    %848 = arith.negf %847 : vector<8x128xf32>
    %849 = math.exp %848 : vector<8x128xf32>
    %cst_289 = arith.constant 1.000000e+00 : f32
    %850 = vector.broadcast %cst_289 : f32 to vector<8x128xf32>
    %851 = arith.addf %850, %849 : vector<8x128xf32>
    %852 = arith.divf %850, %851 : vector<8x128xf32>
    %853 = vector.extract_strided_slice %840 {offsets = [0, 256], sizes = [8, 128], strides = [1, 1]} : vector<8x512xf32> to vector<8x128xf32>
    %854 = math.tanh %853 : vector<8x128xf32>
    %855 = vector.extract_strided_slice %840 {offsets = [0, 384], sizes = [8, 128], strides = [1, 1]} : vector<8x512xf32> to vector<8x128xf32>
    %856 = arith.negf %855 : vector<8x128xf32>
    %857 = math.exp %856 : vector<8x128xf32>
    %cst_290 = arith.constant 1.000000e+00 : f32
    %858 = vector.broadcast %cst_290 : f32 to vector<8x128xf32>
    %859 = arith.addf %858, %857 : vector<8x128xf32>
    %860 = arith.divf %858, %859 : vector<8x128xf32>
    %861 = arith.mulf %852, %827 : vector<8x128xf32>
    %862 = arith.mulf %846, %854 : vector<8x128xf32>
    %863 = arith.addf %861, %862 : vector<8x128xf32>
    %864 = math.tanh %863 : vector<8x128xf32>
    %865 = arith.mulf %860, %864 : vector<8x128xf32>
    %866 = arith.index_cast %833 : i32 to index
    %c0_291 = arith.constant 0 : index
    %867 = vector.load %arg7[%866, %c0_291] : memref<64x128xf32, #tpu.memory_space<vmem>>, vector<8x128xf32>
    tpu.vector_store %arg7[%866, %c0_291], %865 {strides = array<i32>} : memref<64x128xf32, #tpu.memory_space<vmem>>, vector<8x128xf32>,
    %c7_i32_292 = arith.constant 7 : i32
    %c8_i32_293 = arith.constant 8 : i32
    %868 = arith.muli %c7_i32_292, %c8_i32_293 : i32
    %869 = tpu.assume_multiple %868, 8 : i32
    %870 = arith.index_cast %869 : i32 to index
    %c0_294 = arith.constant 0 : index
    %871 = vector.load %arg8[%870, %c0_294] : memref<64x512xf32, #tpu.memory_space<vmem>>, vector<8x512xf32>
    %872 = arith.truncf %865 : vector<8x128xf32> to vector<8x128xbf16>
    %c2_295 = arith.constant 2 : index
    %c0_296 = arith.constant 0 : index
    %c0_297 = arith.constant 0 : index
    %873 = vector.load %arg3[%c2_295, %c0_296, %c0_297] : memref<3x128x512xbf16, #tpu.memory_space<vmem>>, vector<1x128x512xbf16>
    %874 = vector.shape_cast %873 : vector<1x128x512xbf16> to vector<128x512xbf16>
    %cst_298 = arith.constant dense<0.000000e+00> : vector<8x512xf32>
    %875 = tpu.matmul %872, %874, %cst_298 {dimension_numbers = #tpu.dot_dimension_numbers<[1], [0], [0], [1], [0, 0, 1, 1], [], []>} : vector<8x128xbf16>, vector<128x512xbf16>, vector<8x512xf32> -> vector<8x512xf32>
    %876 = arith.addf %871, %875 : vector<8x512xf32>
    %877 = vector.extract_strided_slice %876 {offsets = [0, 0], sizes = [8, 128], strides = [1, 1]} : vector<8x512xf32> to vector<8x128xf32>
    %878 = arith.negf %877 : vector<8x128xf32>
    %879 = math.exp %878 : vector<8x128xf32>
    %cst_299 = arith.constant 1.000000e+00 : f32
    %880 = vector.broadcast %cst_299 : f32 to vector<8x128xf32>
    %881 = arith.addf %880, %879 : vector<8x128xf32>
    %882 = arith.divf %880, %881 : vector<8x128xf32>
    %883 = vector.extract_strided_slice %876 {offsets = [0, 128], sizes = [8, 128], strides = [1, 1]} : vector<8x512xf32> to vector<8x128xf32>
    %884 = arith.negf %883 : vector<8x128xf32>
    %885 = math.exp %884 : vector<8x128xf32>
    %cst_300 = arith.constant 1.000000e+00 : f32
    %886 = vector.broadcast %cst_300 : f32 to vector<8x128xf32>
    %887 = arith.addf %886, %885 : vector<8x128xf32>
    %888 = arith.divf %886, %887 : vector<8x128xf32>
    %889 = vector.extract_strided_slice %876 {offsets = [0, 256], sizes = [8, 128], strides = [1, 1]} : vector<8x512xf32> to vector<8x128xf32>
    %890 = math.tanh %889 : vector<8x128xf32>
    %891 = vector.extract_strided_slice %876 {offsets = [0, 384], sizes = [8, 128], strides = [1, 1]} : vector<8x512xf32> to vector<8x128xf32>
    %892 = arith.negf %891 : vector<8x128xf32>
    %893 = math.exp %892 : vector<8x128xf32>
    %cst_301 = arith.constant 1.000000e+00 : f32
    %894 = vector.broadcast %cst_301 : f32 to vector<8x128xf32>
    %895 = arith.addf %894, %893 : vector<8x128xf32>
    %896 = arith.divf %894, %895 : vector<8x128xf32>
    %897 = arith.mulf %888, %863 : vector<8x128xf32>
    %898 = arith.mulf %882, %890 : vector<8x128xf32>
    %899 = arith.addf %897, %898 : vector<8x128xf32>
    %900 = math.tanh %899 : vector<8x128xf32>
    %901 = arith.mulf %896, %900 : vector<8x128xf32>
    %902 = arith.index_cast %869 : i32 to index
    %c0_302 = arith.constant 0 : index
    %903 = vector.load %arg7[%902, %c0_302] : memref<64x128xf32, #tpu.memory_space<vmem>>, vector<8x128xf32>
    tpu.vector_store %arg7[%902, %c0_302], %901 {strides = array<i32>} : memref<64x128xf32, #tpu.memory_space<vmem>>, vector<8x128xf32>,
    %c8_i32_303 = arith.constant 8 : i32
    return
  }
}

</mosaic_0001>

<bundles_post_ra>
// kernel: encoder_forward.1
= control target key start
LH: loop header
LB: loop body
LE: loop exit
PB: predicated region body
PF: predicated region fallthrough
CT: control target
= control target key end

     0   :  { %12 = vsyncpa [#allocation5], 0  ;;  %s12575_s0 = inlined_call_operand.vmem [shape: bf16[64,128], index: 0, kind: input, shape index: {}]   ;;  %s12576_s1 = inlined_call_operand.vmem [shape: bf16[128,512], index: 1, kind: input, shape index: {}]   ;;  %s12577_s2 = inlined_call_operand.hbm [shape: bf16[2,128,512], index: 2, kind: input, shape index: {}]   ;;  %s12578_s3 = inlined_call_operand.hbm [shape: bf16[3,128,512], index: 3, kind: input, shape index: {}]   ;;  %s12579_s4 = inlined_call_operand.vmem [shape: f32[3,1,512], index: 4, kind: input, shape index: {}]   ;;  %s12580_s5 = inlined_call_operand.vmem [shape: f32[3,8,128], index: 5, kind: input, shape index: {}]   ;;  %s12581_s6 = inlined_call_operand.vmem [shape: f32[3,8,128], index: 6, kind: input, shape index: {}]   ;;  %s12582_s7 = inlined_call_operand.vmem [shape: f32[64,128], index: 7, kind: output, shape index: {}]  }
   0x1   :  { %13 = vsyncpa [#allocation7], 0  ;;  %s10593_s24 = smov [#allocation4]   ;;  %s10545_s28 = scalar_lea.hbm %s12577_s2, 8192 }
   0x2   :  { %s23_s25 = sshll.u32 %s10593_s24, 4  ;;  %p10546_p0 = scmp.ne.s32.totalorder %s12577_s2, %s10545_s28  ;;  %s24_s25 = int_to_ptr.vmem [resolvable:$true] %s23_s25 }
   0x3   :  { %p10549_p1 = scmp.lt.u32.totalorder %s10545_s28, %s12577_s2 }
   0x5   :  { %p10551_p2 = pnand %p10549_p1, %p10546_p0 }
   0x7   :  { %10554 = shalt.err (!%p10551_p2)
}
   0x8   :  { %s10555_s10 = scalar_lea.vmem %s24_s25, 8192  ;;  %p10560_p4 = scmp.lt.s32.totalorder %s24_s25, %s24_s25 }
   0x9   :  { %p10556_p3 = scmp.ne.s32.totalorder %s24_s25, %s10555_s10  ;;  %p10561_p5 = scmp.lt.s32.totalorder %s10555_s10, %s10555_s10 }
   0xb   :  { %p10562_p6 = por %p10561_p5, %p10560_p4 }
   0xd   :  { %p10563_p7 = pnand %p10562_p6, %p10556_p3 }
   0xf   :  { %10566 = shalt.err (!%p10563_p7)
}
  0x10   :  { %s10594_s11 = smov 256   ;;  %s10595_s12 = smov 16  }
  0x11   :  { %29 = dma.hbm_to_vmem [thread:$0]  %s12577_s2, 8192, %s24_s25, [#allocation5], %s10594_s11, %s10594_s11, %s10595_s12  }
  0x12   :  { %s10596_s15 = smov [#allocation6]   ;;  %s10567_s19 = scalar_lea.hbm %s12578_s3, 12288 }
  0x13   :  { %s35_s16 = sshll.u32 %s10596_s15, 4  ;;  %p10568_p8 = scmp.ne.s32.totalorder %s12578_s3, %s10567_s19  ;;  %s36_s16 = int_to_ptr.vmem [resolvable:$true] %s35_s16 }
  0x14   :  { %p10571_p9 = scmp.lt.u32.totalorder %s10567_s19, %s12578_s3 }
  0x16   :  { %p10573_p10 = pnand %p10571_p9, %p10568_p8 }
  0x18   :  { %10576 = shalt.err (!%p10573_p10)
}
  0x19   :  { %s10577_s24 = scalar_lea.vmem %s36_s16, 12288  ;;  %p10582_p12 = scmp.lt.s32.totalorder %s36_s16, %s36_s16 }
  0x1a   :  { %p10578_p11 = scmp.ne.s32.totalorder %s36_s16, %s10577_s24  ;;  %p10583_p13 = scmp.lt.s32.totalorder %s10577_s24, %s10577_s24 }
  0x1c   :  { %p10584_p0 = por %p10583_p13, %p10582_p12 }
  0x1e   :  { %p10585_p1 = pnand %p10584_p0, %p10578_p11 }
  0x20   :  { %10588 = shalt.err (!%p10585_p1)
}
  0x21   :  { %41 = dma.hbm_to_vmem [thread:$0]  %s12578_s3, 12288, %s36_s16, [#allocation7], %s10594_s11, %s10594_s11, %s10595_s12  }
  0x22   :  { %10589 = dma.done.wait [#allocation5], 8192  }
  0x23   :  { %10590 = vsyncadd [#allocation5], 4294959104 }
  0x24   :  { %10591 = dma.done.wait [#allocation7], 12288  }
  0x25   :  { %10592 = vsyncadd [#allocation7], 4294955008  ;;  %v12583_v0 = vmov 0   ;;  %v9703_v1 = vld [vmem:[%s12576_s1 + $0x4] ss:$16 sps:$4 sm:$0xff]   ;;  %v9764_v44 = vld [vmem:[%s12575_s0 + $0x8] sm:$0xff]  }
  0x26   :  { %333 = vmatprep.mubr.bf16.mxu0 %v12583_v0  ;;  %406 = vmatprep.mubr.bf16.mxu1 %v12583_v0  ;;  %v9705_v2 = vld [vmem:[%s12576_s1 + $0xc] ss:$16 sps:$4 sm:$0xff]   ;;  %v9707_v3 = vld [vmem:[%s12576_s1] ss:$16 sps:$4 sm:$0xff]   ;;  %v9708_v4 = vld [vmem:[%s12576_s1 + $0x8] ss:$16 sps:$4 sm:$0xff]  }
  0x27   :  { %301 = vmatprep.subr.bf16.mxu0 %v9703_v1  ;;  %374 = vmatprep.subr.bf16.mxu1 %v9705_v2  ;;  %v9709_v5 = vld [vmem:[%s12576_s1 + $0x24] ss:$16 sps:$4 sm:$0xff]   ;;  %v9711_v6 = vld [vmem:[%s12576_s1 + $0x2c] ss:$16 sps:$4 sm:$0xff]   ;;  %v9713_v7 = vld [vmem:[%s12576_s1 + $0x20] ss:$16 sps:$4 sm:$0xff]  }
  0x28   :  { %302 = vmatpush1.bf16.msra.mxu0 %v9707_v3  ;;  %375 = vmatpush1.bf16.msra.mxu1 %v9708_v4  ;;  %v9714_v8 = vld [vmem:[%s12576_s1 + $0x28] ss:$16 sps:$4 sm:$0xff]   ;;  %v9715_v9 = vld [vmem:[%s12576_s1 + $0x44] ss:$16 sps:$4 sm:$0xff]   ;;  %v9717_v10 = vld [vmem:[%s12576_s1 + $0x4c] ss:$16 sps:$4 sm:$0xff]  }
  0x29   :  { %303 = vmatprep.subr.bf16.mxu0 %v9709_v5  ;;  %376 = vmatprep.subr.bf16.mxu1 %v9711_v6  ;;  %v9719_v11 = vld [vmem:[%s12576_s1 + $0x40] ss:$16 sps:$4 sm:$0xff]   ;;  %v9720_v12 = vld [vmem:[%s12576_s1 + $0x48] ss:$16 sps:$4 sm:$0xff]   ;;  %v9721_v13 = vld [vmem:[%s12576_s1 + $0x64] ss:$16 sps:$4 sm:$0xff]  }
  0x2a   :  { %v9723_v14 = vld [vmem:[%s12576_s1 + $0x6c] ss:$16 sps:$4 sm:$0xff]   ;;  %v9725_v15 = vld [vmem:[%s12576_s1 + $0x60] ss:$16 sps:$4 sm:$0xff]   ;;  %v9726_v16 = vld [vmem:[%s12576_s1 + $0x68] ss:$16 sps:$4 sm:$0xff]  }
  0x2b   :  { %v9727_v17 = vld [vmem:[%s12576_s1 + $0x84] ss:$16 sps:$4 sm:$0xff]   ;;  %v9729_v18 = vld [vmem:[%s12576_s1 + $0x8c] ss:$16 sps:$4 sm:$0xff]   ;;  %v9731_v19 = vld [vmem:[%s12576_s1 + $0x80] ss:$16 sps:$4 sm:$0xff]  }
  0x2c   :  { %304 = vmatpush1.bf16.msra.mxu0 %v9713_v7  ;;  %377 = vmatpush1.bf16.msra.mxu1 %v9714_v8  ;;  %v9732_v20 = vld [vmem:[%s12576_s1 + $0x88] ss:$16 sps:$4 sm:$0xff]   ;;  %v9733_v21 = vld [vmem:[%s12576_s1 + $0xa4] ss:$16 sps:$4 sm:$0xff]   ;;  %v9735_v22 = vld [vmem:[%s12576_s1 + $0xac] ss:$16 sps:$4 sm:$0xff]   ;;  %v97_v8 = vlaneseq }
  0x2d   :  { %305 = vmatprep.subr.bf16.mxu0 %v9715_v9  ;;  %378 = vmatprep.subr.bf16.mxu1 %v9717_v10  ;;  %v9737_v23 = vld [vmem:[%s12576_s1 + $0xa0] ss:$16 sps:$4 sm:$0xff]   ;;  %v9738_v24 = vld [vmem:[%s12576_s1 + $0xa8] ss:$16 sps:$4 sm:$0xff]   ;;  %v9739_v25 = vld [vmem:[%s12576_s1 + $0xc4] ss:$16 sps:$4 sm:$0xff]  }
  0x2e   :  { %v9741_v26 = vld [vmem:[%s12576_s1 + $0xcc] ss:$16 sps:$4 sm:$0xff]   ;;  %v9743_v27 = vld [vmem:[%s12576_s1 + $0xc0] ss:$16 sps:$4 sm:$0xff]   ;;  %v9744_v28 = vld [vmem:[%s12576_s1 + $0xc8] ss:$16 sps:$4 sm:$0xff]  }
  0x2f   :  { %v9745_v29 = vld [vmem:[%s12576_s1 + $0xe4] ss:$16 sps:$4 sm:$0xff]   ;;  %v9747_v30 = vld [vmem:[%s12576_s1 + $0xec] ss:$16 sps:$4 sm:$0xff]   ;;  %v9749_v31 = vld [vmem:[%s12576_s1 + $0xe0] ss:$16 sps:$4 sm:$0xff]  }
  0x30   :  { %306 = vmatpush1.bf16.msra.mxu0 %v9719_v11  ;;  %379 = vmatpush1.bf16.msra.mxu1 %v9720_v12  ;;  %v9750_v32 = vld [vmem:[%s12576_s1 + $0xe8] ss:$16 sps:$4 sm:$0xff]   ;;  %v10760_v33 = vld [vmem:[#allocation6 + $0x4] ss:$16 sps:$4 sm:$0xff]   ;;  %v10762_v34 = vld [vmem:[#allocation6 + $0xc] ss:$16 sps:$4 sm:$0xff]  }
  0x31   :  { %307 = vmatprep.subr.bf16.mxu0 %v9721_v13  ;;  %380 = vmatprep.subr.bf16.mxu1 %v9723_v14  ;;  %v9751_v35 = vld [vmem:[%s12575_s0] sm:$0xff]   ;;  %v10769_v37 = vld [vmem:[#allocation6 + $0x8] ss:$16 sps:$4 sm:$0xff]   ;;  %v10775_v39 = vld [vmem:[#allocation6 + $0x2c] ss:$16 sps:$4 sm:$0xff]   ;;  %v98_v9 = vshrl.u32 %v97_v8, 7 }
  0x32   :  { %v10767_v36 = vld [vmem:[#allocation6] ss:$16 sps:$4 sm:$0xff]   ;;  %v10773_v38 = vld [vmem:[#allocation6 + $0x24] ss:$16 sps:$4 sm:$0xff]   ;;  %v10781_v41 = vld [vmem:[#allocation6 + $0x28] ss:$16 sps:$4 sm:$0xff]  }
  0x33   :  { %v10777_v40 = vld [vmem:[#allocation6 + $0x20] ss:$16 sps:$4 sm:$0xff]   ;;  %v10785_v42 = vld [vmem:[#allocation6 + $0x44] ss:$16 sps:$4 sm:$0xff]   ;;  %v10787_v43 = vld [vmem:[#allocation6 + $0x4c] ss:$16 sps:$4 sm:$0xff]  }
  0x34   :  { %308 = vmatpush1.bf16.msra.mxu0 %v9725_v15  ;;  %381 = vmatpush1.bf16.msra.mxu1 %v9726_v16  ;;  %v10794_v45 = vld [vmem:[#allocation6 + $0x40] ss:$16 sps:$4 sm:$0xff]   ;;  %v10796_v46 = vld [vmem:[#allocation6 + $0x48] ss:$16 sps:$4 sm:$0xff]   ;;  %v10800_v47 = vld [vmem:[#allocation6 + $0x64] ss:$16 sps:$4 sm:$0xff]  }
  0x35   :  { %309 = vmatprep.subr.bf16.mxu0 %v9727_v17  ;;  %382 = vmatprep.subr.bf16.mxu1 %v9729_v18  ;;  %v10804_v48 = vld [vmem:[#allocation6 + $0x6c] ss:$16 sps:$4 sm:$0xff]   ;;  %v10806_v49 = vld [vmem:[#allocation6 + $0x60] ss:$16 sps:$4 sm:$0xff]   ;;  %v10808_v50 = vld [vmem:[#allocation6 + $0x68] ss:$16 sps:$4 sm:$0xff]  }
  0x36   :  { %v10812_v51 = vld [vmem:[#allocation6 + $0x84] ss:$16 sps:$4 sm:$0xff]   ;;  %v10816_v52 = vld [vmem:[#allocation6 + $0x8c] ss:$16 sps:$4 sm:$0xff]   ;;  %v10823_v54 = vld [vmem:[#allocation6 + $0x80] ss:$16 sps:$4 sm:$0xff]  }
  0x37   :  { %v9777_v53 = vld [vmem:[%s12575_s0 + $0x10] sm:$0xff]   ;;  %v10825_v55 = vld [vmem:[#allocation6 + $0x88] ss:$16 sps:$4 sm:$0xff]   ;;  %v10829_v57 = vld [vmem:[#allocation6 + $0xac] ss:$16 sps:$4 sm:$0xff]   ;;  %v10915_v10 = vsub.s32 2, %v98_v9 }
  0x38   :  { %310 = vmatpush1.bf16.msra.mxu0 %v9731_v19  ;;  %383 = vmatpush1.bf16.msra.mxu1 %v9732_v20  ;;  %v10827_v56 = vld [vmem:[#allocation6 + $0xa4] ss:$16 sps:$4 sm:$0xff]   ;;  %v10835_v58 = vld [vmem:[#allocation6 + $0xa0] ss:$16 sps:$4 sm:$0xff]   ;;  %v10837_v59 = vld [vmem:[#allocation6 + $0xa8] ss:$16 sps:$4 sm:$0xff]  }
  0x39   :  { %311 = vmatprep.subr.bf16.mxu0 %v9733_v21  ;;  %384 = vmatprep.subr.bf16.mxu1 %v9735_v22  ;;  %v10839_v60 = vld [vmem:[#allocation6 + $0xc4] ss:$16 sps:$4 sm:$0xff]   ;;  %v10841_v61 = vld [vmem:[#allocation6 + $0xcc] ss:$16 sps:$4 sm:$0xff]   ;;  %v10852_v63 = vld [vmem:[#allocation6 + $0xc0] ss:$16 sps:$4 sm:$0xff]  }
  0x3a   :  { %v9790_v62 = vld [vmem:[%s12575_s0 + $0x18] sm:$0xff]   ;;  %v10856_v2 = vld [vmem:[#allocation6 + $0xe4] ss:$16 sps:$4 sm:$0xff]   ;;  %v10864_v4 = vld [vmem:[#allocation6 + $0xe0] ss:$16 sps:$4 sm:$0xff]   ;;  %12593 = vst [vmem:[#allocation10_spill] sm:$0xff] %v10915_v10 }
  0x3b   :  { %v10854_v1 = vld [vmem:[#allocation6 + $0xc8] ss:$16 sps:$4 sm:$0xff]   ;;  %v10858_v3 = vld [vmem:[#allocation6 + $0xec] ss:$16 sps:$4 sm:$0xff]   ;;  %v479_v6 = vld [vmem:[%s12580_s5] sm:$0xff]  ;;  %v10917_v11 = vsub.s32 3, %v98_v9 }
  0x3c   :  { %312 = vmatpush1.bf16.msra.mxu0 %v9737_v23  ;;  %385 = vmatpush1.bf16.msra.mxu1 %v9738_v24  ;;  %v10866_v5 = vld [vmem:[#allocation6 + $0xe8] ss:$16 sps:$4 sm:$0xff]   ;;  %v488_v7 = vpack.c.bf16 %v479_v6, %v479_v6  ;;  %v10919_v12 = vsub.s32 0, %v98_v9  ;;  %v95_v13 = vld [vmem:[%s12579_s4] sm:$0xf]  ;;  %v10924_v14 = vsub.s32 1, %v98_v9 }
  0x3d   :  { %313 = vmatprep.subr.bf16.mxu0 %v9739_v25  ;;  %386 = vmatprep.subr.bf16.mxu1 %v9741_v26  ;;  %12594 = vst [vmem:[#allocation11_spill] sm:$0xff] %v10917_v11  ;;  %v10927_v15 = vrot.slane %v95_v13, %v10915_v10  ;;  %v10934_v18 = vrot.slane %v95_v13, %v10917_v11 }
  0x3e   :  { %12595 = vst [vmem:[#allocation12_spill] sm:$0xff] %v10919_v12  ;;  %12596 = vst [vmem:[#allocation13_spill] sm:$0xff] %v10924_v14  ;;  %v100_v19 = vrot.slane %v95_v13, %v10919_v12  ;;  %v104_v22 = vrot.slane %v95_v13, %v10924_v14 }
  0x40   :  { %314 = vmatpush1.bf16.msra.mxu0 %v9743_v27  ;;  %387 = vmatpush1.bf16.msra.mxu1 %v9744_v28 }
  0x41   :  { %315 = vmatprep.subr.bf16.mxu0 %v9745_v29  ;;  %388 = vmatprep.subr.bf16.mxu1 %v9747_v30 }
  0x44   :  { %316 = vmatpush1.bf16.msra.mxu0 %v9749_v31  ;;  %389 = vmatpush1.bf16.msra.mxu1 %v9750_v32 }
  0x45   :  { %681 = vmatprep.subr.bf16.mxu0 %v10760_v33  ;;  %722 = vmatprep.subr.bf16.mxu1 %v10762_v34 }
  0x47   :  { %334 = vmatmul.mubr.bf16.vlgmr.msra.gmra.mrb[0].mxu0 %v9751_v35  ;;  %407 = vmatmul.mubr.bf16.vlgmr.msra.gmra.mrb[0].mxu1 %v9751_v35 }
  0x48   :  { %682 = vmatpush1.bf16.msra.mxu0 %v10767_v36  ;;  %723 = vmatpush1.bf16.msra.mxu1 %v10769_v37 }
  0x49   :  { %683 = vmatprep.subr.bf16.mxu0 %v10773_v38  ;;  %724 = vmatprep.subr.bf16.mxu1 %v10775_v39 }
  0x4a   :  { %343 = vmatprep.mubr.bf16.mxu0 %v12583_v0  ;;  %416 = vmatprep.mubr.bf16.mxu1 %v12583_v0 }
  0x4c   :  { %684 = vmatpush1.bf16.msra.mxu0 %v10777_v40  ;;  %725 = vmatpush1.bf16.msra.mxu1 %v10781_v41 }
  0x4d   :  { %685 = vmatprep.subr.bf16.mxu0 %v10785_v42  ;;  %726 = vmatprep.subr.bf16.mxu1 %v10787_v43 }
  0x4f   :  { %344 = vmatmul.mubr.bf16.gmra.mrb[4].mxu0 %v9764_v44  ;;  %417 = vmatmul.mubr.bf16.gmra.mrb[4].mxu1 %v9764_v44 }
  0x50   :  { %686 = vmatpush1.bf16.msra.mxu0 %v10794_v45  ;;  %727 = vmatpush1.bf16.msra.mxu1 %v10796_v46 }
  0x51   :  { %687 = vmatprep.subr.bf16.mxu0 %v10800_v47  ;;  %728 = vmatprep.subr.bf16.mxu1 %v10804_v48 }
  0x52   :  { %353 = vmatprep.mubr.bf16.mxu0 %v12583_v0  ;;  %426 = vmatprep.mubr.bf16.mxu1 %v12583_v0 }
  0x54   :  { %688 = vmatpush1.bf16.msra.mxu0 %v10806_v49  ;;  %729 = vmatpush1.bf16.msra.mxu1 %v10808_v50 }
  0x55   :  { %689 = vmatprep.subr.bf16.mxu0 %v10812_v51  ;;  %730 = vmatprep.subr.bf16.mxu1 %v10816_v52 }
  0x57   :  { %354 = vmatmul.mubr.bf16.gmra.mrb[8].mxu0 %v9777_v53  ;;  %427 = vmatmul.mubr.bf16.gmra.mrb[8].mxu1 %v9777_v53 }
  0x58   :  { %690 = vmatpush1.bf16.msra.mxu0 %v10823_v54  ;;  %731 = vmatpush1.bf16.msra.mxu1 %v10825_v55 }
  0x59   :  { %691 = vmatprep.subr.bf16.mxu0 %v10827_v56  ;;  %732 = vmatprep.subr.bf16.mxu1 %v10829_v57 }
  0x5a   :  { %363 = vmatprep.mubr.bf16.mxu0 %v12583_v0  ;;  %436 = vmatprep.mubr.bf16.mxu1 %v12583_v0 }
  0x5c   :  { %692 = vmatpush1.bf16.msra.mxu0 %v10835_v58  ;;  %733 = vmatpush1.bf16.msra.mxu1 %v10837_v59 }
  0x5d   :  { %693 = vmatprep.subr.bf16.mxu0 %v10839_v60  ;;  %734 = vmatprep.subr.bf16.mxu1 %v10841_v61 }
  0x5f   :  { %364 = vmatmul.mubr.bf16.gmra.mrb[12].mxu0 %v9790_v62  ;;  %437 = vmatmul.mubr.bf16.gmra.mrb[12].mxu1 %v9790_v62 }
  0x60   :  { %694 = vmatpush1.bf16.msra.mxu0 %v10852_v63  ;;  %735 = vmatpush1.bf16.msra.mxu1 %v10854_v1 }
  0x61   :  { %695 = vmatprep.subr.bf16.mxu0 %v10856_v2  ;;  %736 = vmatprep.subr.bf16.mxu1 %v10858_v3 }
  0x62   :  { %713 = vmatprep.mubr.bf16.mxu0 %v12583_v0  ;;  %754 = vmatprep.mubr.bf16.mxu1 %v12583_v0 }
  0x64   :  { %696 = vmatpush1.bf16.msra.mxu0 %v10864_v4  ;;  %737 = vmatpush1.bf16.msra.mxu1 %v10866_v5 }
  0x65   :  { %992 = vmatprep.subr.bf16.mxu0 %v10760_v33  ;;  %1033 = vmatprep.subr.bf16.mxu1 %v10762_v34 }
  0x67   :  { %714 = vmatmul.mubr.bf16.vlgmr.msra.gmra.mrb[16].mxu0 %v488_v7  ;;  %755 = vmatmul.mubr.bf16.vlgmr.msra.gmra.mrb[16].mxu1 %v488_v7 }
  0x68   :  { %993 = vmatpush1.bf16.msra.mxu0 %v10767_v36  ;;  %1034 = vmatpush1.bf16.msra.mxu1 %v10769_v37 }
  0x69   :  { %994 = vmatprep.subr.bf16.mxu0 %v10773_v38  ;;  %1035 = vmatprep.subr.bf16.mxu1 %v10775_v39 }
  0x6a   :  { %1024 = vmatprep.mubr.bf16.mxu0 %v12583_v0  ;;  %1065 = vmatprep.mubr.bf16.mxu1 %v12583_v0 }
  0x6c   :  { %995 = vmatpush1.bf16.msra.mxu0 %v10777_v40  ;;  %1036 = vmatpush1.bf16.msra.mxu1 %v10781_v41 }
  0x6d   :  { %996 = vmatprep.subr.bf16.mxu0 %v10785_v42  ;;  %1037 = vmatprep.subr.bf16.mxu1 %v10787_v43 }
  0x70   :  { %997 = vmatpush1.bf16.msra.mxu0 %v10794_v45  ;;  %1038 = vmatpush1.bf16.msra.mxu1 %v10796_v46 }
  0x71   :  { %998 = vmatprep.subr.bf16.mxu0 %v10800_v47  ;;  %1039 = vmatprep.subr.bf16.mxu1 %v10804_v48 }
  0x74   :  { %999 = vmatpush1.bf16.msra.mxu0 %v10806_v49  ;;  %1040 = vmatpush1.bf16.msra.mxu1 %v10808_v50 }
  0x75   :  { %1000 = vmatprep.subr.bf16.mxu0 %v10812_v51  ;;  %1041 = vmatprep.subr.bf16.mxu1 %v10816_v52 }
  0x78   :  { %1001 = vmatpush1.bf16.msra.mxu0 %v10823_v54  ;;  %1042 = vmatpush1.bf16.msra.mxu1 %v10825_v55 }
  0x79   :  { %1002 = vmatprep.subr.bf16.mxu0 %v10827_v56  ;;  %1043 = vmatprep.subr.bf16.mxu1 %v10829_v57 }
  0x7c   :  { %1003 = vmatpush1.bf16.msra.mxu0 %v10835_v58  ;;  %1044 = vmatpush1.bf16.msra.mxu1 %v10837_v59 }
  0x7d   :  { %1004 = vmatprep.subr.bf16.mxu0 %v10839_v60  ;;  %1045 = vmatprep.subr.bf16.mxu1 %v10841_v61 }
  0x80   :  { %1005 = vmatpush1.bf16.msra.mxu0 %v10852_v63  ;;  %1046 = vmatpush1.bf16.msra.mxu1 %v10854_v1 }
  0x81   :  { %1006 = vmatprep.subr.bf16.mxu0 %v10856_v2  ;;  %1047 = vmatprep.subr.bf16.mxu1 %v10858_v3 }
  0x84   :  { %1007 = vmatpush1.bf16.msra.mxu0 %v10864_v4  ;;  %1048 = vmatpush1.bf16.msra.mxu1 %v10866_v5 }
  0x85   :  { %1304 = vmatprep.subr.bf16.mxu0 %v10760_v33  ;;  %1345 = vmatprep.subr.bf16.mxu1 %v10762_v34 }
 0x11a   :  { %v10929_v16 = vpop.f32.mrb[0].mxu0  ;;  %v10931_v17 = vpop.f32.mrb[0].mxu1 }
 0x11b   :  { %v337_v20 = vpop.f32.mrb[1].mxu0  ;;  %v410_v21 = vpop.f32.mrb[1].mxu1 }
 0x11c   :  { %v339_v23 = vpop.f32.mrb[2].mxu0  ;;  %v412_v24 = vpop.f32.mrb[2].mxu1 }
 0x11d   :  { %v10938_v25 = vadd.f32 %v339_v23, %v100_v19  ;;  %v341_v26 = vpop.f32.mrb[3].mxu0  ;;  %v10941_v27 = vadd.f32 %v412_v24, %v10927_v15  ;;  %v414_v28 = vpop.f32.mrb[3].mxu1 }
 0x11e   :  { %v10943_v29 = vadd.f32 %v341_v26, %v104_v22  ;;  %v10946_v30 = vadd.f32 %v414_v28, %v10934_v18 }
 0x122   :  { %v345_v31 = vpop.f32.mrb[4].mxu0  ;;  %v418_v32 = vpop.f32.mrb[4].mxu1 }
 0x123   :  { %v10948_v33 = vadd.f32 %v345_v31, %v100_v19  ;;  %v347_v34 = vpop.f32.mrb[5].mxu0  ;;  %v10951_v35 = vadd.f32 %v418_v32, %v10927_v15  ;;  %v420_v44 = vpop.f32.mrb[5].mxu1 }
 0x124   :  { %v10953_v53 = vadd.f32 %v347_v34, %v104_v22  ;;  %v349_v62 = vpop.f32.mrb[6].mxu0  ;;  %v10956_v6 = vadd.f32 %v420_v44, %v10934_v18  ;;  %v422_v7 = vpop.f32.mrb[6].mxu1 }
 0x125   :  { %v10958_v8 = vadd.f32 %v349_v62, %v100_v19  ;;  %v351_v9 = vpop.f32.mrb[7].mxu0  ;;  %v10961_v13 = vadd.f32 %v422_v7, %v10927_v15  ;;  %v424_v23 = vpop.f32.mrb[7].mxu1 }
 0x126   :  { %v10963_v24 = vadd.f32 %v351_v9, %v104_v22  ;;  %v10966_v26 = vadd.f32 %v424_v23, %v10934_v18 }
 0x127   :  { %12597 = vst [vmem:[#allocation14_spill] sm:$0xff] %v10961_v13 }
 0x128   :  { %12598 = vst [vmem:[#allocation15_spill] sm:$0xff] %v10963_v24  ;;  %12599 = vst [vmem:[#allocation16_spill] sm:$0xff] %v10966_v26 }
 0x12a   :  { %v355_v28 = vpop.f32.mrb[8].mxu0  ;;  %v428_v31 = vpop.f32.mrb[8].mxu1 }
 0x12b   :  { %v10968_v32 = vadd.f32 %v355_v28, %v100_v19  ;;  %v357_v34 = vpop.f32.mrb[9].mxu0  ;;  %v10971_v44 = vadd.f32 %v428_v31, %v10927_v15  ;;  %v430_v62 = vpop.f32.mrb[9].mxu1 }
 0x12c   :  { %v10973_v0 = vadd.f32 %v357_v34, %v104_v22  ;;  %v359_v11 = vpop.f32.mrb[10].mxu0  ;;  %v10976_v7 = vadd.f32 %v430_v62, %v10934_v18  ;;  %v432_v9 = vpop.f32.mrb[10].mxu1 }
 0x12d   :  { %12600 = vst [vmem:[#allocation17_spill] sm:$0xff] %v10968_v32  ;;  %12601 = vst [vmem:[#allocation18_spill] sm:$0xff] %v10971_v44  ;;  %v10978_v14 = vadd.f32 %v359_v11, %v100_v19  ;;  %v361_v23 = vpop.f32.mrb[11].mxu0  ;;  %v10981_v10 = vadd.f32 %v432_v9, %v10927_v15  ;;  %v434_v28 = vpop.f32.mrb[11].mxu1 }
 0x12e   :  { %12602 = vst [vmem:[#allocation19_spill] sm:$0xff] %v10973_v0  ;;  %12603 = vst [vmem:[#allocation20_spill] sm:$0xff] %v10976_v7  ;;  %v10983_v12 = vadd.f32 %v361_v23, %v104_v22  ;;  %v10986_v31 = vadd.f32 %v434_v28, %v10934_v18 }
 0x12f   :  { %12604 = vst [vmem:[#allocation21_spill] sm:$0xff] %v10978_v14  ;;  %12605 = vst [vmem:[#allocation22_spill] sm:$0xff] %v10981_v10 }
 0x130   :  { %12606 = vst [vmem:[#allocation23_spill] sm:$0xff] %v10983_v12  ;;  %12607 = vst [vmem:[#allocation24_spill] sm:$0xff] %v10986_v31 }
 0x132   :  { %v365_v44 = vpop.f32.mrb[12].mxu0  ;;  %v438_v34 = vpop.f32.mrb[12].mxu1 }
 0x133   :  { %v10988_v0 = vadd.f32 %v365_v44, %v100_v19  ;;  %v367_v32 = vpop.f32.mrb[13].mxu0  ;;  %v10991_v62 = vadd.f32 %v438_v34, %v10927_v15  ;;  %v440_v11 = vpop.f32.mrb[13].mxu1 }
 0x134   :  { %v10993_v14 = vadd.f32 %v367_v32, %v104_v22  ;;  %v369_v7 = vpop.f32.mrb[14].mxu0  ;;  %v10996_v9 = vadd.f32 %v440_v11, %v10934_v18  ;;  %v442_v23 = vpop.f32.mrb[14].mxu1  ;;  %v336_v32 = vadd.f32 %v10929_v16, %v100_v19  ;;  %v338_v11 = vadd.f32 %v337_v20, %v104_v22 }
 0x135   :  { %12608 = vst [vmem:[#allocation25_spill] sm:$0xff] %v10988_v0  ;;  %12609 = vst [vmem:[#allocation26_spill] sm:$0xff] %v10991_v62  ;;  %v10998_v12 = vadd.f32 %v369_v7, %v100_v19  ;;  %v371_v28 = vpop.f32.mrb[15].mxu0  ;;  %v11001_v31 = vadd.f32 %v442_v23, %v10927_v15  ;;  %v444_v44 = vpop.f32.mrb[15].mxu1 }
 0x136   :  { %12610 = vst [vmem:[#allocation27_spill] sm:$0xff] %v10993_v14  ;;  %12611 = vst [vmem:[#allocation28_spill] sm:$0xff] %v10996_v9  ;;  %v11003_v0 = vadd.f32 %v371_v28, %v104_v22  ;;  %v11006_v34 = vadd.f32 %v444_v44, %v10934_v18  ;;  %v409_v14 = vadd.f32 %v10931_v17, %v10927_v15 }
 0x137   :  { %12612 = vst [vmem:[#allocation29_spill] sm:$0xff] %v10998_v12  ;;  %12613 = vst [vmem:[#allocation30_spill] sm:$0xff] %v11001_v31  ;;  %v411_v9 = vadd.f32 %v410_v21, %v10934_v18 }
 0x138   :  { %12614 = vst [vmem:[#allocation31_spill] sm:$0xff] %v11003_v0  ;;  %12615 = vst [vmem:[#allocation32_spill] sm:$0xff] %v11006_v34 }
 0x13a   :  { %v715_v7 = vpop.f32.mrb[16].mxu0  ;;  %v756_v12 = vpop.f32.mrb[16].mxu1 }
 0x13b   :  { %v763_v62 = vadd.f32 %v715_v7, %v336_v32  ;;  %v765_v10 = vadd.f32 %v756_v12, %v409_v14  ;;  %v717_v23 = vpop.f32.mrb[17].mxu0  ;;  %v758_v31 = vpop.f32.mrb[17].mxu1  ;;  %v12616_v32 = vmov 0  }
 0x13c   :  { %v764_v26 = vadd.f32 %v717_v23, %v338_v11  ;;  %v766_v28 = vadd.f32 %v758_v31, %v411_v9  ;;  %v719_v0 = vpop.f32.mrb[18].mxu0  ;;  %v760_v24 = vpop.f32.mrb[18].mxu1 }
 0x13d   :  { %v8813_v44 = vmul.f32 -1.442695, %v763_v62  ;;  %v720_v34 = vpop.f32.mrb[19].mxu0  ;;  %v761_v13 = vpop.f32.mrb[19].mxu1  ;;  %v480_v0 = vld [vmem:[%s12581_s6] sm:$0xff] }
 0x13e   :  { %v8814_v16 = vmul.f32 -1.442695, %v764_v26  ;;  %v8815_v15 = vmul.f32 -1.442695, %v766_v28 }
 0x13f   :  { %10139 = vpow2.f32 %v8813_v44 }
 0x140   :  { %10141 = vpow2.f32 %v8814_v16 }
 0x141   :  { %10143 = vpow2.f32 %v8815_v15 }
 0x142   :  { %10145 = vtanh.f32 %v765_v10 }
 0x149   :  { %v10140_v17 = vpop.eup %10139 }
 0x14a   :  { %v10142_v19 = vpop.eup %10141  ;;  %v770_v18 = vadd.f32 1.0, %v10140_v17 }
 0x14b   :  { %v776_v20 = vadd.f32 1.0, %v10142_v19  ;;  %v10144_v12 = vpop.eup %10143 }
 0x14c   :  { %10147 = vrcp.f32 %v770_v18  ;;  %v10146_v14 = vpop.eup %10145  ;;  %v783_v24 = vadd.f32 1.0, %v10144_v12  ;;  %v10525_v18 = vld [vmem:[#allocation6] ss:$16 sps:$4 sm:$0xff]   ;;  %v10527_v12 = vld [vmem:[#allocation6 + $0x24] ss:$16 sps:$4 sm:$0xff]  }
 0x14d   :  { %10149 = vrcp.f32 %v776_v20  ;;  %v10526_v20 = vld [vmem:[#allocation6 + $0x8] ss:$16 sps:$4 sm:$0xff]  }
 0x14e   :  { %10151 = vrcp.f32 %v783_v24  ;;  %v10533_v24 = vld [vmem:[#allocation6 + $0x40] ss:$16 sps:$4 sm:$0xff]  }
 0x156   :  { %v10148_v21 = vpop.eup %10147 }
 0x157   :  { %v10150_v22 = vpop.eup %10149  ;;  %v787_v13 = vmul.f32 %v10148_v21, %v10146_v14  ;;  %v10528_v14 = vld [vmem:[#allocation6 + $0x2c] ss:$16 sps:$4 sm:$0xff]   ;;  %v10530_v21 = vld [vmem:[#allocation6 + $0x28] ss:$16 sps:$4 sm:$0xff]  }
 0x158   :  { %v786_v26 = vmul.f32 %v10150_v22, %v480_v0  ;;  %v10152_v10 = vpop.eup %10151  ;;  %v10529_v0 = vld [vmem:[#allocation6 + $0x20] ss:$16 sps:$4 sm:$0xff]   ;;  %v10531_v22 = vld [vmem:[#allocation6 + $0x44] ss:$16 sps:$4 sm:$0xff]  }
 0x15a   :  { %v11015_v31 = vadd.f32 %v787_v13, %v786_v26  ;;  %v10532_v13 = vld [vmem:[#allocation6 + $0x4c] ss:$16 sps:$4 sm:$0xff]   ;;  %v10534_v26 = vld [vmem:[#allocation6 + $0x48] ss:$16 sps:$4 sm:$0xff]  }
 0x15c   :  { %10153 = vtanh.f32 %v11015_v31 }
 0x166   :  { %v10154_v62 = vpop.eup %10153 }
 0x167   :  { %v11018_v9 = vmul.f32 %v10154_v62, %v10152_v10  ;;  %v10536_v10 = vld [vmem:[#allocation6 + $0x6c] ss:$16 sps:$4 sm:$0xff]   ;;  %v10537_v62 = vld [vmem:[#allocation6 + $0x60] ss:$16 sps:$4 sm:$0xff]  }
 0x169   :  { %v799_v34 = vpack.c.bf16 %v11018_v9, %v11018_v9 }
 0x16b   :  { %1025 = vmatmul.mubr.bf16.vlgmr.msra.gmra.mrb[20].mxu0 %v799_v34  ;;  %1066 = vmatmul.mubr.bf16.vlgmr.msra.gmra.mrb[20].mxu1 %v799_v34  ;;  %v10538_v34 = vld [vmem:[#allocation6 + $0x68] ss:$16 sps:$4 sm:$0xff]  }
 0x16c   :  { %1305 = vmatpush1.bf16.msra.mxu0 %v10767_v36  ;;  %1346 = vmatpush1.bf16.msra.mxu1 %v10769_v37  ;;  %v10523_v36 = vld [vmem:[#allocation6 + $0x4] ss:$16 sps:$4 sm:$0xff]   ;;  %v10524_v37 = vld [vmem:[#allocation6 + $0xc] ss:$16 sps:$4 sm:$0xff]  }
 0x16d   :  { %1306 = vmatprep.subr.bf16.mxu0 %v10773_v38  ;;  %1347 = vmatprep.subr.bf16.mxu1 %v10775_v39 }
 0x16e   :  { %1336 = vmatprep.mubr.bf16.mxu0 %v12616_v32  ;;  %1377 = vmatprep.mubr.bf16.mxu1 %v12616_v32 }
 0x170   :  { %1307 = vmatpush1.bf16.msra.mxu0 %v10777_v40  ;;  %1348 = vmatpush1.bf16.msra.mxu1 %v10781_v41 }
 0x171   :  { %1308 = vmatprep.subr.bf16.mxu0 %v10785_v42  ;;  %1349 = vmatprep.subr.bf16.mxu1 %v10787_v43 }
 0x174   :  { %1309 = vmatpush1.bf16.msra.mxu0 %v10794_v45  ;;  %1350 = vmatpush1.bf16.msra.mxu1 %v10796_v46 }
 0x175   :  { %1310 = vmatprep.subr.bf16.mxu0 %v10800_v47  ;;  %1351 = vmatprep.subr.bf16.mxu1 %v10804_v48 }
 0x178   :  { %1311 = vmatpush1.bf16.msra.mxu0 %v10806_v49  ;;  %1352 = vmatpush1.bf16.msra.mxu1 %v10808_v50 }
 0x179   :  { %1312 = vmatprep.subr.bf16.mxu0 %v10812_v51  ;;  %1353 = vmatprep.subr.bf16.mxu1 %v10816_v52 }
 0x17c   :  { %1313 = vmatpush1.bf16.msra.mxu0 %v10823_v54  ;;  %1354 = vmatpush1.bf16.msra.mxu1 %v10825_v55 }
 0x17d   :  { %1314 = vmatprep.subr.bf16.mxu0 %v10827_v56  ;;  %1355 = vmatprep.subr.bf16.mxu1 %v10829_v57 }
 0x180   :  { %1315 = vmatpush1.bf16.msra.mxu0 %v10835_v58  ;;  %1356 = vmatpush1.bf16.msra.mxu1 %v10837_v59 }
 0x181   :  { %1316 = vmatprep.subr.bf16.mxu0 %v10839_v60  ;;  %1357 = vmatprep.subr.bf16.mxu1 %v10841_v61 }
 0x184   :  { %1317 = vmatpush1.bf16.msra.mxu0 %v10852_v63  ;;  %1358 = vmatpush1.bf16.msra.mxu1 %v10854_v1 }
 0x185   :  { %1318 = vmatprep.subr.bf16.mxu0 %v10856_v2  ;;  %1359 = vmatprep.subr.bf16.mxu1 %v10858_v3 }
 0x188   :  { %1319 = vmatpush1.bf16.msra.mxu0 %v10864_v4  ;;  %1360 = vmatpush1.bf16.msra.mxu1 %v10866_v5 }
 0x189   :  { %1616 = vmatprep.subr.bf16.mxu0 %v10523_v36  ;;  %1657 = vmatprep.subr.bf16.mxu1 %v10524_v37  ;;  %v10539_v36 = vld [vmem:[#allocation6 + $0x84] ss:$16 sps:$4 sm:$0xff]   ;;  %v10540_v37 = vld [vmem:[#allocation6 + $0x8c] ss:$16 sps:$4 sm:$0xff]  }
 0x23e   :  { %v1026_v38 = vpop.f32.mrb[20].mxu0  ;;  %v1067_v39 = vpop.f32.mrb[20].mxu1 }
 0x23f   :  { %v1074_v40 = vadd.f32 %v1026_v38, %v10938_v25  ;;  %v1076_v41 = vadd.f32 %v1067_v39, %v10941_v27  ;;  %v1028_v42 = vpop.f32.mrb[21].mxu0  ;;  %v1069_v43 = vpop.f32.mrb[21].mxu1  ;;  %v10541_v38 = vld [vmem:[#allocation6 + $0x80] ss:$16 sps:$4 sm:$0xff]   ;;  %v10542_v39 = vld [vmem:[#allocation6 + $0x88] ss:$16 sps:$4 sm:$0xff]  }
 0x240   :  { %v1075_v45 = vadd.f32 %v1028_v42, %v10943_v29  ;;  %v1077_v46 = vadd.f32 %v1069_v43, %v10946_v30  ;;  %v1030_v47 = vpop.f32.mrb[22].mxu0  ;;  %v1071_v48 = vpop.f32.mrb[22].mxu1 }
 0x241   :  { %v8848_v49 = vmul.f32 -1.442695, %v1074_v40  ;;  %v1031_v50 = vpop.f32.mrb[23].mxu0  ;;  %v1072_v51 = vpop.f32.mrb[23].mxu1  ;;  %v10543_v40 = vld [vmem:[#allocation6 + $0xa4] ss:$16 sps:$4 sm:$0xff]  }
 0x242   :  { %v8849_v52 = vmul.f32 -1.442695, %v1075_v45  ;;  %v8850_v54 = vmul.f32 -1.442695, %v1077_v46 }
 0x243   :  { %10155 = vpow2.f32 %v8848_v49 }
 0x244   :  { %10157 = vpow2.f32 %v8849_v52 }
 0x245   :  { %10159 = vpow2.f32 %v8850_v54 }
 0x246   :  { %10161 = vtanh.f32 %v1076_v41  ;;  %v10544_v41 = vld [vmem:[#allocation6 + $0xac] ss:$16 sps:$4 sm:$0xff]  }
 0x24d   :  { %v10156_v55 = vpop.eup %10155 }
 0x24e   :  { %v10158_v56 = vpop.eup %10157  ;;  %v1081_v57 = vadd.f32 1.0, %v10156_v55 }
 0x24f   :  { %v1087_v25 = vadd.f32 1.0, %v10158_v56  ;;  %v10160_v27 = vpop.eup %10159 }
 0x250   :  { %10163 = vrcp.f32 %v1081_v57  ;;  %v10162_v29 = vpop.eup %10161  ;;  %v1094_v23 = vadd.f32 1.0, %v10160_v27 }
 0x251   :  { %10165 = vrcp.f32 %v1087_v25 }
 0x252   :  { %10167 = vrcp.f32 %v1094_v23  ;;  %v11098_v23 = vld [vmem:[#allocation6 + $0x8] ss:$16 sps:$4 sm:$0xff]  }
 0x25a   :  { %v10164_v30 = vpop.eup %10163 }
 0x25b   :  { %v10166_v11 = vpop.eup %10165  ;;  %v1098_v7 = vmul.f32 %v10164_v30, %v10162_v29  ;;  %v11092_v30 = vld [vmem:[#allocation6 + $0x4] ss:$16 sps:$4 sm:$0xff]  }
 0x25c   :  { %v1097_v28 = vmul.f32 %v10166_v11, %v11015_v31  ;;  %v10168_v16 = vpop.eup %10167  ;;  %v10535_v31 = vld [vmem:[#allocation6 + $0x64] ss:$16 sps:$4 sm:$0xff]   ;;  %v11094_v11 = vld [vmem:[#allocation6 + $0xc] ss:$16 sps:$4 sm:$0xff]  }
 0x25e   :  { %v11059_v44 = vadd.f32 %v1098_v7, %v1097_v28  ;;  %v11096_v7 = vld [vmem:[#allocation6] ss:$16 sps:$4 sm:$0xff]   ;;  %v11104_v28 = vld [vmem:[#allocation6 + $0x24] ss:$16 sps:$4 sm:$0xff]  }
 0x260   :  { %10169 = vtanh.f32 %v11059_v44 }
 0x26a   :  { %v10170_v15 = vpop.eup %10169 }
 0x26b   :  { %v11062_v17 = vmul.f32 %v10170_v15, %v10168_v16  ;;  %v11108_v16 = vld [vmem:[#allocation6 + $0x20] ss:$16 sps:$4 sm:$0xff]   ;;  %v11110_v15 = vld [vmem:[#allocation6 + $0x28] ss:$16 sps:$4 sm:$0xff]  }
 0x26d   :  { %v1111_v19 = vpack.c.bf16 %v11062_v17, %v11062_v17 }
 0x26f   :  { %1337 = vmatmul.mubr.bf16.vlgmr.msra.gmra.mrb[24].mxu0 %v1111_v19  ;;  %1378 = vmatmul.mubr.bf16.vlgmr.msra.gmra.mrb[24].mxu1 %v1111_v19  ;;  %v11116_v19 = vld [vmem:[#allocation6 + $0x44] ss:$16 sps:$4 sm:$0xff]  }
 0x270   :  { %1617 = vmatpush1.bf16.msra.mxu0 %v10525_v18  ;;  %1658 = vmatpush1.bf16.msra.mxu1 %v10526_v20  ;;  %v11118_v18 = vld [vmem:[#allocation6 + $0x4c] ss:$16 sps:$4 sm:$0xff]   ;;  %v11120_v20 = vld [vmem:[#allocation6 + $0x40] ss:$16 sps:$4 sm:$0xff]  }
 0x271   :  { %1618 = vmatprep.subr.bf16.mxu0 %v10527_v12  ;;  %1659 = vmatprep.subr.bf16.mxu1 %v10528_v14  ;;  %v11122_v12 = vld [vmem:[#allocation6 + $0x48] ss:$16 sps:$4 sm:$0xff]   ;;  %v11128_v14 = vld [vmem:[#allocation6 + $0x64] ss:$16 sps:$4 sm:$0xff]  }
 0x272   :  { %1648 = vmatprep.mubr.bf16.mxu0 %v12616_v32  ;;  %1689 = vmatprep.mubr.bf16.mxu1 %v12616_v32 }
 0x274   :  { %1619 = vmatpush1.bf16.msra.mxu0 %v10529_v0  ;;  %1660 = vmatpush1.bf16.msra.mxu1 %v10530_v21  ;;  %v11130_v0 = vld [vmem:[#allocation6 + $0x6c] ss:$16 sps:$4 sm:$0xff]   ;;  %v11132_v21 = vld [vmem:[#allocation6 + $0x60] ss:$16 sps:$4 sm:$0xff]  }
 0x275   :  { %1620 = vmatprep.subr.bf16.mxu0 %v10531_v22  ;;  %1661 = vmatprep.subr.bf16.mxu1 %v10532_v13  ;;  %v11134_v22 = vld [vmem:[#allocation6 + $0x68] ss:$16 sps:$4 sm:$0xff]   ;;  %v11140_v13 = vld [vmem:[#allocation6 + $0x84] ss:$16 sps:$4 sm:$0xff]  }
 0x278   :  { %1621 = vmatpush1.bf16.msra.mxu0 %v10533_v24  ;;  %1662 = vmatpush1.bf16.msra.mxu1 %v10534_v26  ;;  %v11142_v24 = vld [vmem:[#allocation6 + $0x8c] ss:$16 sps:$4 sm:$0xff]   ;;  %v11144_v26 = vld [vmem:[#allocation6 + $0x80] ss:$16 sps:$4 sm:$0xff]  }
 0x279   :  { %1622 = vmatprep.subr.bf16.mxu0 %v10535_v31  ;;  %1663 = vmatprep.subr.bf16.mxu1 %v10536_v10  ;;  %v11146_v31 = vld [vmem:[#allocation6 + $0x88] ss:$16 sps:$4 sm:$0xff]   ;;  %v11150_v10 = vld [vmem:[#allocation6 + $0xa4] ss:$16 sps:$4 sm:$0xff]  }
 0x27c   :  { %1623 = vmatpush1.bf16.msra.mxu0 %v10537_v62  ;;  %1664 = vmatpush1.bf16.msra.mxu1 %v10538_v34  ;;  %v11154_v62 = vld [vmem:[#allocation6 + $0xa0] ss:$16 sps:$4 sm:$0xff]   ;;  %v11156_v34 = vld [vmem:[#allocation6 + $0xa8] ss:$16 sps:$4 sm:$0xff]  }
 0x27d   :  { %1624 = vmatprep.subr.bf16.mxu0 %v10539_v36  ;;  %1665 = vmatprep.subr.bf16.mxu1 %v10540_v37  ;;  %v11158_v36 = vld [vmem:[#allocation6 + $0xac] ss:$16 sps:$4 sm:$0xff]   ;;  %v11161_v37 = vld [vmem:[#allocation6 + $0xc4] ss:$16 sps:$4 sm:$0xff]  }
 0x280   :  { %1625 = vmatpush1.bf16.msra.mxu0 %v10541_v38  ;;  %1666 = vmatpush1.bf16.msra.mxu1 %v10542_v39  ;;  %v11163_v38 = vld [vmem:[#allocation6 + $0xcc] ss:$16 sps:$4 sm:$0xff]   ;;  %v11168_v39 = vld [vmem:[#allocation6 + $0xc0] ss:$16 sps:$4 sm:$0xff]  }
 0x281   :  { %1626 = vmatprep.subr.bf16.mxu0 %v10543_v40  ;;  %1667 = vmatprep.subr.bf16.mxu1 %v10544_v41  ;;  %v11170_v40 = vld [vmem:[#allocation6 + $0xc8] ss:$16 sps:$4 sm:$0xff]   ;;  %v11174_v41 = vld [vmem:[#allocation6 + $0xe4] ss:$16 sps:$4 sm:$0xff]  }
 0x284   :  { %1627 = vmatpush1.bf16.msra.mxu0 %v10835_v58  ;;  %1668 = vmatpush1.bf16.msra.mxu1 %v10837_v59 }
 0x285   :  { %1628 = vmatprep.subr.bf16.mxu0 %v10839_v60  ;;  %1669 = vmatprep.subr.bf16.mxu1 %v10841_v61 }
 0x288   :  { %1629 = vmatpush1.bf16.msra.mxu0 %v10852_v63  ;;  %1670 = vmatpush1.bf16.msra.mxu1 %v10854_v1 }
 0x289   :  { %1630 = vmatprep.subr.bf16.mxu0 %v10856_v2  ;;  %1671 = vmatprep.subr.bf16.mxu1 %v10858_v3 }
 0x28c   :  { %1631 = vmatpush1.bf16.msra.mxu0 %v10864_v4  ;;  %1672 = vmatpush1.bf16.msra.mxu1 %v10866_v5 }
 0x28d   :  { %1928 = vmatprep.subr.bf16.mxu0 %v11092_v30  ;;  %1969 = vmatprep.subr.bf16.mxu1 %v11094_v11 }
 0x342   :  { %v1338_v42 = vpop.f32.mrb[24].mxu0  ;;  %v1379_v58 = vpop.f32.mrb[24].mxu1 }
 0x343   :  { %v1386_v59 = vadd.f32 %v1338_v42, %v10948_v33  ;;  %v1388_v60 = vadd.f32 %v1379_v58, %v10951_v35  ;;  %v1340_v43 = vpop.f32.mrb[25].mxu0  ;;  %v1381_v61 = vpop.f32.mrb[25].mxu1  ;;  %v11176_v42 = vld [vmem:[#allocation6 + $0xec] ss:$16 sps:$4 sm:$0xff]   ;;  %v11180_v58 = vld [vmem:[#allocation6 + $0xe0] ss:$16 sps:$4 sm:$0xff]  }
 0x344   :  { %v1387_v63 = vadd.f32 %v1340_v43, %v10953_v53  ;;  %v1389_v1 = vadd.f32 %v1381_v61, %v10956_v6  ;;  %v1342_v45 = vpop.f32.mrb[26].mxu0  ;;  %v1383_v2 = vpop.f32.mrb[26].mxu1 }
 0x345   :  { %v8883_v46 = vmul.f32 -1.442695, %v1386_v59  ;;  %v1343_v3 = vpop.f32.mrb[27].mxu0  ;;  %v1384_v47 = vpop.f32.mrb[27].mxu1  ;;  %v11182_v59 = vld [vmem:[#allocation6 + $0xe8] ss:$16 sps:$4 sm:$0xff]  }
 0x346   :  { %v8884_v4 = vmul.f32 -1.442695, %v1387_v63  ;;  %v8885_v5 = vmul.f32 -1.442695, %v1389_v1  ;;  %v12617_v63 = vld [vmem:[#allocation14_spill] sm:$0xff]  ;;  %v12619_v47 = vld [vmem:[#allocation16_spill] sm:$0xff] }
 0x347   :  { %10171 = vpow2.f32 %v8883_v46  ;;  %v12618_v46 = vld [vmem:[#allocation15_spill] sm:$0xff] }
 0x348   :  { %10173 = vpow2.f32 %v8884_v4 }
 0x349   :  { %10175 = vpow2.f32 %v8885_v5 }
 0x34a   :  { %10177 = vtanh.f32 %v1388_v60 }
 0x351   :  { %v10172_v48 = vpop.eup %10171 }
 0x352   :  { %v10174_v49 = vpop.eup %10173  ;;  %v1393_v33 = vadd.f32 1.0, %v10172_v48 }
 0x353   :  { %v1399_v35 = vadd.f32 1.0, %v10174_v49  ;;  %v10176_v53 = vpop.eup %10175 }
 0x354   :  { %10179 = vrcp.f32 %v1393_v33  ;;  %v10178_v50 = vpop.eup %10177  ;;  %v1406_v54 = vadd.f32 1.0, %v10176_v53 }
 0x355   :  { %10181 = vrcp.f32 %v1399_v35 }
 0x356   :  { %10183 = vrcp.f32 %v1406_v54 }
 0x35e   :  { %v10180_v6 = vpop.eup %10179 }
 0x35f   :  { %v10182_v51 = vpop.eup %10181  ;;  %v1410_v52 = vmul.f32 %v10180_v6, %v10178_v50 }
 0x360   :  { %v1409_v55 = vmul.f32 %v10182_v51, %v11059_v44  ;;  %v10184_v57 = vpop.eup %10183  ;;  %v11106_v44 = vld [vmem:[#allocation6 + $0x2c] ss:$16 sps:$4 sm:$0xff]  }
 0x362   :  { %v11083_v56 = vadd.f32 %v1410_v52, %v1409_v55 }
 0x364   :  { %10185 = vtanh.f32 %v11083_v56 }
 0x36e   :  { %v10186_v25 = vpop.eup %10185 }
 0x36f   :  { %v11086_v27 = vmul.f32 %v10186_v25, %v10184_v57 }
 0x371   :  { %v1423_v29 = vpack.c.bf16 %v11086_v27, %v11086_v27 }
 0x373   :  { %1649 = vmatmul.mubr.bf16.vlgmr.msra.gmra.mrb[28].mxu0 %v1423_v29  ;;  %1690 = vmatmul.mubr.bf16.vlgmr.msra.gmra.mrb[28].mxu1 %v1423_v29 }
 0x374   :  { %1960 = vmatprep.mubr.bf16.mxu0 %v12616_v32  ;;  %2001 = vmatprep.mubr.bf16.mxu1 %v12616_v32 }
 0x375   :  { %1929 = vmatpush1.bf16.msra.mxu0 %v11096_v7  ;;  %1970 = vmatpush1.bf16.msra.mxu1 %v11098_v23 }
 0x376   :  { %1930 = vmatprep.subr.bf16.mxu0 %v11104_v28  ;;  %1971 = vmatprep.subr.bf16.mxu1 %v11106_v44 }
 0x379   :  { %1931 = vmatpush1.bf16.msra.mxu0 %v11108_v16  ;;  %1972 = vmatpush1.bf16.msra.mxu1 %v11110_v15 }
 0x37a   :  { %1932 = vmatprep.subr.bf16.mxu0 %v11116_v19  ;;  %1973 = vmatprep.subr.bf16.mxu1 %v11118_v18 }
 0x37d   :  { %1933 = vmatpush1.bf16.msra.mxu0 %v11120_v20  ;;  %1974 = vmatpush1.bf16.msra.mxu1 %v11122_v12 }
 0x37e   :  { %1934 = vmatprep.subr.bf16.mxu0 %v11128_v14  ;;  %1975 = vmatprep.subr.bf16.mxu1 %v11130_v0 }
 0x381   :  { %1935 = vmatpush1.bf16.msra.mxu0 %v11132_v21  ;;  %1976 = vmatpush1.bf16.msra.mxu1 %v11134_v22 }
 0x382   :  { %1936 = vmatprep.subr.bf16.mxu0 %v11140_v13  ;;  %1977 = vmatprep.subr.bf16.mxu1 %v11142_v24 }
 0x385   :  { %1937 = vmatpush1.bf16.msra.mxu0 %v11144_v26  ;;  %1978 = vmatpush1.bf16.msra.mxu1 %v11146_v31 }
 0x386   :  { %1938 = vmatprep.subr.bf16.mxu0 %v11150_v10  ;;  %1979 = vmatprep.subr.bf16.mxu1 %v11158_v36 }
 0x389   :  { %1939 = vmatpush1.bf16.msra.mxu0 %v11154_v62  ;;  %1980 = vmatpush1.bf16.msra.mxu1 %v11156_v34 }
 0x38a   :  { %1940 = vmatprep.subr.bf16.mxu0 %v11161_v37  ;;  %1981 = vmatprep.subr.bf16.mxu1 %v11163_v38 }
 0x38d   :  { %1941 = vmatpush1.bf16.msra.mxu0 %v11168_v39  ;;  %1982 = vmatpush1.bf16.msra.mxu1 %v11170_v40 }
 0x38e   :  { %1942 = vmatprep.subr.bf16.mxu0 %v11174_v41  ;;  %1983 = vmatprep.subr.bf16.mxu1 %v11176_v42 }
 0x391   :  { %1943 = vmatpush1.bf16.msra.mxu0 %v11180_v58  ;;  %1984 = vmatpush1.bf16.msra.mxu1 %v11182_v59 }
 0x392   :  { %2240 = vmatprep.subr.bf16.mxu0 %v11092_v30  ;;  %2281 = vmatprep.subr.bf16.mxu1 %v11094_v11 }
 0x446   :  { %v1650_v60 = vpop.f32.mrb[28].mxu0  ;;  %v1691_v43 = vpop.f32.mrb[28].mxu1 }
 0x447   :  { %v1698_v61 = vadd.f32 %v1650_v60, %v10958_v8  ;;  %v1700_v1 = vadd.f32 %v1691_v43, %v12617_v63  ;;  %v1652_v45 = vpop.f32.mrb[29].mxu0  ;;  %v1693_v2 = vpop.f32.mrb[29].mxu1 }
 0x448   :  { %v1699_v3 = vadd.f32 %v1652_v45, %v12618_v46  ;;  %v1701_v4 = vadd.f32 %v1693_v2, %v12619_v47  ;;  %v1654_v5 = vpop.f32.mrb[30].mxu0  ;;  %v1695_v48 = vpop.f32.mrb[30].mxu1 }
 0x449   :  { %v8918_v49 = vmul.f32 -1.442695, %v1698_v61  ;;  %v1655_v33 = vpop.f32.mrb[31].mxu0  ;;  %v1696_v35 = vpop.f32.mrb[31].mxu1 }
 0x44a   :  { %v8919_v53 = vmul.f32 -1.442695, %v1699_v3  ;;  %v8920_v50 = vmul.f32 -1.442695, %v1701_v4  ;;  %v12620_v3 = vld [vmem:[#allocation17_spill] sm:$0xff]  ;;  %v12621_v4 = vld [vmem:[#allocation18_spill] sm:$0xff] }
 0x44b   :  { %10187 = vpow2.f32 %v8918_v49  ;;  %v12622_v33 = vld [vmem:[#allocation19_spill] sm:$0xff] }
 0x44c   :  { %10189 = vpow2.f32 %v8919_v53  ;;  %v12623_v53 = vld [vmem:[#allocation20_spill] sm:$0xff] }
 0x44d   :  { %10191 = vpow2.f32 %v8920_v50 }
 0x44e   :  { %10193 = vtanh.f32 %v1700_v1 }
 0x455   :  { %v10188_v6 = vpop.eup %10187 }
 0x456   :  { %v10190_v51 = vpop.eup %10189  ;;  %v1705_v8 = vadd.f32 1.0, %v10188_v6 }
 0x457   :  { %v1711_v52 = vadd.f32 1.0, %v10190_v51  ;;  %v10192_v54 = vpop.eup %10191 }
 0x458   :  { %10195 = vrcp.f32 %v1705_v8  ;;  %v10194_v55 = vpop.eup %10193  ;;  %v1718_v60 = vadd.f32 1.0, %v10192_v54 }
 0x459   :  { %10197 = vrcp.f32 %v1711_v52 }
 0x45a   :  { %10199 = vrcp.f32 %v1718_v60 }
 0x462   :  { %v10196_v57 = vpop.eup %10195 }
 0x463   :  { %v10198_v25 = vpop.eup %10197  ;;  %v1722_v29 = vmul.f32 %v10196_v57, %v10194_v55 }
 0x464   :  { %v1721_v43 = vmul.f32 %v10198_v25, %v11083_v56  ;;  %v10200_v63 = vpop.eup %10199 }
 0x466   :  { %v11195_v61 = vadd.f32 %v1722_v29, %v1721_v43 }
 0x468   :  { %10201 = vtanh.f32 %v11195_v61 }
 0x472   :  { %v10202_v45 = vpop.eup %10201 }
 0x473   :  { %v11198_v2 = vmul.f32 %v10202_v45, %v10200_v63 }
 0x475   :  { %v1735_v1 = vpack.c.bf16 %v11198_v2, %v11198_v2 }
 0x477   :  { %1961 = vmatmul.mubr.bf16.vlgmr.msra.gmra.mrb[32].mxu0 %v1735_v1  ;;  %2002 = vmatmul.mubr.bf16.vlgmr.msra.gmra.mrb[32].mxu1 %v1735_v1 }
 0x478   :  { %2241 = vmatpush1.bf16.msra.mxu0 %v11096_v7  ;;  %2282 = vmatpush1.bf16.msra.mxu1 %v11098_v23 }
 0x479   :  { %2242 = vmatprep.subr.bf16.mxu0 %v11104_v28  ;;  %2283 = vmatprep.subr.bf16.mxu1 %v11106_v44 }
 0x47a   :  { %2272 = vmatprep.mubr.bf16.mxu0 %v12616_v32  ;;  %2313 = vmatprep.mubr.bf16.mxu1 %v12616_v32 }
 0x47c   :  { %2243 = vmatpush1.bf16.msra.mxu0 %v11108_v16  ;;  %2284 = vmatpush1.bf16.msra.mxu1 %v11110_v15 }
 0x47d   :  { %2244 = vmatprep.subr.bf16.mxu0 %v11116_v19  ;;  %2285 = vmatprep.subr.bf16.mxu1 %v11118_v18 }
 0x480   :  { %2245 = vmatpush1.bf16.msra.mxu0 %v11120_v20  ;;  %2286 = vmatpush1.bf16.msra.mxu1 %v11122_v12 }
 0x481   :  { %2246 = vmatprep.subr.bf16.mxu0 %v11128_v14  ;;  %2287 = vmatprep.subr.bf16.mxu1 %v11130_v0 }
 0x484   :  { %2247 = vmatpush1.bf16.msra.mxu0 %v11132_v21  ;;  %2288 = vmatpush1.bf16.msra.mxu1 %v11134_v22 }
 0x485   :  { %2248 = vmatprep.subr.bf16.mxu0 %v11140_v13  ;;  %2289 = vmatprep.subr.bf16.mxu1 %v11142_v24 }
 0x488   :  { %2249 = vmatpush1.bf16.msra.mxu0 %v11144_v26  ;;  %2290 = vmatpush1.bf16.msra.mxu1 %v11146_v31 }
 0x489   :  { %2250 = vmatprep.subr.bf16.mxu0 %v11150_v10  ;;  %2291 = vmatprep.subr.bf16.mxu1 %v11158_v36 }
 0x48c   :  { %2251 = vmatpush1.bf16.msra.mxu0 %v11154_v62  ;;  %2292 = vmatpush1.bf16.msra.mxu1 %v11156_v34 }
 0x48d   :  { %2252 = vmatprep.subr.bf16.mxu0 %v11161_v37  ;;  %2293 = vmatprep.subr.bf16.mxu1 %v11163_v38 }
 0x490   :  { %2253 = vmatpush1.bf16.msra.mxu0 %v11168_v39  ;;  %2294 = vmatpush1.bf16.msra.mxu1 %v11170_v40 }
 0x491   :  { %2254 = vmatprep.subr.bf16.mxu0 %v11174_v41  ;;  %2295 = vmatprep.subr.bf16.mxu1 %v11176_v42 }
 0x494   :  { %2255 = vmatpush1.bf16.msra.mxu0 %v11180_v58  ;;  %2296 = vmatpush1.bf16.msra.mxu1 %v11182_v59 }
 0x495   :  { %2552 = vmatprep.subr.bf16.mxu0 %v11092_v30  ;;  %2593 = vmatprep.subr.bf16.mxu1 %v11094_v11 }
 0x54a   :  { %v1962_v56 = vpop.f32.mrb[32].mxu0  ;;  %v2003_v46 = vpop.f32.mrb[32].mxu1 }
 0x54b   :  { %v2010_v47 = vadd.f32 %v1962_v56, %v12620_v3  ;;  %v2012_v5 = vadd.f32 %v2003_v46, %v12621_v4  ;;  %v1964_v48 = vpop.f32.mrb[33].mxu0  ;;  %v2005_v49 = vpop.f32.mrb[33].mxu1 }
 0x54c   :  { %v2011_v35 = vadd.f32 %v1964_v48, %v12622_v33  ;;  %v2013_v50 = vadd.f32 %v2005_v49, %v12623_v53  ;;  %v1966_v6 = vpop.f32.mrb[34].mxu0  ;;  %v2007_v51 = vpop.f32.mrb[34].mxu1  ;;  %v12624_v53 = vld [vmem:[#allocation21_spill] sm:$0xff] }
 0x54d   :  { %v8953_v8 = vmul.f32 -1.442695, %v2010_v47  ;;  %v1967_v52 = vpop.f32.mrb[35].mxu0  ;;  %v2008_v54 = vpop.f32.mrb[35].mxu1  ;;  %v12625_v6 = vld [vmem:[#allocation22_spill] sm:$0xff] }
 0x54e   :  { %v8954_v55 = vmul.f32 -1.442695, %v2011_v35  ;;  %v8955_v57 = vmul.f32 -1.442695, %v2013_v50  ;;  %v12626_v54 = vld [vmem:[#allocation23_spill] sm:$0xff] }
 0x54f   :  { %10203 = vpow2.f32 %v8953_v8 }
 0x550   :  { %10205 = vpow2.f32 %v8954_v55 }
 0x551   :  { %10207 = vpow2.f32 %v8955_v57  ;;  %v12627_v57 = vld [vmem:[#allocation24_spill] sm:$0xff] }
 0x552   :  { %10209 = vtanh.f32 %v2012_v5 }
 0x559   :  { %v10204_v25 = vpop.eup %10203 }
 0x55a   :  { %v10206_v29 = vpop.eup %10205  ;;  %v2017_v60 = vadd.f32 1.0, %v10204_v25 }
 0x55b   :  { %v2023_v43 = vadd.f32 1.0, %v10206_v29  ;;  %v10208_v63 = vpop.eup %10207 }
 0x55c   :  { %10211 = vrcp.f32 %v2017_v60  ;;  %v10210_v45 = vpop.eup %10209  ;;  %v2030_v3 = vadd.f32 1.0, %v10208_v63 }
 0x55d   :  { %10213 = vrcp.f32 %v2023_v43 }
 0x55e   :  { %10215 = vrcp.f32 %v2030_v3 }
 0x566   :  { %v10212_v1 = vpop.eup %10211 }
 0x567   :  { %v10214_v56 = vpop.eup %10213  ;;  %v2034_v46 = vmul.f32 %v10212_v1, %v10210_v45 }
 0x568   :  { %v2033_v47 = vmul.f32 %v10214_v56, %v11195_v61  ;;  %v10216_v48 = vpop.eup %10215 }
 0x56a   :  { %v11241_v4 = vadd.f32 %v2034_v46, %v2033_v47 }
 0x56c   :  { %10217 = vtanh.f32 %v11241_v4 }
 0x576   :  { %v10218_v49 = vpop.eup %10217 }
 0x577   :  { %v11244_v33 = vmul.f32 %v10218_v49, %v10216_v48 }
 0x579   :  { %v2047_v5 = vpack.c.bf16 %v11244_v33, %v11244_v33 }
 0x57b   :  { %2273 = vmatmul.mubr.bf16.vlgmr.msra.gmra.mrb[36].mxu0 %v2047_v5  ;;  %2314 = vmatmul.mubr.bf16.vlgmr.msra.gmra.mrb[36].mxu1 %v2047_v5 }
 0x57c   :  { %2553 = vmatpush1.bf16.msra.mxu0 %v11096_v7  ;;  %2594 = vmatpush1.bf16.msra.mxu1 %v11098_v23 }
 0x57d   :  { %2554 = vmatprep.subr.bf16.mxu0 %v11104_v28  ;;  %2595 = vmatprep.subr.bf16.mxu1 %v11106_v44 }
 0x57e   :  { %2584 = vmatprep.mubr.bf16.mxu0 %v12616_v32  ;;  %2625 = vmatprep.mubr.bf16.mxu1 %v12616_v32 }
 0x580   :  { %2555 = vmatpush1.bf16.msra.mxu0 %v11108_v16  ;;  %2596 = vmatpush1.bf16.msra.mxu1 %v11110_v15 }
 0x581   :  { %2556 = vmatprep.subr.bf16.mxu0 %v11116_v19  ;;  %2597 = vmatprep.subr.bf16.mxu1 %v11118_v18 }
 0x584   :  { %2557 = vmatpush1.bf16.msra.mxu0 %v11120_v20  ;;  %2598 = vmatpush1.bf16.msra.mxu1 %v11122_v12 }
 0x585   :  { %2558 = vmatprep.subr.bf16.mxu0 %v11128_v14  ;;  %2599 = vmatprep.subr.bf16.mxu1 %v11130_v0 }
 0x588   :  { %2559 = vmatpush1.bf16.msra.mxu0 %v11132_v21  ;;  %2600 = vmatpush1.bf16.msra.mxu1 %v11134_v22 }
 0x589   :  { %2560 = vmatprep.subr.bf16.mxu0 %v11140_v13  ;;  %2601 = vmatprep.subr.bf16.mxu1 %v11142_v24 }
 0x58c   :  { %2561 = vmatpush1.bf16.msra.mxu0 %v11144_v26  ;;  %2602 = vmatpush1.bf16.msra.mxu1 %v11146_v31 }
 0x58d   :  { %2562 = vmatprep.subr.bf16.mxu0 %v11150_v10  ;;  %2603 = vmatprep.subr.bf16.mxu1 %v11158_v36 }
 0x590   :  { %2563 = vmatpush1.bf16.msra.mxu0 %v11154_v62  ;;  %2604 = vmatpush1.bf16.msra.mxu1 %v11156_v34 }
 0x591   :  { %2564 = vmatprep.subr.bf16.mxu0 %v11161_v37  ;;  %2605 = vmatprep.subr.bf16.mxu1 %v11163_v38 }
 0x594   :  { %2565 = vmatpush1.bf16.msra.mxu0 %v11168_v39  ;;  %2606 = vmatpush1.bf16.msra.mxu1 %v11170_v40 }
 0x595   :  { %2566 = vmatprep.subr.bf16.mxu0 %v11174_v41  ;;  %2607 = vmatprep.subr.bf16.mxu1 %v11176_v42 }
 0x598   :  { %2567 = vmatpush1.bf16.msra.mxu0 %v11180_v58  ;;  %2608 = vmatpush1.bf16.msra.mxu1 %v11182_v59 }
 0x599   :  { %2864 = vmatprep.subr.bf16.mxu0 %v11092_v30  ;;  %2905 = vmatprep.subr.bf16.mxu1 %v11094_v11 }
 0x64e   :  { %v2274_v61 = vpop.f32.mrb[36].mxu0  ;;  %v2315_v35 = vpop.f32.mrb[36].mxu1 }
 0x64f   :  { %v2322_v50 = vadd.f32 %v2274_v61, %v12624_v53  ;;  %v2324_v51 = vadd.f32 %v2315_v35, %v12625_v6  ;;  %v2276_v8 = vpop.f32.mrb[37].mxu0  ;;  %v2317_v52 = vpop.f32.mrb[37].mxu1 }
 0x650   :  { %v2323_v55 = vadd.f32 %v2276_v8, %v12626_v54  ;;  %v2325_v25 = vadd.f32 %v2317_v52, %v12627_v57  ;;  %v2278_v29 = vpop.f32.mrb[38].mxu0  ;;  %v2319_v60 = vpop.f32.mrb[38].mxu1 }
 0x651   :  { %v8988_v43 = vmul.f32 -1.442695, %v2322_v50  ;;  %v2279_v63 = vpop.f32.mrb[39].mxu0  ;;  %v2320_v45 = vpop.f32.mrb[39].mxu1  ;;  %v9851_v60 = vld [vmem:[#allocation4] ss:$16 sps:$4 sm:$0xff]  }
 0x652   :  { %v8989_v30 = vmul.f32 -1.442695, %v2323_v55  ;;  %v8990_v11 = vmul.f32 -1.442695, %v2325_v25  ;;  %v9859_v45 = vld [vmem:[#allocation4 + $0x24] ss:$16 sps:$4 sm:$0xff]  }
 0x653   :  { %10219 = vpow2.f32 %v8988_v43  ;;  %v9854_v43 = vld [vmem:[#allocation4 + $0x8] ss:$16 sps:$4 sm:$0xff]  }
 0x654   :  { %10221 = vpow2.f32 %v8989_v30  ;;  %v9862_v30 = vld [vmem:[#allocation4 + $0x2c] ss:$16 sps:$4 sm:$0xff]  }
 0x655   :  { %10223 = vpow2.f32 %v8990_v11  ;;  %v9857_v11 = vld [vmem:[#allocation4 + $0x20] ss:$16 sps:$4 sm:$0xff]  }
 0x656   :  { %10225 = vtanh.f32 %v2324_v51 }
 0x65d   :  { %v10220_v1 = vpop.eup %10219 }
 0x65e   :  { %v10222_v56 = vpop.eup %10221  ;;  %v2329_v46 = vadd.f32 1.0, %v10220_v1  ;;  %v9860_v1 = vld [vmem:[#allocation4 + $0x28] ss:$16 sps:$4 sm:$0xff]  }
 0x65f   :  { %v2335_v3 = vadd.f32 1.0, %v10222_v56  ;;  %v10224_v47 = vpop.eup %10223  ;;  %v9865_v56 = vld [vmem:[#allocation4 + $0x44] ss:$16 sps:$4 sm:$0xff]  }
 0x660   :  { %10227 = vrcp.f32 %v2329_v46  ;;  %v10226_v48 = vpop.eup %10225  ;;  %v2342_v35 = vadd.f32 1.0, %v10224_v47  ;;  %v9868_v46 = vld [vmem:[#allocation4 + $0x4c] ss:$16 sps:$4 sm:$0xff]   ;;  %v9866_v47 = vld [vmem:[#allocation4 + $0x48] ss:$16 sps:$4 sm:$0xff]  }
 0x661   :  { %10229 = vrcp.f32 %v2335_v3  ;;  %v9863_v3 = vld [vmem:[#allocation4 + $0x40] ss:$16 sps:$4 sm:$0xff]  }
 0x662   :  { %10231 = vrcp.f32 %v2342_v35  ;;  %v9877_v35 = vld [vmem:[#allocation4 + $0x84] ss:$16 sps:$4 sm:$0xff]  }
 0x66a   :  { %v10228_v49 = vpop.eup %10227 }
 0x66b   :  { %v10230_v5 = vpop.eup %10229  ;;  %v2346_v61 = vmul.f32 %v10228_v49, %v10226_v48  ;;  %v9871_v48 = vld [vmem:[#allocation4 + $0x64] ss:$16 sps:$4 sm:$0xff]   ;;  %v9874_v49 = vld [vmem:[#allocation4 + $0x6c] ss:$16 sps:$4 sm:$0xff]  }
 0x66c   :  { %v2345_v53 = vmul.f32 %v10230_v5, %v11241_v4  ;;  %v10232_v6 = vpop.eup %10231  ;;  %v9869_v5 = vld [vmem:[#allocation4 + $0x60] ss:$16 sps:$4 sm:$0xff]  }
 0x66e   :  { %v11287_v50 = vadd.f32 %v2346_v61, %v2345_v53  ;;  %v9872_v61 = vld [vmem:[#allocation4 + $0x68] ss:$16 sps:$4 sm:$0xff]   ;;  %v9880_v53 = vld [vmem:[#allocation4 + $0x8c] ss:$16 sps:$4 sm:$0xff]  }
 0x670   :  { %10233 = vtanh.f32 %v11287_v50 }
 0x67a   :  { %v10234_v8 = vpop.eup %10233 }
 0x67b   :  { %v11290_v52 = vmul.f32 %v10234_v8, %v10232_v6  ;;  %v9878_v6 = vld [vmem:[#allocation4 + $0x88] ss:$16 sps:$4 sm:$0xff]   ;;  %v9883_v8 = vld [vmem:[#allocation4 + $0xa4] ss:$16 sps:$4 sm:$0xff]  }
 0x67d   :  { %v2359_v51 = vpack.c.bf16 %v11290_v52, %v11290_v52 }
 0x67f   :  { %2585 = vmatmul.mubr.bf16.vlgmr.msra.gmra.mrb[40].mxu0 %v2359_v51  ;;  %2626 = vmatmul.mubr.bf16.vlgmr.msra.gmra.mrb[40].mxu1 %v2359_v51  ;;  %v9886_v51 = vld [vmem:[#allocation4 + $0xac] ss:$16 sps:$4 sm:$0xff]  }
 0x680   :  { %2865 = vmatpush1.bf16.msra.mxu0 %v11096_v7  ;;  %2906 = vmatpush1.bf16.msra.mxu1 %v11098_v23  ;;  %v9853_v7 = vld [vmem:[#allocation4 + $0x4] ss:$16 sps:$4 sm:$0xff]   ;;  %v9856_v23 = vld [vmem:[#allocation4 + $0xc] ss:$16 sps:$4 sm:$0xff]  }
 0x681   :  { %2866 = vmatprep.subr.bf16.mxu0 %v11104_v28  ;;  %2907 = vmatprep.subr.bf16.mxu1 %v11106_v44 }
 0x682   :  { %2896 = vmatprep.mubr.bf16.mxu0 %v12616_v32  ;;  %2937 = vmatprep.mubr.bf16.mxu1 %v12616_v32 }
 0x684   :  { %2867 = vmatpush1.bf16.msra.mxu0 %v11108_v16  ;;  %2908 = vmatpush1.bf16.msra.mxu1 %v11110_v15  ;;  %v12628_v16 = vld [vmem:[#allocation25_spill] sm:$0xff] }
 0x685   :  { %2868 = vmatprep.subr.bf16.mxu0 %v11116_v19  ;;  %2909 = vmatprep.subr.bf16.mxu1 %v11118_v18  ;;  %v12629_v19 = vld [vmem:[#allocation26_spill] sm:$0xff] }
 0x688   :  { %2869 = vmatpush1.bf16.msra.mxu0 %v11120_v20  ;;  %2910 = vmatpush1.bf16.msra.mxu1 %v11122_v12 }
 0x689   :  { %2870 = vmatprep.subr.bf16.mxu0 %v11128_v14  ;;  %2911 = vmatprep.subr.bf16.mxu1 %v11130_v0  ;;  %v12630_v14 = vld [vmem:[#allocation27_spill] sm:$0xff] }
 0x68c   :  { %2871 = vmatpush1.bf16.msra.mxu0 %v11132_v21  ;;  %2912 = vmatpush1.bf16.msra.mxu1 %v11134_v22  ;;  %v12631_v21 = vld [vmem:[#allocation28_spill] sm:$0xff] }
 0x68d   :  { %2872 = vmatprep.subr.bf16.mxu0 %v11140_v13  ;;  %2913 = vmatprep.subr.bf16.mxu1 %v11142_v24 }
 0x690   :  { %2873 = vmatpush1.bf16.msra.mxu0 %v11144_v26  ;;  %2914 = vmatpush1.bf16.msra.mxu1 %v11146_v31 }
 0x691   :  { %2874 = vmatprep.subr.bf16.mxu0 %v11150_v10  ;;  %2915 = vmatprep.subr.bf16.mxu1 %v11158_v36 }
 0x694   :  { %2875 = vmatpush1.bf16.msra.mxu0 %v11154_v62  ;;  %2916 = vmatpush1.bf16.msra.mxu1 %v11156_v34 }
 0x695   :  { %2876 = vmatprep.subr.bf16.mxu0 %v11161_v37  ;;  %2917 = vmatprep.subr.bf16.mxu1 %v11163_v38 }
 0x698   :  { %2877 = vmatpush1.bf16.msra.mxu0 %v11168_v39  ;;  %2918 = vmatpush1.bf16.msra.mxu1 %v11170_v40 }
 0x699   :  { %2878 = vmatprep.subr.bf16.mxu0 %v11174_v41  ;;  %2919 = vmatprep.subr.bf16.mxu1 %v11176_v42 }
 0x69c   :  { %2879 = vmatpush1.bf16.msra.mxu0 %v11180_v58  ;;  %2920 = vmatpush1.bf16.msra.mxu1 %v11182_v59 }
 0x69d   :  { %3203 = vmatprep.subr.bf16.mxu0 %v9853_v7  ;;  %3276 = vmatprep.subr.bf16.mxu1 %v9856_v23  ;;  %v9881_v7 = vld [vmem:[#allocation4 + $0xa0] ss:$16 sps:$4 sm:$0xff]   ;;  %v9884_v23 = vld [vmem:[#allocation4 + $0xa8] ss:$16 sps:$4 sm:$0xff]  }
 0x752   :  { %v2586_v28 = vpop.f32.mrb[40].mxu0  ;;  %v2627_v44 = vpop.f32.mrb[40].mxu1 }
 0x753   :  { %v2634_v15 = vadd.f32 %v2586_v28, %v12628_v16  ;;  %v2636_v18 = vadd.f32 %v2627_v44, %v12629_v19  ;;  %v2588_v20 = vpop.f32.mrb[41].mxu0  ;;  %v2629_v12 = vpop.f32.mrb[41].mxu1  ;;  %v9889_v28 = vld [vmem:[#allocation4 + $0xc4] ss:$16 sps:$4 sm:$0xff]   ;;  %v9892_v44 = vld [vmem:[#allocation4 + $0xcc] ss:$16 sps:$4 sm:$0xff]  }
 0x754   :  { %v2635_v0 = vadd.f32 %v2588_v20, %v12630_v14  ;;  %v2637_v22 = vadd.f32 %v2629_v12, %v12631_v21  ;;  %v2590_v13 = vpop.f32.mrb[42].mxu0  ;;  %v2631_v24 = vpop.f32.mrb[42].mxu1  ;;  %v9887_v16 = vld [vmem:[#allocation4 + $0xc0] ss:$16 sps:$4 sm:$0xff]   ;;  %v9895_v19 = vld [vmem:[#allocation4 + $0xe4] ss:$16 sps:$4 sm:$0xff]   ;;  %v2984_v14 = vpack.c.bf16 %v11062_v17, %v11018_v9  ;;  %v2986_v21 = vpack.c.bf16 %v11290_v52, %v11244_v33 }
 0x755   :  { %v9023_v26 = vmul.f32 -1.442695, %v2634_v15  ;;  %v2591_v31 = vpop.f32.mrb[43].mxu0  ;;  %v2632_v10 = vpop.f32.mrb[43].mxu1  ;;  %v9890_v15 = vld [vmem:[#allocation4 + $0xc8] ss:$16 sps:$4 sm:$0xff]  }
 0x756   :  { %v9024_v62 = vmul.f32 -1.442695, %v2635_v0  ;;  %v9025_v34 = vmul.f32 -1.442695, %v2637_v22  ;;  %v9893_v20 = vld [vmem:[#allocation4 + $0xe0] ss:$16 sps:$4 sm:$0xff]   ;;  %v2985_v0 = vpack.c.bf16 %v11198_v2, %v11086_v27 }
 0x757   :  { %10235 = vpow2.f32 %v9023_v26  ;;  %v9896_v12 = vld [vmem:[#allocation4 + $0xe8] ss:$16 sps:$4 sm:$0xff]   ;;  %v11352_v9 = vld [vmem:[#allocation6 + $0x104] ss:$16 sps:$4 sm:$0xff]   ;;  %v11354_v17 = vld [vmem:[#allocation6 + $0x10c] ss:$16 sps:$4 sm:$0xff]  }
 0x758   :  { %10237 = vpow2.f32 %v9024_v62  ;;  %v11356_v27 = vld [vmem:[#allocation6 + $0x100] ss:$16 sps:$4 sm:$0xff]   ;;  %v11358_v2 = vld [vmem:[#allocation6 + $0x108] ss:$16 sps:$4 sm:$0xff]   ;;  %v11364_v33 = vld [vmem:[#allocation6 + $0x124] ss:$16 sps:$4 sm:$0xff]  }
 0x759   :  { %10239 = vpow2.f32 %v9025_v34  ;;  %v11366_v52 = vld [vmem:[#allocation6 + $0x12c] ss:$16 sps:$4 sm:$0xff]   ;;  %v11368_v22 = vld [vmem:[#allocation6 + $0x120] ss:$16 sps:$4 sm:$0xff]   ;;  %v11370_v13 = vld [vmem:[#allocation6 + $0x128] ss:$16 sps:$4 sm:$0xff]  }
 0x75a   :  { %10241 = vtanh.f32 %v2636_v18  ;;  %v9898_v18 = vld [vmem:[#allocation4 + $0xec] ss:$16 sps:$4 sm:$0xff]   ;;  %v11376_v24 = vld [vmem:[#allocation6 + $0x144] ss:$16 sps:$4 sm:$0xff]   ;;  %v11380_v31 = vld [vmem:[#allocation6 + $0x140] ss:$16 sps:$4 sm:$0xff]  }
 0x75b   :  { %v11378_v26 = vld [vmem:[#allocation6 + $0x14c] ss:$16 sps:$4 sm:$0xff]   ;;  %v11382_v10 = vld [vmem:[#allocation6 + $0x148] ss:$16 sps:$4 sm:$0xff]   ;;  %v11388_v62 = vld [vmem:[#allocation6 + $0x160] ss:$16 sps:$4 sm:$0xff]  }
 0x75c   :  { %v11390_v34 = vld [vmem:[#allocation6 + $0x164] ss:$16 sps:$4 sm:$0xff]  }
 0x761   :  { %v10236_v36 = vpop.eup %10235 }
 0x762   :  { %v10238_v37 = vpop.eup %10237  ;;  %v2641_v38 = vadd.f32 1.0, %v10236_v36  ;;  %v11392_v36 = vld [vmem:[#allocation6 + $0x168] ss:$16 sps:$4 sm:$0xff]  }
 0x763   :  { %v2647_v39 = vadd.f32 1.0, %v10238_v37  ;;  %v10240_v40 = vpop.eup %10239  ;;  %v11394_v37 = vld [vmem:[#allocation6 + $0x16c] ss:$16 sps:$4 sm:$0xff]  }
 0x764   :  { %10243 = vrcp.f32 %v2641_v38  ;;  %v10242_v41 = vpop.eup %10241  ;;  %v2654_v4 = vadd.f32 1.0, %v10240_v40  ;;  %v11400_v38 = vld [vmem:[#allocation6 + $0x184] ss:$16 sps:$4 sm:$0xff]   ;;  %v11404_v40 = vld [vmem:[#allocation6 + $0x180] ss:$16 sps:$4 sm:$0xff]  }
 0x765   :  { %10245 = vrcp.f32 %v2647_v39  ;;  %v11402_v39 = vld [vmem:[#allocation6 + $0x18c] ss:$16 sps:$4 sm:$0xff]  }
 0x766   :  { %10247 = vrcp.f32 %v2654_v4  ;;  %v11418_v4 = vld [vmem:[#allocation6 + $0x1ac] ss:$16 sps:$4 sm:$0xff]  }
 0x76e   :  { %v10244_v42 = vpop.eup %10243 }
 0x76f   :  { %v10246_v58 = vpop.eup %10245  ;;  %v2658_v59 = vmul.f32 %v10244_v42, %v10242_v41  ;;  %v11406_v41 = vld [vmem:[#allocation6 + $0x188] ss:$16 sps:$4 sm:$0xff]   ;;  %v11412_v42 = vld [vmem:[#allocation6 + $0x1a0] ss:$16 sps:$4 sm:$0xff]  }
 0x770   :  { %v2657_v54 = vmul.f32 %v10246_v58, %v11287_v50  ;;  %v10248_v57 = vpop.eup %10247  ;;  %v9875_v50 = vld [vmem:[#allocation4 + $0x80] ss:$16 sps:$4 sm:$0xff]   ;;  %v11414_v58 = vld [vmem:[#allocation6 + $0x1a4] ss:$16 sps:$4 sm:$0xff]  }
 0x772   :  { %v11331_v55 = vadd.f32 %v2658_v59, %v2657_v54  ;;  %v11416_v59 = vld [vmem:[#allocation6 + $0x1a8] ss:$16 sps:$4 sm:$0xff]   ;;  %v11424_v54 = vld [vmem:[#allocation6 + $0x1c4] ss:$16 sps:$4 sm:$0xff]  }
 0x774   :  { %10249 = vtanh.f32 %v11331_v55 }
 0x77e   :  { %v10250_v25 = vpop.eup %10249 }
 0x77f   :  { %v11334_v29 = vmul.f32 %v10250_v25, %v10248_v57  ;;  %v11426_v57 = vld [vmem:[#allocation6 + $0x1cc] ss:$16 sps:$4 sm:$0xff]   ;;  %v11428_v25 = vld [vmem:[#allocation6 + $0x1c0] ss:$16 sps:$4 sm:$0xff]  }
 0x781   :  { %v2671_v63 = vpack.c.bf16 %v11334_v29, %v11334_v29 }
 0x783   :  { %2897 = vmatmul.mubr.bf16.vlgmr.msra.gmra.mrb[44].mxu0 %v2671_v63  ;;  %2938 = vmatmul.mubr.bf16.vlgmr.msra.gmra.mrb[44].mxu1 %v2671_v63  ;;  %v11438_v63 = vld [vmem:[#allocation6 + $0x1e4] ss:$16 sps:$4 sm:$0xff]  }
 0x784   :  { %3204 = vmatpush1.bf16.msra.mxu0 %v9851_v60  ;;  %3277 = vmatpush1.bf16.msra.mxu1 %v9854_v43  ;;  %v11430_v60 = vld [vmem:[#allocation6 + $0x1c8] ss:$16 sps:$4 sm:$0xff]   ;;  %v11436_v43 = vld [vmem:[#allocation6 + $0x1e0] ss:$16 sps:$4 sm:$0xff]  }
 0x785   :  { %3205 = vmatprep.subr.bf16.mxu0 %v9859_v45  ;;  %3278 = vmatprep.subr.bf16.mxu1 %v9862_v30  ;;  %v11440_v45 = vld [vmem:[#allocation6 + $0x1e8] ss:$16 sps:$4 sm:$0xff]   ;;  %v11442_v30 = vld [vmem:[#allocation6 + $0x1ec] ss:$16 sps:$4 sm:$0xff]  }
 0x786   :  { %3235 = vmatprep.mubr.bf16.mxu0 %v12616_v32  ;;  %3308 = vmatprep.mubr.bf16.mxu1 %v12616_v32 }
 0x788   :  { %3206 = vmatpush1.bf16.msra.mxu0 %v9857_v11  ;;  %3279 = vmatpush1.bf16.msra.mxu1 %v9860_v1 }
 0x789   :  { %3207 = vmatprep.subr.bf16.mxu0 %v9865_v56  ;;  %3280 = vmatprep.subr.bf16.mxu1 %v9868_v46  ;;  %v12632_v56 = vld [vmem:[#allocation29_spill] sm:$0xff] }
 0x78c   :  { %3208 = vmatpush1.bf16.msra.mxu0 %v9863_v3  ;;  %3281 = vmatpush1.bf16.msra.mxu1 %v9866_v47  ;;  %v12633_v3 = vld [vmem:[#allocation30_spill] sm:$0xff] }
 0x78d   :  { %3209 = vmatprep.subr.bf16.mxu0 %v9871_v48  ;;  %3282 = vmatprep.subr.bf16.mxu1 %v9874_v49 }
 0x790   :  { %3210 = vmatpush1.bf16.msra.mxu0 %v9869_v5  ;;  %3283 = vmatpush1.bf16.msra.mxu1 %v9872_v61  ;;  %v12634_v5 = vld [vmem:[#allocation31_spill] sm:$0xff] }
 0x791   :  { %3211 = vmatprep.subr.bf16.mxu0 %v9877_v35  ;;  %3284 = vmatprep.subr.bf16.mxu1 %v9880_v53  ;;  %v12635_v35 = vld [vmem:[#allocation32_spill] sm:$0xff] }
 0x794   :  { %3212 = vmatpush1.bf16.msra.mxu0 %v9875_v50  ;;  %3285 = vmatpush1.bf16.msra.mxu1 %v9878_v6 }
 0x795   :  { %3213 = vmatprep.subr.bf16.mxu0 %v9883_v8  ;;  %3286 = vmatprep.subr.bf16.mxu1 %v9886_v51 }
 0x798   :  { %3214 = vmatpush1.bf16.msra.mxu0 %v9881_v7  ;;  %3287 = vmatpush1.bf16.msra.mxu1 %v9884_v23 }
 0x799   :  { %3215 = vmatprep.subr.bf16.mxu0 %v9889_v28  ;;  %3288 = vmatprep.subr.bf16.mxu1 %v9892_v44 }
 0x79c   :  { %3216 = vmatpush1.bf16.msra.mxu0 %v9887_v16  ;;  %3289 = vmatpush1.bf16.msra.mxu1 %v9890_v15 }
 0x79d   :  { %3217 = vmatprep.subr.bf16.mxu0 %v9895_v19  ;;  %3290 = vmatprep.subr.bf16.mxu1 %v9898_v18 }
 0x7a0   :  { %3218 = vmatpush1.bf16.msra.mxu0 %v9893_v20  ;;  %3291 = vmatpush1.bf16.msra.mxu1 %v9896_v12 }
 0x7a1   :  { %3583 = vmatprep.subr.bf16.mxu0 %v11352_v9  ;;  %3624 = vmatprep.subr.bf16.mxu1 %v11354_v17 }
 0x7a3   :  { %3236 = vmatmul.mubr.bf16.vlgmr.msra.gmra.mrb[48].mxu0 %v2984_v14  ;;  %3309 = vmatmul.mubr.bf16.vlgmr.msra.gmra.mrb[48].mxu1 %v2984_v14 }
 0x7a4   :  { %3245 = vmatprep.mubr.bf16.mxu0 %v12616_v32  ;;  %3318 = vmatprep.mubr.bf16.mxu1 %v12616_v32 }
 0x7a5   :  { %3584 = vmatpush1.bf16.msra.mxu0 %v11356_v27  ;;  %3625 = vmatpush1.bf16.msra.mxu1 %v11358_v2 }
 0x7a6   :  { %3585 = vmatprep.subr.bf16.mxu0 %v11364_v33  ;;  %3626 = vmatprep.subr.bf16.mxu1 %v11366_v52 }
 0x7a9   :  { %3586 = vmatpush1.bf16.msra.mxu0 %v11368_v22  ;;  %3627 = vmatpush1.bf16.msra.mxu1 %v11370_v13 }
 0x7aa   :  { %3587 = vmatprep.subr.bf16.mxu0 %v11376_v24  ;;  %3628 = vmatprep.subr.bf16.mxu1 %v11378_v26 }
 0x7ab   :  { %3246 = vmatmul.mubr.bf16.gmra.mrb[52].mxu0 %v2985_v0  ;;  %3319 = vmatmul.mubr.bf16.gmra.mrb[52].mxu1 %v2985_v0 }
 0x7ac   :  { %3255 = vmatprep.mubr.bf16.mxu0 %v12616_v32  ;;  %3328 = vmatprep.mubr.bf16.mxu1 %v12616_v32 }
 0x7ad   :  { %3588 = vmatpush1.bf16.msra.mxu0 %v11380_v31  ;;  %3629 = vmatpush1.bf16.msra.mxu1 %v11382_v10 }
 0x7ae   :  { %3589 = vmatprep.subr.bf16.mxu0 %v11390_v34  ;;  %3630 = vmatprep.subr.bf16.mxu1 %v11394_v37 }
 0x7b1   :  { %3590 = vmatpush1.bf16.msra.mxu0 %v11388_v62  ;;  %3631 = vmatpush1.bf16.msra.mxu1 %v11392_v36 }
 0x7b2   :  { %3591 = vmatprep.subr.bf16.mxu0 %v11400_v38  ;;  %3632 = vmatprep.subr.bf16.mxu1 %v11402_v39 }
 0x7b3   :  { %3256 = vmatmul.mubr.bf16.gmra.mrb[56].mxu0 %v2986_v21  ;;  %3329 = vmatmul.mubr.bf16.gmra.mrb[56].mxu1 %v2986_v21 }
 0x7b4   :  { %3265 = vmatprep.mubr.bf16.mxu0 %v12616_v32  ;;  %3338 = vmatprep.mubr.bf16.mxu1 %v12616_v32 }
 0x7b5   :  { %3592 = vmatpush1.bf16.msra.mxu0 %v11404_v40  ;;  %3633 = vmatpush1.bf16.msra.mxu1 %v11406_v41 }
 0x7b6   :  { %3593 = vmatprep.subr.bf16.mxu0 %v11414_v58  ;;  %3634 = vmatprep.subr.bf16.mxu1 %v11418_v4 }
 0x7b9   :  { %3594 = vmatpush1.bf16.msra.mxu0 %v11412_v42  ;;  %3635 = vmatpush1.bf16.msra.mxu1 %v11416_v59 }
 0x7ba   :  { %3595 = vmatprep.subr.bf16.mxu0 %v11424_v54  ;;  %3636 = vmatprep.subr.bf16.mxu1 %v11426_v57 }
 0x7bd   :  { %3596 = vmatpush1.bf16.msra.mxu0 %v11428_v25  ;;  %3637 = vmatpush1.bf16.msra.mxu1 %v11430_v60 }
 0x7be   :  { %3597 = vmatprep.subr.bf16.mxu0 %v11438_v63  ;;  %3638 = vmatprep.subr.bf16.mxu1 %v11442_v30 }
 0x7c1   :  { %3598 = vmatpush1.bf16.msra.mxu0 %v11436_v43  ;;  %3639 = vmatpush1.bf16.msra.mxu1 %v11440_v45 }
 0x7c2   :  { %3891 = vmatprep.subr.bf16.mxu0 %v11352_v9  ;;  %3932 = vmatprep.subr.bf16.mxu1 %v11354_v17 }
 0x856   :  { %v2898_v11 = vpop.f32.mrb[44].mxu0  ;;  %v2939_v1 = vpop.f32.mrb[44].mxu1 }
 0x857   :  { %v2946_v46 = vadd.f32 %v2898_v11, %v12632_v56  ;;  %v2948_v47 = vadd.f32 %v2939_v1, %v12633_v3  ;;  %v2900_v48 = vpop.f32.mrb[45].mxu0  ;;  %v2941_v49 = vpop.f32.mrb[45].mxu1 }
 0x858   :  { %v2947_v61 = vadd.f32 %v2900_v48, %v12634_v5  ;;  %v2949_v53 = vadd.f32 %v2941_v49, %v12635_v35  ;;  %v2902_v50 = vpop.f32.mrb[46].mxu0  ;;  %v2943_v6 = vpop.f32.mrb[46].mxu1 }
 0x859   :  { %v9058_v8 = vmul.f32 -1.442695, %v2946_v46  ;;  %v2903_v51 = vpop.f32.mrb[47].mxu0  ;;  %v2944_v7 = vpop.f32.mrb[47].mxu1 }
 0x85a   :  { %v9059_v23 = vmul.f32 -1.442695, %v2947_v61  ;;  %v9060_v28 = vmul.f32 -1.442695, %v2949_v53 }
 0x85b   :  { %10251 = vpow2.f32 %v9058_v8 }
 0x85c   :  { %10253 = vpow2.f32 %v9059_v23 }
 0x85d   :  { %10255 = vpow2.f32 %v9060_v28 }
 0x85e   :  { %10257 = vtanh.f32 %v2948_v47 }
 0x865   :  { %v10252_v44 = vpop.eup %10251 }
 0x866   :  { %v10254_v16 = vpop.eup %10253  ;;  %v2953_v15 = vadd.f32 1.0, %v10252_v44 }
 0x867   :  { %v2959_v19 = vadd.f32 1.0, %v10254_v16  ;;  %v10256_v18 = vpop.eup %10255 }
 0x868   :  { %10259 = vrcp.f32 %v2953_v15  ;;  %v10258_v20 = vpop.eup %10257  ;;  %v2966_v21 = vadd.f32 1.0, %v10256_v18 }
 0x869   :  { %10261 = vrcp.f32 %v2959_v19 }
 0x86a   :  { %10263 = vrcp.f32 %v2966_v21 }
 0x872   :  { %v10260_v12 = vpop.eup %10259 }
 0x873   :  { %v10262_v14 = vpop.eup %10261  ;;  %v2970_v0 = vmul.f32 %v10260_v12, %v10258_v20 }
 0x874   :  { %v2969_v11 = vmul.f32 %v10262_v14, %v11331_v55  ;;  %v10264_v51 = vpop.eup %10263 }
 0x876   :  { %v11455_v1 = vpop.f32.mrb[48].mxu0  ;;  %v11457_v56 = vpop.f32.mrb[48].mxu1  ;;  %v2971_v46 = vadd.f32 %v2970_v0, %v2969_v11 }
 0x877   :  { %v11459_v3 = vpop.f32.mrb[49].mxu0  ;;  %v11461_v47 = vpop.f32.mrb[49].mxu1 }
 0x878   :  { %v11463_v48 = vpop.f32.mrb[50].mxu0  ;;  %v11465_v49 = vpop.f32.mrb[50].mxu1  ;;  %10265 = vtanh.f32 %v2971_v46  ;;  %v9061_v46 = vld [vmem:[%s12579_s4 + $0x4] sm:$0xf] }
 0x879   :  { %v11467_v5 = vpop.f32.mrb[51].mxu0  ;;  %v11469_v61 = vpop.f32.mrb[51].mxu1 }
 0x87e   :  { %v11471_v55 = vpop.f32.mrb[52].mxu0  ;;  %v11473_v35 = vpop.f32.mrb[52].mxu1 }
 0x87f   :  { %12636 = vst [vmem:[#allocation14_spill] sm:$0xff] %v11473_v35  ;;  %v11475_v53 = vpop.f32.mrb[53].mxu0  ;;  %v11477_v50 = vpop.f32.mrb[53].mxu1 }
 0x880   :  { %12637 = vst [vmem:[#allocation15_spill] sm:$0xff] %v11475_v53  ;;  %12638 = vst [vmem:[#allocation16_spill] sm:$0xff] %v11477_v50  ;;  %v11479_v6 = vpop.f32.mrb[54].mxu0  ;;  %v11481_v8 = vpop.f32.mrb[54].mxu1 }
 0x881   :  { %12639 = vst [vmem:[#allocation17_spill] sm:$0xff] %v11479_v6  ;;  %12640 = vst [vmem:[#allocation18_spill] sm:$0xff] %v11481_v8  ;;  %v11483_v7 = vpop.f32.mrb[55].mxu0  ;;  %v11485_v23 = vpop.f32.mrb[55].mxu1 }
 0x882   :  { %12641 = vst [vmem:[#allocation19_spill] sm:$0xff] %v11483_v7  ;;  %12642 = vst [vmem:[#allocation20_spill] sm:$0xff] %v11485_v23  ;;  %v10266_v28 = vpop.eup %10265 }
 0x883   :  { %v2973_v44 = vmul.f32 %v10266_v28, %v10264_v51 }
 0x885   :  { %v2987_v16 = vpack.c.bf16 %v2973_v44, %v11334_v29  ;;  %v9094_v29 = vld [vmem:[%s12580_s5 + $0x8] sm:$0xff] }
 0x886   :  { %v11488_v15 = vpop.f32.mrb[56].mxu0  ;;  %v11490_v19 = vpop.f32.mrb[56].mxu1  ;;  %v3389_v11 = vpack.c.bf16 %v9094_v29, %v9094_v29 }
 0x887   :  { %12643 = vst [vmem:[#allocation21_spill] sm:$0xff] %v11488_v15  ;;  %12644 = vst [vmem:[#allocation22_spill] sm:$0xff] %v11490_v19  ;;  %v11492_v18 = vpop.f32.mrb[57].mxu0  ;;  %v11494_v20 = vpop.f32.mrb[57].mxu1  ;;  %3266 = vmatmul.mubr.bf16.gmra.mrb[60].mxu0 %v2987_v16  ;;  %3339 = vmatmul.mubr.bf16.gmra.mrb[60].mxu1 %v2987_v16 }
 0x888   :  { %12645 = vst [vmem:[#allocation23_spill] sm:$0xff] %v11492_v18  ;;  %12646 = vst [vmem:[#allocation24_spill] sm:$0xff] %v11494_v20  ;;  %v11496_v12 = vpop.f32.mrb[58].mxu0  ;;  %v11498_v14 = vpop.f32.mrb[58].mxu1  ;;  %3615 = vmatprep.mubr.bf16.mxu0 %v12616_v32  ;;  %3656 = vmatprep.mubr.bf16.mxu1 %v12616_v32 }
 0x889   :  { %12647 = vst [vmem:[#allocation25_spill] sm:$0xff] %v11496_v12  ;;  %12648 = vst [vmem:[#allocation26_spill] sm:$0xff] %v11498_v14  ;;  %v11505_v0 = vpop.f32.mrb[59].mxu0  ;;  %v11507_v21 = vpop.f32.mrb[59].mxu1  ;;  %v12658_v14 = vld [vmem:[#allocation10_spill] sm:$0xff] }
 0x88a   :  { %12649 = vst [vmem:[#allocation27_spill] sm:$0xff] %v11505_v0  ;;  %12650 = vst [vmem:[#allocation28_spill] sm:$0xff] %v11507_v21  ;;  %v12657_v21 = vld [vmem:[#allocation12_spill] sm:$0xff]  ;;  %v11562_v12 = vrot.slane %v9061_v46, %v12658_v14 }
 0x88b   :  { %v11559_v0 = vrot.slane %v9061_v46, %v12657_v21 }
 0x88c   :  { %v3311_v21 = vadd.f32 %v11457_v56, %v11562_v12 }
 0x88f   :  { %3616 = vmatmul.mubr.bf16.vlgmr.msra.gmra.mrb[64].mxu0 %v3389_v11  ;;  %3657 = vmatmul.mubr.bf16.vlgmr.msra.gmra.mrb[64].mxu1 %v3389_v11 }
 0x890   :  { %3892 = vmatpush1.bf16.msra.mxu0 %v11356_v27  ;;  %3933 = vmatpush1.bf16.msra.mxu1 %v11358_v2 }
 0x891   :  { %3893 = vmatprep.subr.bf16.mxu0 %v11364_v33  ;;  %3934 = vmatprep.subr.bf16.mxu1 %v11366_v52 }
 0x892   :  { %3923 = vmatprep.mubr.bf16.mxu0 %v12616_v32  ;;  %3964 = vmatprep.mubr.bf16.mxu1 %v12616_v32 }
 0x894   :  { %3894 = vmatpush1.bf16.msra.mxu0 %v11368_v22  ;;  %3935 = vmatpush1.bf16.msra.mxu1 %v11370_v13 }
 0x895   :  { %3895 = vmatprep.subr.bf16.mxu0 %v11376_v24  ;;  %3936 = vmatprep.subr.bf16.mxu1 %v11378_v26 }
 0x898   :  { %3896 = vmatpush1.bf16.msra.mxu0 %v11380_v31  ;;  %3937 = vmatpush1.bf16.msra.mxu1 %v11382_v10 }
 0x899   :  { %3897 = vmatprep.subr.bf16.mxu0 %v11390_v34  ;;  %3938 = vmatprep.subr.bf16.mxu1 %v11394_v37 }
 0x89c   :  { %3898 = vmatpush1.bf16.msra.mxu0 %v11388_v62  ;;  %3939 = vmatpush1.bf16.msra.mxu1 %v11392_v36 }
 0x89d   :  { %3899 = vmatprep.subr.bf16.mxu0 %v11400_v38  ;;  %3940 = vmatprep.subr.bf16.mxu1 %v11402_v39 }
 0x8a0   :  { %3900 = vmatpush1.bf16.msra.mxu0 %v11404_v40  ;;  %3941 = vmatpush1.bf16.msra.mxu1 %v11406_v41 }
 0x8a1   :  { %3901 = vmatprep.subr.bf16.mxu0 %v11414_v58  ;;  %3942 = vmatprep.subr.bf16.mxu1 %v11418_v4 }
 0x8a4   :  { %3902 = vmatpush1.bf16.msra.mxu0 %v11412_v42  ;;  %3943 = vmatpush1.bf16.msra.mxu1 %v11416_v59 }
 0x8a5   :  { %3903 = vmatprep.subr.bf16.mxu0 %v11424_v54  ;;  %3944 = vmatprep.subr.bf16.mxu1 %v11426_v57 }
 0x8a8   :  { %3904 = vmatpush1.bf16.msra.mxu0 %v11428_v25  ;;  %3945 = vmatpush1.bf16.msra.mxu1 %v11430_v60 }
 0x8a9   :  { %3905 = vmatprep.subr.bf16.mxu0 %v11438_v63  ;;  %3946 = vmatprep.subr.bf16.mxu1 %v11442_v30 }
 0x8ac   :  { %3906 = vmatpush1.bf16.msra.mxu0 %v11436_v43  ;;  %3947 = vmatpush1.bf16.msra.mxu1 %v11440_v45 }
 0x8ad   :  { %4199 = vmatprep.subr.bf16.mxu0 %v11352_v9  ;;  %4240 = vmatprep.subr.bf16.mxu1 %v11354_v17 }
 0x95a   :  { %v11546_v51 = vpop.f32.mrb[60].mxu0  ;;  %v11548_v28 = vpop.f32.mrb[60].mxu1 }
 0x95b   :  { %12651 = vst [vmem:[#allocation29_spill] sm:$0xff] %v11546_v51  ;;  %12652 = vst [vmem:[#allocation30_spill] sm:$0xff] %v11548_v28  ;;  %v11550_v44 = vpop.f32.mrb[61].mxu0  ;;  %v11552_v16 = vpop.f32.mrb[61].mxu1  ;;  %v12661_v51 = vld [vmem:[#allocation13_spill] sm:$0xff] }
 0x95c   :  { %12653 = vst [vmem:[#allocation31_spill] sm:$0xff] %v11550_v44  ;;  %12654 = vst [vmem:[#allocation32_spill] sm:$0xff] %v11552_v16  ;;  %v11554_v29 = vpop.f32.mrb[62].mxu0  ;;  %v11556_v11 = vpop.f32.mrb[62].mxu1  ;;  %v11569_v28 = vrot.slane %v9061_v46, %v12661_v51  ;;  %v12662_v44 = vld [vmem:[#allocation11_spill] sm:$0xff] }
 0x95d   :  { %12655 = vst [vmem:[#allocation33_spill] sm:$0xff] %v11554_v29  ;;  %12656 = vst [vmem:[#allocation34_spill] sm:$0xff] %v11556_v11  ;;  %v11564_v20 = vpop.f32.mrb[63].mxu0  ;;  %v11566_v18 = vpop.f32.mrb[63].mxu1  ;;  %v11572_v19 = vrot.slane %v9061_v46, %v12662_v44  ;;  %v3238_v29 = vadd.f32 %v11455_v1, %v11559_v0 }
 0x95e   :  { %12659 = vst [vmem:[#allocation35_spill] sm:$0xff] %v11564_v20  ;;  %12660 = vst [vmem:[#allocation36_spill] sm:$0xff] %v11566_v18  ;;  %v3240_v14 = vadd.f32 %v11459_v3, %v11569_v28 }
 0x95f   :  { %v3313_v20 = vadd.f32 %v11461_v47, %v11572_v19 }
 0x962   :  { %v3617_v11 = vpop.f32.mrb[64].mxu0  ;;  %v3658_v18 = vpop.f32.mrb[64].mxu1 }
 0x963   :  { %v3665_v16 = vadd.f32 %v3617_v11, %v3238_v29  ;;  %v3667_v51 = vadd.f32 %v3658_v18, %v3311_v21  ;;  %v3619_v15 = vpop.f32.mrb[65].mxu0  ;;  %v3660_v23 = vpop.f32.mrb[65].mxu1  ;;  %v3244_v11 = vadd.f32 %v11467_v5, %v11569_v28 }
 0x964   :  { %v3666_v46 = vadd.f32 %v3619_v15, %v3240_v14  ;;  %v3668_v44 = vadd.f32 %v3660_v23, %v3313_v20  ;;  %v3621_v7 = vpop.f32.mrb[66].mxu0  ;;  %v3662_v8 = vpop.f32.mrb[66].mxu1 }
 0x965   :  { %v9128_v1 = vmul.f32 -1.442695, %v3665_v16  ;;  %v3622_v6 = vpop.f32.mrb[67].mxu0  ;;  %v3663_v50 = vpop.f32.mrb[67].mxu1  ;;  %v9095_v8 = vld [vmem:[%s12581_s6 + $0x8] sm:$0xff]  ;;  %v3315_v16 = vadd.f32 %v11465_v49, %v11562_v12 }
 0x966   :  { %v9129_v56 = vmul.f32 -1.442695, %v3666_v46  ;;  %v9130_v3 = vmul.f32 -1.442695, %v3668_v44  ;;  %v3242_v44 = vadd.f32 %v11463_v48, %v11559_v0  ;;  %v3317_v46 = vadd.f32 %v11469_v61, %v11572_v19 }
 0x967   :  { %10267 = vpow2.f32 %v9128_v1 }
 0x968   :  { %10269 = vpow2.f32 %v9129_v56 }
 0x969   :  { %10271 = vpow2.f32 %v9130_v3 }
 0x96a   :  { %10273 = vtanh.f32 %v3667_v51 }
 0x971   :  { %v10268_v53 = vpop.eup %10267 }
 0x972   :  { %v10270_v35 = vpop.eup %10269  ;;  %v3672_v47 = vadd.f32 1.0, %v10268_v53 }
 0x973   :  { %v3678_v29 = vadd.f32 1.0, %v10270_v35  ;;  %v10272_v18 = vpop.eup %10271 }
 0x974   :  { %10275 = vrcp.f32 %v3672_v47  ;;  %v10274_v15 = vpop.eup %10273  ;;  %v3685_v23 = vadd.f32 1.0, %v10272_v18 }
 0x975   :  { %10277 = vrcp.f32 %v3678_v29 }
 0x976   :  { %10279 = vrcp.f32 %v3685_v23 }
 0x97e   :  { %v10276_v6 = vpop.eup %10275 }
 0x97f   :  { %v10278_v50 = vpop.eup %10277  ;;  %v3689_v7 = vmul.f32 %v10276_v6, %v10274_v15 }
 0x980   :  { %v3688_v20 = vmul.f32 %v10278_v50, %v9095_v8  ;;  %v10280_v53 = vpop.eup %10279 }
 0x982   :  { %v11585_v14 = vadd.f32 %v3689_v7, %v3688_v20 }
 0x984   :  { %10281 = vtanh.f32 %v11585_v14 }
 0x98e   :  { %v10282_v35 = vpop.eup %10281 }
 0x98f   :  { %v11588_v21 = vmul.f32 %v10282_v35, %v10280_v53 }
 0x991   :  { %v3698_v51 = vpack.c.bf16 %v11588_v21, %v11588_v21 }
 0x993   :  { %3924 = vmatmul.mubr.bf16.vlgmr.msra.gmra.mrb[68].mxu0 %v3698_v51  ;;  %3965 = vmatmul.mubr.bf16.vlgmr.msra.gmra.mrb[68].mxu1 %v3698_v51 }
 0x994   :  { %4200 = vmatpush1.bf16.msra.mxu0 %v11356_v27  ;;  %4241 = vmatpush1.bf16.msra.mxu1 %v11358_v2 }
 0x995   :  { %4201 = vmatprep.subr.bf16.mxu0 %v11364_v33  ;;  %4242 = vmatprep.subr.bf16.mxu1 %v11366_v52 }
 0x996   :  { %4231 = vmatprep.mubr.bf16.mxu0 %v12616_v32  ;;  %4272 = vmatprep.mubr.bf16.mxu1 %v12616_v32 }
 0x998   :  { %4202 = vmatpush1.bf16.msra.mxu0 %v11368_v22  ;;  %4243 = vmatpush1.bf16.msra.mxu1 %v11370_v13 }
 0x999   :  { %4203 = vmatprep.subr.bf16.mxu0 %v11376_v24  ;;  %4244 = vmatprep.subr.bf16.mxu1 %v11378_v26 }
 0x99c   :  { %4204 = vmatpush1.bf16.msra.mxu0 %v11380_v31  ;;  %4245 = vmatpush1.bf16.msra.mxu1 %v11382_v10 }
 0x99d   :  { %4205 = vmatprep.subr.bf16.mxu0 %v11390_v34  ;;  %4246 = vmatprep.subr.bf16.mxu1 %v11394_v37 }
 0x9a0   :  { %4206 = vmatpush1.bf16.msra.mxu0 %v11388_v62  ;;  %4247 = vmatpush1.bf16.msra.mxu1 %v11392_v36 }
 0x9a1   :  { %4207 = vmatprep.subr.bf16.mxu0 %v11400_v38  ;;  %4248 = vmatprep.subr.bf16.mxu1 %v11402_v39 }
 0x9a4   :  { %4208 = vmatpush1.bf16.msra.mxu0 %v11404_v40  ;;  %4249 = vmatpush1.bf16.msra.mxu1 %v11406_v41 }
 0x9a5   :  { %4209 = vmatprep.subr.bf16.mxu0 %v11414_v58  ;;  %4250 = vmatprep.subr.bf16.mxu1 %v11418_v4 }
 0x9a8   :  { %4210 = vmatpush1.bf16.msra.mxu0 %v11412_v42  ;;  %4251 = vmatpush1.bf16.msra.mxu1 %v11416_v59 }
 0x9a9   :  { %4211 = vmatprep.subr.bf16.mxu0 %v11424_v54  ;;  %4252 = vmatprep.subr.bf16.mxu1 %v11426_v57 }
 0x9ac   :  { %4212 = vmatpush1.bf16.msra.mxu0 %v11428_v25  ;;  %4253 = vmatpush1.bf16.msra.mxu1 %v11430_v60 }
 0x9ad   :  { %4213 = vmatprep.subr.bf16.mxu0 %v11438_v63  ;;  %4254 = vmatprep.subr.bf16.mxu1 %v11442_v30 }
 0x9b0   :  { %4214 = vmatpush1.bf16.msra.mxu0 %v11436_v43  ;;  %4255 = vmatpush1.bf16.msra.mxu1 %v11440_v45 }
 0x9b1   :  { %4507 = vmatprep.subr.bf16.mxu0 %v11352_v9  ;;  %4548 = vmatprep.subr.bf16.mxu1 %v11354_v17 }
 0xa66   :  { %v3925_v1 = vpop.f32.mrb[68].mxu0  ;;  %v3966_v56 = vpop.f32.mrb[68].mxu1 }
 0xa67   :  { %v3973_v3 = vadd.f32 %v3925_v1, %v3242_v44  ;;  %v3975_v47 = vadd.f32 %v3966_v56, %v3315_v16  ;;  %v3927_v29 = vpop.f32.mrb[69].mxu0  ;;  %v3968_v9 = vpop.f32.mrb[69].mxu1 }
 0xa68   :  { %v3974_v18 = vadd.f32 %v3927_v29, %v3244_v11  ;;  %v3976_v17 = vadd.f32 %v3968_v9, %v3317_v46  ;;  %v3929_v15 = vpop.f32.mrb[70].mxu0  ;;  %v3970_v8 = vpop.f32.mrb[70].mxu1 }
 0xa69   :  { %v9163_v48 = vmul.f32 -1.442695, %v3973_v3  ;;  %v3930_v6 = vpop.f32.mrb[71].mxu0  ;;  %v3971_v50 = vpop.f32.mrb[71].mxu1 }
 0xa6a   :  { %v9164_v49 = vmul.f32 -1.442695, %v3974_v18  ;;  %v9165_v5 = vmul.f32 -1.442695, %v3976_v17  ;;  %v11692_v6 = vld [vmem:[#allocation6 + $0x104] ss:$16 sps:$4 sm:$0xff]  }
 0xa6b   :  { %10283 = vpow2.f32 %v9163_v48  ;;  %v11694_v50 = vld [vmem:[#allocation6 + $0x10c] ss:$16 sps:$4 sm:$0xff]  }
 0xa6c   :  { %10285 = vpow2.f32 %v9164_v49  ;;  %v11696_v49 = vld [vmem:[#allocation6 + $0x100] ss:$16 sps:$4 sm:$0xff]  }
 0xa6d   :  { %10287 = vpow2.f32 %v9165_v5  ;;  %v11698_v5 = vld [vmem:[#allocation6 + $0x108] ss:$16 sps:$4 sm:$0xff]  }
 0xa6e   :  { %10289 = vtanh.f32 %v3975_v47 }
 0xa75   :  { %v10284_v7 = vpop.eup %10283 }
 0xa76   :  { %v10286_v23 = vpop.eup %10285  ;;  %v3980_v61 = vadd.f32 1.0, %v10284_v7  ;;  %v11704_v7 = vld [vmem:[#allocation6 + $0x124] ss:$16 sps:$4 sm:$0xff]  }
 0xa77   :  { %v3986_v20 = vadd.f32 1.0, %v10286_v23  ;;  %v10288_v53 = vpop.eup %10287  ;;  %v11706_v23 = vld [vmem:[#allocation6 + $0x12c] ss:$16 sps:$4 sm:$0xff]  }
 0xa78   :  { %10291 = vrcp.f32 %v3980_v61  ;;  %v10290_v35 = vpop.eup %10289  ;;  %v3993_v11 = vadd.f32 1.0, %v10288_v53  ;;  %v11708_v61 = vld [vmem:[#allocation6 + $0x120] ss:$16 sps:$4 sm:$0xff]   ;;  %v11716_v53 = vld [vmem:[#allocation6 + $0x144] ss:$16 sps:$4 sm:$0xff]  }
 0xa79   :  { %10293 = vrcp.f32 %v3986_v20  ;;  %v11710_v20 = vld [vmem:[#allocation6 + $0x128] ss:$16 sps:$4 sm:$0xff]  }
 0xa7a   :  { %10295 = vrcp.f32 %v3993_v11  ;;  %v11730_v11 = vld [vmem:[#allocation6 + $0x16c] ss:$16 sps:$4 sm:$0xff]  }
 0xa82   :  { %v10292_v51 = vpop.eup %10291 }
 0xa83   :  { %v10294_v44 = vpop.eup %10293  ;;  %v3997_v16 = vmul.f32 %v10292_v51, %v10290_v35  ;;  %v11718_v35 = vld [vmem:[#allocation6 + $0x14c] ss:$16 sps:$4 sm:$0xff]   ;;  %v11720_v51 = vld [vmem:[#allocation6 + $0x140] ss:$16 sps:$4 sm:$0xff]  }
 0xa84   :  { %v3996_v46 = vmul.f32 %v10294_v44, %v11585_v14  ;;  %v10296_v56 = vpop.eup %10295  ;;  %v11722_v44 = vld [vmem:[#allocation6 + $0x148] ss:$16 sps:$4 sm:$0xff]  }
 0xa86   :  { %v11635_v1 = vadd.f32 %v3997_v16, %v3996_v46  ;;  %v11728_v16 = vld [vmem:[#allocation6 + $0x164] ss:$16 sps:$4 sm:$0xff]   ;;  %v11732_v46 = vld [vmem:[#allocation6 + $0x160] ss:$16 sps:$4 sm:$0xff]  }
 0xa88   :  { %10297 = vtanh.f32 %v11635_v1 }
 0xa92   :  { %v10298_v3 = vpop.eup %10297 }
 0xa93   :  { %v11638_v29 = vmul.f32 %v10298_v3, %v10296_v56  ;;  %v11740_v56 = vld [vmem:[#allocation6 + $0x184] ss:$16 sps:$4 sm:$0xff]   ;;  %v11742_v3 = vld [vmem:[#allocation6 + $0x18c] ss:$16 sps:$4 sm:$0xff]  }
 0xa95   :  { %v4006_v47 = vpack.c.bf16 %v11638_v29, %v11638_v29 }
 0xa97   :  { %4232 = vmatmul.mubr.bf16.vlgmr.msra.gmra.mrb[72].mxu0 %v4006_v47  ;;  %4273 = vmatmul.mubr.bf16.vlgmr.msra.gmra.mrb[72].mxu1 %v4006_v47  ;;  %v11744_v47 = vld [vmem:[#allocation6 + $0x180] ss:$16 sps:$4 sm:$0xff]  }
 0xa98   :  { %4508 = vmatpush1.bf16.msra.mxu0 %v11356_v27  ;;  %4549 = vmatpush1.bf16.msra.mxu1 %v11358_v2  ;;  %v3248_v27 = vadd.f32 %v11471_v55, %v11559_v0  ;;  %v12663_v2 = vld [vmem:[#allocation14_spill] sm:$0xff] }
 0xa99   :  { %4509 = vmatprep.subr.bf16.mxu0 %v11364_v33  ;;  %4550 = vmatprep.subr.bf16.mxu1 %v11366_v52  ;;  %v3321_v33 = vadd.f32 %v12663_v2, %v11562_v12  ;;  %v12664_v52 = vld [vmem:[#allocation15_spill] sm:$0xff]  ;;  %v11750_v2 = vld [vmem:[#allocation6 + $0x1a4] ss:$16 sps:$4 sm:$0xff]  }
 0xa9a   :  { %4539 = vmatprep.mubr.bf16.mxu0 %v12616_v32  ;;  %4580 = vmatprep.mubr.bf16.mxu1 %v12616_v32 }
 0xa9c   :  { %4510 = vmatpush1.bf16.msra.mxu0 %v11368_v22  ;;  %4551 = vmatpush1.bf16.msra.mxu1 %v11370_v13  ;;  %v3250_v22 = vadd.f32 %v12664_v52, %v11569_v28  ;;  %v12665_v13 = vld [vmem:[#allocation16_spill] sm:$0xff]  ;;  %v11756_v52 = vld [vmem:[#allocation6 + $0x1a8] ss:$16 sps:$4 sm:$0xff]  }
 0xa9d   :  { %4511 = vmatprep.subr.bf16.mxu0 %v11376_v24  ;;  %4552 = vmatprep.subr.bf16.mxu1 %v11378_v26  ;;  %v3323_v24 = vadd.f32 %v12665_v13, %v11572_v19  ;;  %v11761_v13 = vld [vmem:[#allocation6 + $0x1c4] ss:$16 sps:$4 sm:$0xff]  }
 0xaa0   :  { %4512 = vmatpush1.bf16.msra.mxu0 %v11380_v31  ;;  %4553 = vmatpush1.bf16.msra.mxu1 %v11382_v10 }
 0xaa1   :  { %4513 = vmatprep.subr.bf16.mxu0 %v11390_v34  ;;  %4554 = vmatprep.subr.bf16.mxu1 %v11394_v37 }
 0xaa4   :  { %4514 = vmatpush1.bf16.msra.mxu0 %v11388_v62  ;;  %4555 = vmatpush1.bf16.msra.mxu1 %v11392_v36 }
 0xaa5   :  { %4515 = vmatprep.subr.bf16.mxu0 %v11400_v38  ;;  %4556 = vmatprep.subr.bf16.mxu1 %v11402_v39 }
 0xaa8   :  { %4516 = vmatpush1.bf16.msra.mxu0 %v11404_v40  ;;  %4557 = vmatpush1.bf16.msra.mxu1 %v11406_v41 }
 0xaa9   :  { %4517 = vmatprep.subr.bf16.mxu0 %v11414_v58  ;;  %4558 = vmatprep.subr.bf16.mxu1 %v11418_v4 }
 0xaac   :  { %4518 = vmatpush1.bf16.msra.mxu0 %v11412_v42  ;;  %4559 = vmatpush1.bf16.msra.mxu1 %v11416_v59 }
 0xaad   :  { %4519 = vmatprep.subr.bf16.mxu0 %v11424_v54  ;;  %4560 = vmatprep.subr.bf16.mxu1 %v11426_v57 }
 0xab0   :  { %4520 = vmatpush1.bf16.msra.mxu0 %v11428_v25  ;;  %4561 = vmatpush1.bf16.msra.mxu1 %v11430_v60 }
 0xab1   :  { %4521 = vmatprep.subr.bf16.mxu0 %v11438_v63  ;;  %4562 = vmatprep.subr.bf16.mxu1 %v11442_v30 }
 0xab4   :  { %4522 = vmatpush1.bf16.msra.mxu0 %v11436_v43  ;;  %4563 = vmatpush1.bf16.msra.mxu1 %v11440_v45 }
 0xab5   :  { %4815 = vmatprep.subr.bf16.mxu0 %v11692_v6  ;;  %4856 = vmatprep.subr.bf16.mxu1 %v11694_v50 }
 0xb6a   :  { %v4233_v26 = vpop.f32.mrb[72].mxu0  ;;  %v4274_v31 = vpop.f32.mrb[72].mxu1 }
 0xb6b   :  { %v4281_v10 = vadd.f32 %v4233_v26, %v3248_v27  ;;  %v4283_v62 = vadd.f32 %v4274_v31, %v3321_v33  ;;  %v4235_v34 = vpop.f32.mrb[73].mxu0  ;;  %v4276_v36 = vpop.f32.mrb[73].mxu1  ;;  %v11746_v27 = vld [vmem:[#allocation6 + $0x188] ss:$16 sps:$4 sm:$0xff]   ;;  %v11754_v33 = vld [vmem:[#allocation6 + $0x1a0] ss:$16 sps:$4 sm:$0xff]  }
 0xb6c   :  { %v4282_v37 = vadd.f32 %v4235_v34, %v3250_v22  ;;  %v4284_v38 = vadd.f32 %v4276_v36, %v3323_v24  ;;  %v4237_v39 = vpop.f32.mrb[74].mxu0  ;;  %v4278_v40 = vpop.f32.mrb[74].mxu1  ;;  %v11758_v22 = vld [vmem:[#allocation6 + $0x1ac] ss:$16 sps:$4 sm:$0xff]   ;;  %v11768_v26 = vld [vmem:[#allocation6 + $0x1c0] ss:$16 sps:$4 sm:$0xff]  }
 0xb6d   :  { %v9198_v41 = vmul.f32 -1.442695, %v4281_v10  ;;  %v4238_v42 = vpop.f32.mrb[75].mxu0  ;;  %v4279_v58 = vpop.f32.mrb[75].mxu1  ;;  %v11763_v24 = vld [vmem:[#allocation6 + $0x1cc] ss:$16 sps:$4 sm:$0xff]  }
 0xb6e   :  { %v9199_v59 = vmul.f32 -1.442695, %v4282_v37  ;;  %v9200_v4 = vmul.f32 -1.442695, %v4284_v38  ;;  %v11770_v31 = vld [vmem:[#allocation6 + $0x1c8] ss:$16 sps:$4 sm:$0xff]  }
 0xb6f   :  { %10299 = vpow2.f32 %v9198_v41  ;;  %v11774_v10 = vld [vmem:[#allocation6 + $0x1e4] ss:$16 sps:$4 sm:$0xff]   ;;  %v11780_v34 = vld [vmem:[#allocation6 + $0x1e0] ss:$16 sps:$4 sm:$0xff]   ;;  %v11782_v36 = vld [vmem:[#allocation6 + $0x1e8] ss:$16 sps:$4 sm:$0xff]  }
 0xb70   :  { %10301 = vpow2.f32 %v9199_v59  ;;  %v12666_v37 = vld [vmem:[#allocation17_spill] sm:$0xff]  ;;  %v12667_v39 = vld [vmem:[#allocation18_spill] sm:$0xff]  ;;  %v12668_v41 = vld [vmem:[#allocation19_spill] sm:$0xff] }
 0xb71   :  { %10303 = vpow2.f32 %v9200_v4  ;;  %v3252_v38 = vadd.f32 %v12666_v37, %v11559_v0  ;;  %v3325_v40 = vadd.f32 %v12667_v39, %v11562_v12  ;;  %v3254_v42 = vadd.f32 %v12668_v41, %v11569_v28  ;;  %v12669_v58 = vld [vmem:[#allocation20_spill] sm:$0xff] }
 0xb72   :  { %10305 = vtanh.f32 %v4283_v62  ;;  %v11776_v62 = vld [vmem:[#allocation6 + $0x1ec] ss:$16 sps:$4 sm:$0xff]   ;;  %v3327_v59 = vadd.f32 %v12669_v58, %v11572_v19 }
 0xb79   :  { %v10300_v54 = vpop.eup %10299 }
 0xb7a   :  { %v10302_v57 = vpop.eup %10301  ;;  %v4288_v25 = vadd.f32 1.0, %v10300_v54 }
 0xb7b   :  { %v4294_v60 = vadd.f32 1.0, %v10302_v57  ;;  %v10304_v43 = vpop.eup %10303 }
 0xb7c   :  { %10307 = vrcp.f32 %v4288_v25  ;;  %v10306_v63 = vpop.eup %10305  ;;  %v4301_v14 = vadd.f32 1.0, %v10304_v43 }
 0xb7d   :  { %10309 = vrcp.f32 %v4294_v60 }
 0xb7e   :  { %10311 = vrcp.f32 %v4301_v14 }
 0xb86   :  { %v10308_v45 = vpop.eup %10307 }
 0xb87   :  { %v10310_v30 = vpop.eup %10309  ;;  %v4305_v55 = vmul.f32 %v10308_v45, %v10306_v63 }
 0xb88   :  { %v4304_v9 = vmul.f32 %v10310_v30, %v11635_v1  ;;  %v10312_v17 = vpop.eup %10311  ;;  %v11734_v1 = vld [vmem:[#allocation6 + $0x168] ss:$16 sps:$4 sm:$0xff]  }
 0xb8a   :  { %v11683_v18 = vadd.f32 %v4305_v55, %v4304_v9 }
 0xb8c   :  { %10313 = vtanh.f32 %v11683_v18 }
 0xb96   :  { %v10314_v15 = vpop.eup %10313 }
 0xb97   :  { %v11686_v8 = vmul.f32 %v10314_v15, %v10312_v17 }
 0xb99   :  { %v4314_v48 = vpack.c.bf16 %v11686_v8, %v11686_v8 }
 0xb9b   :  { %4540 = vmatmul.mubr.bf16.vlgmr.msra.gmra.mrb[76].mxu0 %v4314_v48  ;;  %4581 = vmatmul.mubr.bf16.vlgmr.msra.gmra.mrb[76].mxu1 %v4314_v48 }
 0xb9c   :  { %4847 = vmatprep.mubr.bf16.mxu0 %v12616_v32  ;;  %4888 = vmatprep.mubr.bf16.mxu1 %v12616_v32 }
 0xb9d   :  { %4816 = vmatpush1.bf16.msra.mxu0 %v11696_v49  ;;  %4857 = vmatpush1.bf16.msra.mxu1 %v11698_v5 }
 0xb9e   :  { %4817 = vmatprep.subr.bf16.mxu0 %v11704_v7  ;;  %4858 = vmatprep.subr.bf16.mxu1 %v11706_v23 }
 0xba1   :  { %4818 = vmatpush1.bf16.msra.mxu0 %v11708_v61  ;;  %4859 = vmatpush1.bf16.msra.mxu1 %v11710_v20 }
 0xba2   :  { %4819 = vmatprep.subr.bf16.mxu0 %v11716_v53  ;;  %4860 = vmatprep.subr.bf16.mxu1 %v11718_v35 }
 0xba5   :  { %4820 = vmatpush1.bf16.msra.mxu0 %v11720_v51  ;;  %4861 = vmatpush1.bf16.msra.mxu1 %v11722_v44 }
 0xba6   :  { %4821 = vmatprep.subr.bf16.mxu0 %v11728_v16  ;;  %4862 = vmatprep.subr.bf16.mxu1 %v11730_v11 }
 0xba9   :  { %4822 = vmatpush1.bf16.msra.mxu0 %v11732_v46  ;;  %4863 = vmatpush1.bf16.msra.mxu1 %v11734_v1 }
 0xbaa   :  { %4823 = vmatprep.subr.bf16.mxu0 %v11740_v56  ;;  %4864 = vmatprep.subr.bf16.mxu1 %v11742_v3 }
 0xbad   :  { %4824 = vmatpush1.bf16.msra.mxu0 %v11744_v47  ;;  %4865 = vmatpush1.bf16.msra.mxu1 %v11746_v27 }
 0xbae   :  { %4825 = vmatprep.subr.bf16.mxu0 %v11750_v2  ;;  %4866 = vmatprep.subr.bf16.mxu1 %v11758_v22 }
 0xbb1   :  { %4826 = vmatpush1.bf16.msra.mxu0 %v11754_v33  ;;  %4867 = vmatpush1.bf16.msra.mxu1 %v11756_v52 }
 0xbb2   :  { %4827 = vmatprep.subr.bf16.mxu0 %v11761_v13  ;;  %4868 = vmatprep.subr.bf16.mxu1 %v11763_v24 }
 0xbb5   :  { %4828 = vmatpush1.bf16.msra.mxu0 %v11768_v26  ;;  %4869 = vmatpush1.bf16.msra.mxu1 %v11770_v31 }
 0xbb6   :  { %4829 = vmatprep.subr.bf16.mxu0 %v11774_v10  ;;  %4870 = vmatprep.subr.bf16.mxu1 %v11776_v62 }
 0xbb9   :  { %4830 = vmatpush1.bf16.msra.mxu0 %v11780_v34  ;;  %4871 = vmatpush1.bf16.msra.mxu1 %v11782_v36 }
 0xbba   :  { %5123 = vmatprep.subr.bf16.mxu0 %v11692_v6  ;;  %5164 = vmatprep.subr.bf16.mxu1 %v11694_v50 }
 0xc6e   :  { %v4541_v4 = vpop.f32.mrb[76].mxu0  ;;  %v4582_v54 = vpop.f32.mrb[76].mxu1 }
 0xc6f   :  { %v4589_v57 = vadd.f32 %v4541_v4, %v3252_v38  ;;  %v4591_v25 = vadd.f32 %v4582_v54, %v3325_v40  ;;  %v4543_v60 = vpop.f32.mrb[77].mxu0  ;;  %v4584_v43 = vpop.f32.mrb[77].mxu1 }
 0xc70   :  { %v4590_v63 = vadd.f32 %v4543_v60, %v3254_v42  ;;  %v4592_v45 = vadd.f32 %v4584_v43, %v3327_v59  ;;  %v4545_v30 = vpop.f32.mrb[78].mxu0  ;;  %v4586_v55 = vpop.f32.mrb[78].mxu1 }
 0xc71   :  { %v9233_v14 = vmul.f32 -1.442695, %v4589_v57  ;;  %v4546_v9 = vpop.f32.mrb[79].mxu0  ;;  %v4587_v17 = vpop.f32.mrb[79].mxu1  ;;  %v12671_v55 = vld [vmem:[#allocation22_spill] sm:$0xff] }
 0xc72   :  { %v9234_v15 = vmul.f32 -1.442695, %v4590_v63  ;;  %v9235_v48 = vmul.f32 -1.442695, %v4592_v45  ;;  %v12672_v9 = vld [vmem:[#allocation23_spill] sm:$0xff] }
 0xc73   :  { %10315 = vpow2.f32 %v9233_v14  ;;  %v3331_v14 = vadd.f32 %v12671_v55, %v11562_v12  ;;  %v3260_v17 = vadd.f32 %v12672_v9, %v11569_v28 }
 0xc74   :  { %10317 = vpow2.f32 %v9234_v15  ;;  %v12673_v15 = vld [vmem:[#allocation24_spill] sm:$0xff] }
 0xc75   :  { %10319 = vpow2.f32 %v9235_v48  ;;  %v3333_v48 = vadd.f32 %v12673_v15, %v11572_v19 }
 0xc76   :  { %10321 = vtanh.f32 %v4591_v25 }
 0xc7d   :  { %v10316_v37 = vpop.eup %10315 }
 0xc7e   :  { %v10318_v39 = vpop.eup %10317  ;;  %v4596_v41 = vadd.f32 1.0, %v10316_v37 }
 0xc7f   :  { %v4602_v38 = vadd.f32 1.0, %v10318_v39  ;;  %v10320_v40 = vpop.eup %10319 }
 0xc80   :  { %10323 = vrcp.f32 %v4596_v41  ;;  %v10322_v42 = vpop.eup %10321  ;;  %v4609_v54 = vadd.f32 1.0, %v10320_v40 }
 0xc81   :  { %10325 = vrcp.f32 %v4602_v38 }
 0xc82   :  { %10327 = vrcp.f32 %v4609_v54 }
 0xc8a   :  { %v10324_v58 = vpop.eup %10323 }
 0xc8b   :  { %v10326_v59 = vpop.eup %10325  ;;  %v4613_v4 = vmul.f32 %v10324_v58, %v10322_v42 }
 0xc8c   :  { %v4612_v57 = vmul.f32 %v10326_v59, %v11683_v18  ;;  %v10328_v43 = vpop.eup %10327  ;;  %v12670_v18 = vld [vmem:[#allocation21_spill] sm:$0xff] }
 0xc8d   :  { %v3258_v30 = vadd.f32 %v12670_v18, %v11559_v0 }
 0xc8e   :  { %v11799_v60 = vadd.f32 %v4613_v4, %v4612_v57 }
 0xc90   :  { %10329 = vtanh.f32 %v11799_v60 }
 0xc9a   :  { %v10330_v63 = vpop.eup %10329 }
 0xc9b   :  { %v11802_v45 = vmul.f32 %v10330_v63, %v10328_v43 }
 0xc9d   :  { %v4622_v25 = vpack.c.bf16 %v11802_v45, %v11802_v45 }
 0xc9f   :  { %4848 = vmatmul.mubr.bf16.vlgmr.msra.gmra.mrb[80].mxu0 %v4622_v25  ;;  %4889 = vmatmul.mubr.bf16.vlgmr.msra.gmra.mrb[80].mxu1 %v4622_v25 }
 0xca0   :  { %5124 = vmatpush1.bf16.msra.mxu0 %v11696_v49  ;;  %5165 = vmatpush1.bf16.msra.mxu1 %v11698_v5 }
 0xca1   :  { %5125 = vmatprep.subr.bf16.mxu0 %v11704_v7  ;;  %5166 = vmatprep.subr.bf16.mxu1 %v11706_v23 }
 0xca2   :  { %5155 = vmatprep.mubr.bf16.mxu0 %v12616_v32  ;;  %5196 = vmatprep.mubr.bf16.mxu1 %v12616_v32 }
 0xca4   :  { %5126 = vmatpush1.bf16.msra.mxu0 %v11708_v61  ;;  %5167 = vmatpush1.bf16.msra.mxu1 %v11710_v20 }
 0xca5   :  { %5127 = vmatprep.subr.bf16.mxu0 %v11716_v53  ;;  %5168 = vmatprep.subr.bf16.mxu1 %v11718_v35 }
 0xca8   :  { %5128 = vmatpush1.bf16.msra.mxu0 %v11720_v51  ;;  %5169 = vmatpush1.bf16.msra.mxu1 %v11722_v44 }
 0xca9   :  { %5129 = vmatprep.subr.bf16.mxu0 %v11728_v16  ;;  %5170 = vmatprep.subr.bf16.mxu1 %v11730_v11 }
 0xcac   :  { %5130 = vmatpush1.bf16.msra.mxu0 %v11732_v46  ;;  %5171 = vmatpush1.bf16.msra.mxu1 %v11734_v1 }
 0xcad   :  { %5131 = vmatprep.subr.bf16.mxu0 %v11740_v56  ;;  %5172 = vmatprep.subr.bf16.mxu1 %v11742_v3 }
 0xcb0   :  { %5132 = vmatpush1.bf16.msra.mxu0 %v11744_v47  ;;  %5173 = vmatpush1.bf16.msra.mxu1 %v11746_v27 }
 0xcb1   :  { %5133 = vmatprep.subr.bf16.mxu0 %v11750_v2  ;;  %5174 = vmatprep.subr.bf16.mxu1 %v11758_v22 }
 0xcb4   :  { %5134 = vmatpush1.bf16.msra.mxu0 %v11754_v33  ;;  %5175 = vmatpush1.bf16.msra.mxu1 %v11756_v52 }
 0xcb5   :  { %5135 = vmatprep.subr.bf16.mxu0 %v11761_v13  ;;  %5176 = vmatprep.subr.bf16.mxu1 %v11763_v24 }
 0xcb8   :  { %5136 = vmatpush1.bf16.msra.mxu0 %v11768_v26  ;;  %5177 = vmatpush1.bf16.msra.mxu1 %v11770_v31 }
 0xcb9   :  { %5137 = vmatprep.subr.bf16.mxu0 %v11774_v10  ;;  %5178 = vmatprep.subr.bf16.mxu1 %v11776_v62 }
 0xcbc   :  { %5138 = vmatpush1.bf16.msra.mxu0 %v11780_v34  ;;  %5179 = vmatpush1.bf16.msra.mxu1 %v11782_v36 }
 0xcbd   :  { %5431 = vmatprep.subr.bf16.mxu0 %v11692_v6  ;;  %5472 = vmatprep.subr.bf16.mxu1 %v11694_v50 }
 0xd72   :  { %v4849_v37 = vpop.f32.mrb[80].mxu0  ;;  %v4890_v39 = vpop.f32.mrb[80].mxu1 }
 0xd73   :  { %v4897_v41 = vadd.f32 %v4849_v37, %v3258_v30  ;;  %v4899_v38 = vadd.f32 %v4890_v39, %v3331_v14  ;;  %v4851_v40 = vpop.f32.mrb[81].mxu0  ;;  %v4892_v42 = vpop.f32.mrb[81].mxu1 }
 0xd74   :  { %v4898_v58 = vadd.f32 %v4851_v40, %v3260_v17  ;;  %v4900_v59 = vadd.f32 %v4892_v42, %v3333_v48  ;;  %v4853_v4 = vpop.f32.mrb[82].mxu0  ;;  %v4894_v54 = vpop.f32.mrb[82].mxu1 }
 0xd75   :  { %v9268_v57 = vmul.f32 -1.442695, %v4897_v41  ;;  %v4854_v43 = vpop.f32.mrb[83].mxu0  ;;  %v4895_v63 = vpop.f32.mrb[83].mxu1 }
 0xd76   :  { %v9269_v25 = vmul.f32 -1.442695, %v4898_v58  ;;  %v9270_v18 = vmul.f32 -1.442695, %v4900_v59  ;;  %v12676_v63 = vld [vmem:[#allocation27_spill] sm:$0xff] }
 0xd77   :  { %10331 = vpow2.f32 %v9268_v57  ;;  %v12675_v57 = vld [vmem:[#allocation26_spill] sm:$0xff] }
 0xd78   :  { %10333 = vpow2.f32 %v9269_v25  ;;  %v3335_v43 = vadd.f32 %v12675_v57, %v11562_v12  ;;  %v3264_v25 = vadd.f32 %v12676_v63, %v11569_v28 }
 0xd79   :  { %10335 = vpow2.f32 %v9270_v18  ;;  %v12677_v18 = vld [vmem:[#allocation28_spill] sm:$0xff] }
 0xd7a   :  { %10337 = vtanh.f32 %v4899_v38 }
 0xd81   :  { %v10332_v55 = vpop.eup %10331 }
 0xd82   :  { %v10334_v9 = vpop.eup %10333  ;;  %v4904_v15 = vadd.f32 1.0, %v10332_v55  ;;  %v3337_v55 = vadd.f32 %v12677_v18, %v11572_v19 }
 0xd83   :  { %v4910_v30 = vadd.f32 1.0, %v10334_v9  ;;  %v10336_v14 = vpop.eup %10335 }
 0xd84   :  { %10339 = vrcp.f32 %v4904_v15  ;;  %v10338_v17 = vpop.eup %10337  ;;  %v4917_v41 = vadd.f32 1.0, %v10336_v14 }
 0xd85   :  { %10341 = vrcp.f32 %v4910_v30 }
 0xd86   :  { %10343 = vrcp.f32 %v4917_v41 }
 0xd8e   :  { %v10340_v48 = vpop.eup %10339 }
 0xd8f   :  { %v10342_v37 = vpop.eup %10341  ;;  %v4921_v39 = vmul.f32 %v10340_v48, %v10338_v17 }
 0xd90   :  { %v4920_v40 = vmul.f32 %v10342_v37, %v11799_v60  ;;  %v10344_v58 = vpop.eup %10343  ;;  %v12674_v60 = vld [vmem:[#allocation25_spill] sm:$0xff] }
 0xd91   :  { %v3262_v54 = vadd.f32 %v12674_v60, %v11559_v0 }
 0xd92   :  { %v11849_v42 = vadd.f32 %v4921_v39, %v4920_v40 }
 0xd94   :  { %10345 = vtanh.f32 %v11849_v42 }
 0xd9e   :  { %v10346_v59 = vpop.eup %10345 }
 0xd9f   :  { %v11852_v4 = vmul.f32 %v10346_v59, %v10344_v58 }
 0xda1   :  { %v4930_v38 = vpack.c.bf16 %v11852_v4, %v11852_v4 }
 0xda3   :  { %5156 = vmatmul.mubr.bf16.vlgmr.msra.gmra.mrb[84].mxu0 %v4930_v38  ;;  %5197 = vmatmul.mubr.bf16.vlgmr.msra.gmra.mrb[84].mxu1 %v4930_v38 }
 0xda4   :  { %5432 = vmatpush1.bf16.msra.mxu0 %v11696_v49  ;;  %5473 = vmatpush1.bf16.msra.mxu1 %v11698_v5 }
 0xda5   :  { %5433 = vmatprep.subr.bf16.mxu0 %v11704_v7  ;;  %5474 = vmatprep.subr.bf16.mxu1 %v11706_v23 }
 0xda6   :  { %5463 = vmatprep.mubr.bf16.mxu0 %v12616_v32  ;;  %5504 = vmatprep.mubr.bf16.mxu1 %v12616_v32 }
 0xda8   :  { %5434 = vmatpush1.bf16.msra.mxu0 %v11708_v61  ;;  %5475 = vmatpush1.bf16.msra.mxu1 %v11710_v20 }
 0xda9   :  { %5435 = vmatprep.subr.bf16.mxu0 %v11716_v53  ;;  %5476 = vmatprep.subr.bf16.mxu1 %v11718_v35 }
 0xdac   :  { %5436 = vmatpush1.bf16.msra.mxu0 %v11720_v51  ;;  %5477 = vmatpush1.bf16.msra.mxu1 %v11722_v44 }
 0xdad   :  { %5437 = vmatprep.subr.bf16.mxu0 %v11728_v16  ;;  %5478 = vmatprep.subr.bf16.mxu1 %v11730_v11 }
 0xdb0   :  { %5438 = vmatpush1.bf16.msra.mxu0 %v11732_v46  ;;  %5479 = vmatpush1.bf16.msra.mxu1 %v11734_v1 }
 0xdb1   :  { %5439 = vmatprep.subr.bf16.mxu0 %v11740_v56  ;;  %5480 = vmatprep.subr.bf16.mxu1 %v11742_v3 }
 0xdb4   :  { %5440 = vmatpush1.bf16.msra.mxu0 %v11744_v47  ;;  %5481 = vmatpush1.bf16.msra.mxu1 %v11746_v27 }
 0xdb5   :  { %5441 = vmatprep.subr.bf16.mxu0 %v11750_v2  ;;  %5482 = vmatprep.subr.bf16.mxu1 %v11758_v22 }
 0xdb8   :  { %5442 = vmatpush1.bf16.msra.mxu0 %v11754_v33  ;;  %5483 = vmatpush1.bf16.msra.mxu1 %v11756_v52 }
 0xdb9   :  { %5443 = vmatprep.subr.bf16.mxu0 %v11761_v13  ;;  %5484 = vmatprep.subr.bf16.mxu1 %v11763_v24 }
 0xdbc   :  { %5444 = vmatpush1.bf16.msra.mxu0 %v11768_v26  ;;  %5485 = vmatpush1.bf16.msra.mxu1 %v11770_v31 }
 0xdbd   :  { %5445 = vmatprep.subr.bf16.mxu0 %v11774_v10  ;;  %5486 = vmatprep.subr.bf16.mxu1 %v11776_v62 }
 0xdc0   :  { %5446 = vmatpush1.bf16.msra.mxu0 %v11780_v34  ;;  %5487 = vmatpush1.bf16.msra.mxu1 %v11782_v36 }
 0xdc1   :  { %5739 = vmatprep.subr.bf16.mxu0 %v11692_v6  ;;  %5780 = vmatprep.subr.bf16.mxu1 %v11694_v50 }
 0xe76   :  { %v5157_v9 = vpop.f32.mrb[84].mxu0  ;;  %v5198_v15 = vpop.f32.mrb[84].mxu1 }
 0xe77   :  { %v5205_v30 = vadd.f32 %v5157_v9, %v3262_v54  ;;  %v5207_v14 = vadd.f32 %v5198_v15, %v3335_v43  ;;  %v5159_v17 = vpop.f32.mrb[85].mxu0  ;;  %v5200_v6 = vpop.f32.mrb[85].mxu1 }
 0xe78   :  { %v5206_v48 = vadd.f32 %v5159_v17, %v3264_v25  ;;  %v5208_v50 = vadd.f32 %v5200_v6, %v3337_v55  ;;  %v5161_v37 = vpop.f32.mrb[86].mxu0  ;;  %v5202_v39 = vpop.f32.mrb[86].mxu1 }
 0xe79   :  { %v9303_v41 = vmul.f32 -1.442695, %v5205_v30  ;;  %v5162_v40 = vpop.f32.mrb[87].mxu0  ;;  %v5203_v58 = vpop.f32.mrb[87].mxu1 }
 0xe7a   :  { %v9304_v59 = vmul.f32 -1.442695, %v5206_v48  ;;  %v9305_v38 = vmul.f32 -1.442695, %v5208_v50 }
 0xe7b   :  { %10347 = vpow2.f32 %v9303_v41 }
 0xe7c   :  { %10349 = vpow2.f32 %v9304_v59 }
 0xe7d   :  { %10351 = vpow2.f32 %v9305_v38 }
 0xe7e   :  { %10353 = vtanh.f32 %v5207_v14 }
 0xe85   :  { %v10348_v60 = vpop.eup %10347 }
 0xe86   :  { %v10350_v57 = vpop.eup %10349  ;;  %v5212_v63 = vadd.f32 1.0, %v10348_v60 }
 0xe87   :  { %v5218_v54 = vadd.f32 1.0, %v10350_v57  ;;  %v10352_v43 = vpop.eup %10351 }
 0xe88   :  { %10355 = vrcp.f32 %v5212_v63  ;;  %v10354_v25 = vpop.eup %10353  ;;  %v5225_v15 = vadd.f32 1.0, %v10352_v43  ;;  %v9995_v63 = vld [vmem:[#allocation4 + $0x100] ss:$16 sps:$4 sm:$0xff]  }
 0xe89   :  { %10357 = vrcp.f32 %v5218_v54  ;;  %v9998_v54 = vld [vmem:[#allocation4 + $0x108] ss:$16 sps:$4 sm:$0xff]  }
 0xe8a   :  { %10359 = vrcp.f32 %v5225_v15  ;;  %v10009_v15 = vld [vmem:[#allocation4 + $0x144] ss:$16 sps:$4 sm:$0xff]  }
 0xe92   :  { %v10356_v18 = vpop.eup %10355 }
 0xe93   :  { %v10358_v55 = vpop.eup %10357  ;;  %v5229_v9 = vmul.f32 %v10356_v18, %v10354_v25  ;;  %v10003_v25 = vld [vmem:[#allocation4 + $0x124] ss:$16 sps:$4 sm:$0xff]   ;;  %v10006_v18 = vld [vmem:[#allocation4 + $0x12c] ss:$16 sps:$4 sm:$0xff]  }
 0xe94   :  { %v5228_v30 = vmul.f32 %v10358_v55, %v11849_v42  ;;  %v10360_v6 = vpop.eup %10359  ;;  %v10001_v55 = vld [vmem:[#allocation4 + $0x120] ss:$16 sps:$4 sm:$0xff]  }
 0xe96   :  { %v11899_v17 = vadd.f32 %v5229_v9, %v5228_v30  ;;  %v10004_v9 = vld [vmem:[#allocation4 + $0x128] ss:$16 sps:$4 sm:$0xff]   ;;  %v10012_v30 = vld [vmem:[#allocation4 + $0x14c] ss:$16 sps:$4 sm:$0xff]  }
 0xe98   :  { %10361 = vtanh.f32 %v11899_v17 }
 0xea2   :  { %v10362_v48 = vpop.eup %10361 }
 0xea3   :  { %v11902_v50 = vmul.f32 %v10362_v48, %v10360_v6  ;;  %v10010_v6 = vld [vmem:[#allocation4 + $0x148] ss:$16 sps:$4 sm:$0xff]   ;;  %v10015_v48 = vld [vmem:[#allocation4 + $0x164] ss:$16 sps:$4 sm:$0xff]  }
 0xea5   :  { %v5238_v14 = vpack.c.bf16 %v11902_v50, %v11902_v50 }
 0xea7   :  { %5464 = vmatmul.mubr.bf16.vlgmr.msra.gmra.mrb[88].mxu0 %v5238_v14  ;;  %5505 = vmatmul.mubr.bf16.vlgmr.msra.gmra.mrb[88].mxu1 %v5238_v14  ;;  %v10018_v14 = vld [vmem:[#allocation4 + $0x16c] ss:$16 sps:$4 sm:$0xff]  }
 0xea8   :  { %5740 = vmatpush1.bf16.msra.mxu0 %v11696_v49  ;;  %5781 = vmatpush1.bf16.msra.mxu1 %v11698_v5  ;;  %v9997_v49 = vld [vmem:[#allocation4 + $0x104] ss:$16 sps:$4 sm:$0xff]   ;;  %v10000_v5 = vld [vmem:[#allocation4 + $0x10c] ss:$16 sps:$4 sm:$0xff]  }
 0xea9   :  { %5741 = vmatprep.subr.bf16.mxu0 %v11704_v7  ;;  %5782 = vmatprep.subr.bf16.mxu1 %v11706_v23  ;;  %v12678_v7 = vld [vmem:[#allocation29_spill] sm:$0xff] }
 0xeaa   :  { %5771 = vmatprep.mubr.bf16.mxu0 %v12616_v32  ;;  %5812 = vmatprep.mubr.bf16.mxu1 %v12616_v32  ;;  %v3268_v23 = vadd.f32 %v12678_v7, %v11559_v0  ;;  %v10021_v7 = vld [vmem:[#allocation4 + $0x184] ss:$16 sps:$4 sm:$0xff]  }
 0xeac   :  { %5742 = vmatpush1.bf16.msra.mxu0 %v11708_v61  ;;  %5783 = vmatpush1.bf16.msra.mxu1 %v11710_v20  ;;  %v12679_v61 = vld [vmem:[#allocation30_spill] sm:$0xff] }
 0xead   :  { %5743 = vmatprep.subr.bf16.mxu0 %v11716_v53  ;;  %5784 = vmatprep.subr.bf16.mxu1 %v11718_v35  ;;  %v3341_v20 = vadd.f32 %v12679_v61, %v11562_v12  ;;  %v12680_v53 = vld [vmem:[#allocation31_spill] sm:$0xff]  ;;  %v10019_v61 = vld [vmem:[#allocation4 + $0x180] ss:$16 sps:$4 sm:$0xff]  }
 0xeae   :  { %v3270_v35 = vadd.f32 %v12680_v53, %v11569_v28  ;;  %v10027_v53 = vld [vmem:[#allocation4 + $0x1a4] ss:$16 sps:$4 sm:$0xff]  }
 0xeb0   :  { %5744 = vmatpush1.bf16.msra.mxu0 %v11720_v51  ;;  %5785 = vmatpush1.bf16.msra.mxu1 %v11722_v44  ;;  %v12681_v51 = vld [vmem:[#allocation32_spill] sm:$0xff] }
 0xeb1   :  { %5745 = vmatprep.subr.bf16.mxu0 %v11728_v16  ;;  %5786 = vmatprep.subr.bf16.mxu1 %v11730_v11  ;;  %v3343_v44 = vadd.f32 %v12681_v51, %v11572_v19  ;;  %v10025_v51 = vld [vmem:[#allocation4 + $0x1a0] ss:$16 sps:$4 sm:$0xff]  }
 0xeb4   :  { %5746 = vmatpush1.bf16.msra.mxu0 %v11732_v46  ;;  %5787 = vmatpush1.bf16.msra.mxu1 %v11734_v1 }
 0xeb5   :  { %5747 = vmatprep.subr.bf16.mxu0 %v11740_v56  ;;  %5788 = vmatprep.subr.bf16.mxu1 %v11742_v3 }
 0xeb8   :  { %5748 = vmatpush1.bf16.msra.mxu0 %v11744_v47  ;;  %5789 = vmatpush1.bf16.msra.mxu1 %v11746_v27 }
 0xeb9   :  { %5749 = vmatprep.subr.bf16.mxu0 %v11750_v2  ;;  %5790 = vmatprep.subr.bf16.mxu1 %v11758_v22 }
 0xebc   :  { %5750 = vmatpush1.bf16.msra.mxu0 %v11754_v33  ;;  %5791 = vmatpush1.bf16.msra.mxu1 %v11756_v52 }
 0xebd   :  { %5751 = vmatprep.subr.bf16.mxu0 %v11761_v13  ;;  %5792 = vmatprep.subr.bf16.mxu1 %v11763_v24 }
 0xec0   :  { %5752 = vmatpush1.bf16.msra.mxu0 %v11768_v26  ;;  %5793 = vmatpush1.bf16.msra.mxu1 %v11770_v31 }
 0xec1   :  { %5753 = vmatprep.subr.bf16.mxu0 %v11774_v10  ;;  %5794 = vmatprep.subr.bf16.mxu1 %v11776_v62 }
 0xec4   :  { %5754 = vmatpush1.bf16.msra.mxu0 %v11780_v34  ;;  %5795 = vmatpush1.bf16.msra.mxu1 %v11782_v36 }
 0xec5   :  { %6078 = vmatprep.subr.bf16.mxu0 %v9997_v49  ;;  %6151 = vmatprep.subr.bf16.mxu1 %v10000_v5  ;;  %v10013_v49 = vld [vmem:[#allocation4 + $0x160] ss:$16 sps:$4 sm:$0xff]   ;;  %v10016_v5 = vld [vmem:[#allocation4 + $0x168] ss:$16 sps:$4 sm:$0xff]  }
 0xf7a   :  { %v5465_v16 = vpop.f32.mrb[88].mxu0  ;;  %v5506_v11 = vpop.f32.mrb[88].mxu1 }
 0xf7b   :  { %v5513_v46 = vadd.f32 %v5465_v16, %v3268_v23  ;;  %v5515_v1 = vadd.f32 %v5506_v11, %v3341_v20  ;;  %v5467_v56 = vpop.f32.mrb[89].mxu0  ;;  %v5508_v3 = vpop.f32.mrb[89].mxu1  ;;  %v10024_v23 = vld [vmem:[#allocation4 + $0x18c] ss:$16 sps:$4 sm:$0xff]   ;;  %v10022_v20 = vld [vmem:[#allocation4 + $0x188] ss:$16 sps:$4 sm:$0xff]  }
 0xf7c   :  { %v5514_v47 = vadd.f32 %v5467_v56, %v3270_v35  ;;  %v5516_v27 = vadd.f32 %v5508_v3, %v3343_v44  ;;  %v5469_v2 = vpop.f32.mrb[90].mxu0  ;;  %v5510_v33 = vpop.f32.mrb[90].mxu1  ;;  %v10030_v35 = vld [vmem:[#allocation4 + $0x1ac] ss:$16 sps:$4 sm:$0xff]   ;;  %v10028_v44 = vld [vmem:[#allocation4 + $0x1a8] ss:$16 sps:$4 sm:$0xff]  }
 0xf7d   :  { %v9338_v52 = vmul.f32 -1.442695, %v5513_v46  ;;  %v5470_v22 = vpop.f32.mrb[91].mxu0  ;;  %v5511_v13 = vpop.f32.mrb[91].mxu1  ;;  %v10033_v16 = vld [vmem:[#allocation4 + $0x1c4] ss:$16 sps:$4 sm:$0xff]   ;;  %v5858_v2 = vpack.c.bf16 %v11638_v29, %v11588_v21  ;;  %v5859_v33 = vpack.c.bf16 %v11802_v45, %v11686_v8 }
 0xf7e   :  { %v9339_v24 = vmul.f32 -1.442695, %v5514_v47  ;;  %v9340_v26 = vmul.f32 -1.442695, %v5516_v27  ;;  %v10036_v11 = vld [vmem:[#allocation4 + $0x1cc] ss:$16 sps:$4 sm:$0xff]  }
 0xf7f   :  { %10363 = vpow2.f32 %v9338_v52  ;;  %v10031_v46 = vld [vmem:[#allocation4 + $0x1c0] ss:$16 sps:$4 sm:$0xff]   ;;  %v10039_v56 = vld [vmem:[#allocation4 + $0x1e4] ss:$16 sps:$4 sm:$0xff]   ;;  %v10042_v3 = vld [vmem:[#allocation4 + $0x1ec] ss:$16 sps:$4 sm:$0xff]   ;;  %v5860_v52 = vpack.c.bf16 %v11902_v50, %v11852_v4 }
 0xf80   :  { %10365 = vpow2.f32 %v9339_v24  ;;  %v10037_v47 = vld [vmem:[#allocation4 + $0x1e0] ss:$16 sps:$4 sm:$0xff]   ;;  %v10040_v27 = vld [vmem:[#allocation4 + $0x1e8] ss:$16 sps:$4 sm:$0xff]   ;;  %v11968_v21 = vld [vmem:[#allocation6 + $0x204] ss:$16 sps:$4 sm:$0xff]  }
 0xf81   :  { %10367 = vpow2.f32 %v9340_v26  ;;  %v11970_v29 = vld [vmem:[#allocation6 + $0x20c] ss:$16 sps:$4 sm:$0xff]   ;;  %v11972_v8 = vld [vmem:[#allocation6 + $0x200] ss:$16 sps:$4 sm:$0xff]   ;;  %v11974_v45 = vld [vmem:[#allocation6 + $0x208] ss:$16 sps:$4 sm:$0xff]  }
 0xf82   :  { %10369 = vtanh.f32 %v5515_v1  ;;  %v10034_v1 = vld [vmem:[#allocation4 + $0x1c8] ss:$16 sps:$4 sm:$0xff]   ;;  %v11980_v4 = vld [vmem:[#allocation6 + $0x224] ss:$16 sps:$4 sm:$0xff]   ;;  %v11982_v50 = vld [vmem:[#allocation6 + $0x22c] ss:$16 sps:$4 sm:$0xff]  }
 0xf83   :  { %v11984_v22 = vld [vmem:[#allocation6 + $0x220] ss:$16 sps:$4 sm:$0xff]   ;;  %v11986_v13 = vld [vmem:[#allocation6 + $0x228] ss:$16 sps:$4 sm:$0xff]   ;;  %v11992_v24 = vld [vmem:[#allocation6 + $0x244] ss:$16 sps:$4 sm:$0xff]  }
 0xf84   :  { %v11994_v26 = vld [vmem:[#allocation6 + $0x24c] ss:$16 sps:$4 sm:$0xff]  }
 0xf89   :  { %v10364_v31 = vpop.eup %10363 }
 0xf8a   :  { %v10366_v10 = vpop.eup %10365  ;;  %v5520_v62 = vadd.f32 1.0, %v10364_v31  ;;  %v11996_v31 = vld [vmem:[#allocation6 + $0x240] ss:$16 sps:$4 sm:$0xff]  }
 0xf8b   :  { %v5526_v34 = vadd.f32 1.0, %v10366_v10  ;;  %v10368_v36 = vpop.eup %10367  ;;  %v11998_v10 = vld [vmem:[#allocation6 + $0x248] ss:$16 sps:$4 sm:$0xff]  }
 0xf8c   :  { %10371 = vrcp.f32 %v5520_v62  ;;  %v10370_v42 = vpop.eup %10369  ;;  %v5533_v40 = vadd.f32 1.0, %v10368_v36  ;;  %v12004_v62 = vld [vmem:[#allocation6 + $0x260] ss:$16 sps:$4 sm:$0xff]   ;;  %v12008_v36 = vld [vmem:[#allocation6 + $0x268] ss:$16 sps:$4 sm:$0xff]  }
 0xf8d   :  { %10373 = vrcp.f32 %v5526_v34  ;;  %v12006_v34 = vld [vmem:[#allocation6 + $0x264] ss:$16 sps:$4 sm:$0xff]  }
 0xf8e   :  { %10375 = vrcp.f32 %v5533_v40  ;;  %v12022_v40 = vld [vmem:[#allocation6 + $0x288] ss:$16 sps:$4 sm:$0xff]  }
 0xf96   :  { %v10372_v37 = vpop.eup %10371 }
 0xf97   :  { %v10374_v39 = vpop.eup %10373  ;;  %v5537_v41 = vmul.f32 %v10372_v37, %v10370_v42  ;;  %v12010_v42 = vld [vmem:[#allocation6 + $0x26c] ss:$16 sps:$4 sm:$0xff]   ;;  %v12016_v37 = vld [vmem:[#allocation6 + $0x284] ss:$16 sps:$4 sm:$0xff]  }
 0xf98   :  { %v5536_v58 = vmul.f32 %v10374_v39, %v11899_v17  ;;  %v10376_v38 = vpop.eup %10375  ;;  %v10007_v17 = vld [vmem:[#allocation4 + $0x140] ss:$16 sps:$4 sm:$0xff]   ;;  %v12018_v39 = vld [vmem:[#allocation6 + $0x28c] ss:$16 sps:$4 sm:$0xff]  }
 0xf9a   :  { %v11947_v59 = vadd.f32 %v5537_v41, %v5536_v58  ;;  %v12020_v41 = vld [vmem:[#allocation6 + $0x280] ss:$16 sps:$4 sm:$0xff]  }
 0xf9b   :  { %v12028_v58 = vld [vmem:[#allocation6 + $0x2a0] ss:$16 sps:$4 sm:$0xff]  }
 0xf9c   :  { %10377 = vtanh.f32 %v11947_v59 }
 0xfa6   :  { %v10378_v60 = vpop.eup %10377 }
 0xfa7   :  { %v11950_v57 = vmul.f32 %v10378_v60, %v10376_v38  ;;  %v12030_v38 = vld [vmem:[#allocation6 + $0x2a4] ss:$16 sps:$4 sm:$0xff]   ;;  %v12032_v60 = vld [vmem:[#allocation6 + $0x2a8] ss:$16 sps:$4 sm:$0xff]  }
 0xfa9   :  { %v5546_v43 = vpack.c.bf16 %v11950_v57, %v11950_v57 }
 0xfab   :  { %5772 = vmatmul.mubr.bf16.vlgmr.msra.gmra.mrb[92].mxu0 %v5546_v43  ;;  %5813 = vmatmul.mubr.bf16.vlgmr.msra.gmra.mrb[92].mxu1 %v5546_v43  ;;  %v12042_v43 = vld [vmem:[#allocation6 + $0x2cc] ss:$16 sps:$4 sm:$0xff]  }
 0xfac   :  { %6079 = vmatpush1.bf16.msra.mxu0 %v9995_v63  ;;  %6152 = vmatpush1.bf16.msra.mxu1 %v9998_v54  ;;  %v12034_v63 = vld [vmem:[#allocation6 + $0x2ac] ss:$16 sps:$4 sm:$0xff]   ;;  %v12040_v54 = vld [vmem:[#allocation6 + $0x2c4] ss:$16 sps:$4 sm:$0xff]  }
 0xfad   :  { %6080 = vmatprep.subr.bf16.mxu0 %v10003_v25  ;;  %6153 = vmatprep.subr.bf16.mxu1 %v10006_v18  ;;  %v12044_v25 = vld [vmem:[#allocation6 + $0x2c0] ss:$16 sps:$4 sm:$0xff]   ;;  %v12046_v18 = vld [vmem:[#allocation6 + $0x2c8] ss:$16 sps:$4 sm:$0xff]  }
 0xfae   :  { %6110 = vmatprep.mubr.bf16.mxu0 %v12616_v32  ;;  %6183 = vmatprep.mubr.bf16.mxu1 %v12616_v32 }
 0xfb0   :  { %6081 = vmatpush1.bf16.msra.mxu0 %v10001_v55  ;;  %6154 = vmatpush1.bf16.msra.mxu1 %v10004_v9  ;;  %v12052_v55 = vld [vmem:[#allocation6 + $0x2e0] ss:$16 sps:$4 sm:$0xff]   ;;  %v12054_v9 = vld [vmem:[#allocation6 + $0x2e4] ss:$16 sps:$4 sm:$0xff]  }
 0xfb1   :  { %6082 = vmatprep.subr.bf16.mxu0 %v10009_v15  ;;  %6155 = vmatprep.subr.bf16.mxu1 %v10012_v30  ;;  %v12056_v15 = vld [vmem:[#allocation6 + $0x2e8] ss:$16 sps:$4 sm:$0xff]   ;;  %v12058_v30 = vld [vmem:[#allocation6 + $0x2ec] ss:$16 sps:$4 sm:$0xff]  }
 0xfb4   :  { %6083 = vmatpush1.bf16.msra.mxu0 %v10007_v17  ;;  %6156 = vmatpush1.bf16.msra.mxu1 %v10010_v6  ;;  %v12682_v17 = vld [vmem:[#allocation33_spill] sm:$0xff] }
 0xfb5   :  { %6084 = vmatprep.subr.bf16.mxu0 %v10015_v48  ;;  %6157 = vmatprep.subr.bf16.mxu1 %v10018_v14  ;;  %v3272_v6 = vadd.f32 %v12682_v17, %v11559_v0  ;;  %v12683_v48 = vld [vmem:[#allocation34_spill] sm:$0xff] }
 0xfb6   :  { %v3345_v14 = vadd.f32 %v12683_v48, %v11562_v12 }
 0xfb8   :  { %6085 = vmatpush1.bf16.msra.mxu0 %v10013_v49  ;;  %6158 = vmatpush1.bf16.msra.mxu1 %v10016_v5  ;;  %v12684_v49 = vld [vmem:[#allocation35_spill] sm:$0xff] }
 0xfb9   :  { %6086 = vmatprep.subr.bf16.mxu0 %v10021_v7  ;;  %6159 = vmatprep.subr.bf16.mxu1 %v10024_v23  ;;  %v3274_v5 = vadd.f32 %v12684_v49, %v11569_v28  ;;  %v12685_v7 = vld [vmem:[#allocation36_spill] sm:$0xff] }
 0xfba   :  { %v3347_v23 = vadd.f32 %v12685_v7, %v11572_v19 }
 0xfbc   :  { %6087 = vmatpush1.bf16.msra.mxu0 %v10019_v61  ;;  %6160 = vmatpush1.bf16.msra.mxu1 %v10022_v20 }
 0xfbd   :  { %6088 = vmatprep.subr.bf16.mxu0 %v10027_v53  ;;  %6161 = vmatprep.subr.bf16.mxu1 %v10030_v35 }
 0xfc0   :  { %6089 = vmatpush1.bf16.msra.mxu0 %v10025_v51  ;;  %6162 = vmatpush1.bf16.msra.mxu1 %v10028_v44 }
 0xfc1   :  { %6090 = vmatprep.subr.bf16.mxu0 %v10033_v16  ;;  %6163 = vmatprep.subr.bf16.mxu1 %v10036_v11 }
 0xfc4   :  { %6091 = vmatpush1.bf16.msra.mxu0 %v10031_v46  ;;  %6164 = vmatpush1.bf16.msra.mxu1 %v10034_v1 }
 0xfc5   :  { %6092 = vmatprep.subr.bf16.mxu0 %v10039_v56  ;;  %6165 = vmatprep.subr.bf16.mxu1 %v10042_v3 }
 0xfc8   :  { %6093 = vmatpush1.bf16.msra.mxu0 %v10037_v47  ;;  %6166 = vmatpush1.bf16.msra.mxu1 %v10040_v27 }
 0xfc9   :  { %6458 = vmatprep.subr.bf16.mxu0 %v11968_v21  ;;  %6499 = vmatprep.subr.bf16.mxu1 %v11970_v29 }
 0xfcb   :  { %6111 = vmatmul.mubr.bf16.vlgmr.msra.gmra.mrb[96].mxu0 %v5858_v2  ;;  %6184 = vmatmul.mubr.bf16.vlgmr.msra.gmra.mrb[96].mxu1 %v5858_v2 }
 0xfcc   :  { %6120 = vmatprep.mubr.bf16.mxu0 %v12616_v32  ;;  %6193 = vmatprep.mubr.bf16.mxu1 %v12616_v32 }
 0xfcd   :  { %6459 = vmatpush1.bf16.msra.mxu0 %v11972_v8  ;;  %6500 = vmatpush1.bf16.msra.mxu1 %v11974_v45 }
 0xfce   :  { %6460 = vmatprep.subr.bf16.mxu0 %v11980_v4  ;;  %6501 = vmatprep.subr.bf16.mxu1 %v11982_v50 }
 0xfd1   :  { %6461 = vmatpush1.bf16.msra.mxu0 %v11984_v22  ;;  %6502 = vmatpush1.bf16.msra.mxu1 %v11986_v13 }
 0xfd2   :  { %6462 = vmatprep.subr.bf16.mxu0 %v11992_v24  ;;  %6503 = vmatprep.subr.bf16.mxu1 %v11994_v26 }
 0xfd3   :  { %6121 = vmatmul.mubr.bf16.gmra.mrb[100].mxu0 %v5859_v33  ;;  %6194 = vmatmul.mubr.bf16.gmra.mrb[100].mxu1 %v5859_v33 }
 0xfd4   :  { %6130 = vmatprep.mubr.bf16.mxu0 %v12616_v32  ;;  %6203 = vmatprep.mubr.bf16.mxu1 %v12616_v32 }
 0xfd5   :  { %6463 = vmatpush1.bf16.msra.mxu0 %v11996_v31  ;;  %6504 = vmatpush1.bf16.msra.mxu1 %v11998_v10 }
 0xfd6   :  { %6464 = vmatprep.subr.bf16.mxu0 %v12006_v34  ;;  %6505 = vmatprep.subr.bf16.mxu1 %v12010_v42 }
 0xfd9   :  { %6465 = vmatpush1.bf16.msra.mxu0 %v12004_v62  ;;  %6506 = vmatpush1.bf16.msra.mxu1 %v12008_v36 }
 0xfda   :  { %6466 = vmatprep.subr.bf16.mxu0 %v12016_v37  ;;  %6507 = vmatprep.subr.bf16.mxu1 %v12018_v39 }
 0xfdb   :  { %6131 = vmatmul.mubr.bf16.gmra.mrb[104].mxu0 %v5860_v52  ;;  %6204 = vmatmul.mubr.bf16.gmra.mrb[104].mxu1 %v5860_v52 }
 0xfdc   :  { %6140 = vmatprep.mubr.bf16.mxu0 %v12616_v32  ;;  %6213 = vmatprep.mubr.bf16.mxu1 %v12616_v32 }
 0xfdd   :  { %6467 = vmatpush1.bf16.msra.mxu0 %v12020_v41  ;;  %6508 = vmatpush1.bf16.msra.mxu1 %v12022_v40 }
 0xfde   :  { %6468 = vmatprep.subr.bf16.mxu0 %v12030_v38  ;;  %6509 = vmatprep.subr.bf16.mxu1 %v12034_v63 }
 0xfe1   :  { %6469 = vmatpush1.bf16.msra.mxu0 %v12028_v58  ;;  %6510 = vmatpush1.bf16.msra.mxu1 %v12032_v60 }
 0xfe2   :  { %6470 = vmatprep.subr.bf16.mxu0 %v12040_v54  ;;  %6511 = vmatprep.subr.bf16.mxu1 %v12042_v43 }
 0xfe5   :  { %6471 = vmatpush1.bf16.msra.mxu0 %v12044_v25  ;;  %6512 = vmatpush1.bf16.msra.mxu1 %v12046_v18 }
 0xfe6   :  { %6472 = vmatprep.subr.bf16.mxu0 %v12054_v9  ;;  %6513 = vmatprep.subr.bf16.mxu1 %v12058_v30 }
 0xfe9   :  { %6473 = vmatpush1.bf16.msra.mxu0 %v12052_v55  ;;  %6514 = vmatpush1.bf16.msra.mxu1 %v12056_v15 }
 0xfea   :  { %6766 = vmatprep.subr.bf16.mxu0 %v11968_v21  ;;  %6807 = vmatprep.subr.bf16.mxu1 %v11970_v29 }
0x107e   :  { %v5773_v61 = vpop.f32.mrb[92].mxu0  ;;  %v5814_v20 = vpop.f32.mrb[92].mxu1 }
0x107f   :  { %v5821_v53 = vadd.f32 %v5773_v61, %v3272_v6  ;;  %v5823_v35 = vadd.f32 %v5814_v20, %v3345_v14  ;;  %v5775_v51 = vpop.f32.mrb[93].mxu0  ;;  %v5816_v44 = vpop.f32.mrb[93].mxu1 }
0x1080   :  { %v5822_v16 = vadd.f32 %v5775_v51, %v3274_v5  ;;  %v5824_v11 = vadd.f32 %v5816_v44, %v3347_v23  ;;  %v5777_v46 = vpop.f32.mrb[94].mxu0  ;;  %v5818_v1 = vpop.f32.mrb[94].mxu1 }
0x1081   :  { %v9373_v0 = vmul.f32 -1.442695, %v5821_v53  ;;  %v5778_v56 = vpop.f32.mrb[95].mxu0  ;;  %v5819_v3 = vpop.f32.mrb[95].mxu1 }
0x1082   :  { %v9374_v12 = vmul.f32 -1.442695, %v5822_v16  ;;  %v9375_v28 = vmul.f32 -1.442695, %v5824_v11 }
0x1083   :  { %10379 = vpow2.f32 %v9373_v0 }
0x1084   :  { %10381 = vpow2.f32 %v9374_v12 }
0x1085   :  { %10383 = vpow2.f32 %v9375_v28 }
0x1086   :  { %10385 = vtanh.f32 %v5823_v35 }
0x108d   :  { %v10380_v47 = vpop.eup %10379 }
0x108e   :  { %v10382_v27 = vpop.eup %10381  ;;  %v5828_v19 = vadd.f32 1.0, %v10380_v47 }
0x108f   :  { %v5834_v2 = vadd.f32 1.0, %v10382_v27  ;;  %v10384_v33 = vpop.eup %10383 }
0x1090   :  { %10387 = vrcp.f32 %v5828_v19  ;;  %v10386_v52 = vpop.eup %10385  ;;  %v5841_v14 = vadd.f32 1.0, %v10384_v33 }
0x1091   :  { %10389 = vrcp.f32 %v5834_v2 }
0x1092   :  { %10391 = vrcp.f32 %v5841_v14 }
0x109a   :  { %v10388_v17 = vpop.eup %10387 }
0x109b   :  { %v10390_v6 = vpop.eup %10389  ;;  %v5845_v48 = vmul.f32 %v10388_v17, %v10386_v52 }
0x109c   :  { %v5844_v49 = vmul.f32 %v10390_v6, %v11947_v59  ;;  %v10392_v56 = vpop.eup %10391 }
0x109e   :  { %v12075_v5 = vpop.f32.mrb[96].mxu0  ;;  %v12077_v7 = vpop.f32.mrb[96].mxu1  ;;  %v5846_v23 = vadd.f32 %v5845_v48, %v5844_v49 }
0x109f   :  { %v12079_v61 = vpop.f32.mrb[97].mxu0  ;;  %v12081_v20 = vpop.f32.mrb[97].mxu1 }
0x10a0   :  { %v12083_v53 = vpop.f32.mrb[98].mxu0  ;;  %v12085_v35 = vpop.f32.mrb[98].mxu1  ;;  %10393 = vtanh.f32 %v5846_v23  ;;  %v9376_v23 = vld [vmem:[%s12579_s4 + $0x8] sm:$0xf] }
0x10a1   :  { %v12087_v51 = vpop.f32.mrb[99].mxu0  ;;  %v12089_v44 = vpop.f32.mrb[99].mxu1 }
0x10a6   :  { %v12091_v59 = vpop.f32.mrb[100].mxu0  ;;  %v12093_v16 = vpop.f32.mrb[100].mxu1 }
0x10a7   :  { %12686 = vst [vmem:[#allocation14_spill] sm:$0xff] %v12093_v16  ;;  %v12095_v11 = vpop.f32.mrb[101].mxu0  ;;  %v12097_v46 = vpop.f32.mrb[101].mxu1 }
0x10a8   :  { %12687 = vst [vmem:[#allocation15_spill] sm:$0xff] %v12095_v11  ;;  %12688 = vst [vmem:[#allocation16_spill] sm:$0xff] %v12097_v46  ;;  %v12099_v1 = vpop.f32.mrb[102].mxu0  ;;  %v12101_v0 = vpop.f32.mrb[102].mxu1 }
0x10a9   :  { %12689 = vst [vmem:[#allocation17_spill] sm:$0xff] %v12099_v1  ;;  %12690 = vst [vmem:[#allocation18_spill] sm:$0xff] %v12101_v0  ;;  %v12103_v3 = vpop.f32.mrb[103].mxu0  ;;  %v12105_v12 = vpop.f32.mrb[103].mxu1 }
0x10aa   :  { %12691 = vst [vmem:[#allocation19_spill] sm:$0xff] %v12103_v3  ;;  %12692 = vst [vmem:[#allocation20_spill] sm:$0xff] %v12105_v12  ;;  %v10394_v28 = vpop.eup %10393 }
0x10ab   :  { %v5848_v47 = vmul.f32 %v10394_v28, %v10392_v56 }
0x10ad   :  { %v5861_v27 = vpack.c.bf16 %v5848_v47, %v11950_v57  ;;  %v9409_v57 = vld [vmem:[%s12580_s5 + $0x10] sm:$0xff] }
0x10ae   :  { %v12108_v19 = vpop.f32.mrb[104].mxu0  ;;  %v12110_v2 = vpop.f32.mrb[104].mxu1  ;;  %v6264_v49 = vpack.c.bf16 %v9409_v57, %v9409_v57 }
0x10af   :  { %12693 = vst [vmem:[#allocation21_spill] sm:$0xff] %v12108_v19  ;;  %12694 = vst [vmem:[#allocation22_spill] sm:$0xff] %v12110_v2  ;;  %v12112_v33 = vpop.f32.mrb[105].mxu0  ;;  %v12114_v52 = vpop.f32.mrb[105].mxu1  ;;  %6141 = vmatmul.mubr.bf16.gmra.mrb[108].mxu0 %v5861_v27  ;;  %6214 = vmatmul.mubr.bf16.gmra.mrb[108].mxu1 %v5861_v27 }
0x10b0   :  { %12695 = vst [vmem:[#allocation23_spill] sm:$0xff] %v12112_v33  ;;  %12696 = vst [vmem:[#allocation24_spill] sm:$0xff] %v12114_v52  ;;  %v12116_v17 = vpop.f32.mrb[106].mxu0  ;;  %v12118_v6 = vpop.f32.mrb[106].mxu1  ;;  %6490 = vmatprep.mubr.bf16.mxu0 %v12616_v32  ;;  %6531 = vmatprep.mubr.bf16.mxu1 %v12616_v32 }
0x10b1   :  { %12697 = vst [vmem:[#allocation25_spill] sm:$0xff] %v12116_v17  ;;  %12698 = vst [vmem:[#allocation26_spill] sm:$0xff] %v12118_v6  ;;  %v12125_v48 = vpop.f32.mrb[107].mxu0  ;;  %v12127_v14 = vpop.f32.mrb[107].mxu1  ;;  %v12708_v6 = vld [vmem:[#allocation10_spill] sm:$0xff] }
0x10b2   :  { %12699 = vst [vmem:[#allocation27_spill] sm:$0xff] %v12125_v48  ;;  %12700 = vst [vmem:[#allocation28_spill] sm:$0xff] %v12127_v14  ;;  %v12707_v14 = vld [vmem:[#allocation12_spill] sm:$0xff]  ;;  %v12182_v17 = vrot.slane %v9376_v23, %v12708_v6 }
0x10b3   :  { %v12179_v48 = vrot.slane %v9376_v23, %v12707_v14 }
0x10b4   :  { %v6186_v14 = vadd.f32 %v12077_v7, %v12182_v17 }
0x10b7   :  { %6491 = vmatmul.mubr.bf16.vlgmr.msra.gmra.mrb[112].mxu0 %v6264_v49  ;;  %6532 = vmatmul.mubr.bf16.vlgmr.msra.gmra.mrb[112].mxu1 %v6264_v49 }
0x10b8   :  { %6767 = vmatpush1.bf16.msra.mxu0 %v11972_v8  ;;  %6808 = vmatpush1.bf16.msra.mxu1 %v11974_v45 }
0x10b9   :  { %6768 = vmatprep.subr.bf16.mxu0 %v11980_v4  ;;  %6809 = vmatprep.subr.bf16.mxu1 %v11982_v50 }
0x10ba   :  { %6798 = vmatprep.mubr.bf16.mxu0 %v12616_v32  ;;  %6839 = vmatprep.mubr.bf16.mxu1 %v12616_v32 }
0x10bc   :  { %6769 = vmatpush1.bf16.msra.mxu0 %v11984_v22  ;;  %6810 = vmatpush1.bf16.msra.mxu1 %v11986_v13 }
0x10bd   :  { %6770 = vmatprep.subr.bf16.mxu0 %v11992_v24  ;;  %6811 = vmatprep.subr.bf16.mxu1 %v11994_v26 }
0x10c0   :  { %6771 = vmatpush1.bf16.msra.mxu0 %v11996_v31  ;;  %6812 = vmatpush1.bf16.msra.mxu1 %v11998_v10 }
0x10c1   :  { %6772 = vmatprep.subr.bf16.mxu0 %v12006_v34  ;;  %6813 = vmatprep.subr.bf16.mxu1 %v12010_v42 }
0x10c4   :  { %6773 = vmatpush1.bf16.msra.mxu0 %v12004_v62  ;;  %6814 = vmatpush1.bf16.msra.mxu1 %v12008_v36 }
0x10c5   :  { %6774 = vmatprep.subr.bf16.mxu0 %v12016_v37  ;;  %6815 = vmatprep.subr.bf16.mxu1 %v12018_v39 }
0x10c8   :  { %6775 = vmatpush1.bf16.msra.mxu0 %v12020_v41  ;;  %6816 = vmatpush1.bf16.msra.mxu1 %v12022_v40 }
0x10c9   :  { %6776 = vmatprep.subr.bf16.mxu0 %v12030_v38  ;;  %6817 = vmatprep.subr.bf16.mxu1 %v12034_v63 }
0x10cc   :  { %6777 = vmatpush1.bf16.msra.mxu0 %v12028_v58  ;;  %6818 = vmatpush1.bf16.msra.mxu1 %v12032_v60 }
0x10cd   :  { %6778 = vmatprep.subr.bf16.mxu0 %v12040_v54  ;;  %6819 = vmatprep.subr.bf16.mxu1 %v12042_v43 }
0x10d0   :  { %6779 = vmatpush1.bf16.msra.mxu0 %v12044_v25  ;;  %6820 = vmatpush1.bf16.msra.mxu1 %v12046_v18 }
0x10d1   :  { %6780 = vmatprep.subr.bf16.mxu0 %v12054_v9  ;;  %6821 = vmatprep.subr.bf16.mxu1 %v12058_v30 }
0x10d4   :  { %6781 = vmatpush1.bf16.msra.mxu0 %v12052_v55  ;;  %6822 = vmatpush1.bf16.msra.mxu1 %v12056_v15 }
0x10d5   :  { %7075 = vmatprep.subr.bf16.mxu0 %v11968_v21  ;;  %7116 = vmatprep.subr.bf16.mxu1 %v11970_v29 }
0x1182   :  { %v12166_v56 = vpop.f32.mrb[108].mxu0  ;;  %v12168_v28 = vpop.f32.mrb[108].mxu1 }
0x1183   :  { %12701 = vst [vmem:[#allocation29_spill] sm:$0xff] %v12166_v56  ;;  %12702 = vst [vmem:[#allocation30_spill] sm:$0xff] %v12168_v28  ;;  %v12170_v47 = vpop.f32.mrb[109].mxu0  ;;  %v12172_v27 = vpop.f32.mrb[109].mxu1  ;;  %v12711_v56 = vld [vmem:[#allocation13_spill] sm:$0xff] }
0x1184   :  { %12703 = vst [vmem:[#allocation31_spill] sm:$0xff] %v12170_v47  ;;  %12704 = vst [vmem:[#allocation32_spill] sm:$0xff] %v12172_v27  ;;  %v12174_v57 = vpop.f32.mrb[110].mxu0  ;;  %v12176_v49 = vpop.f32.mrb[110].mxu1  ;;  %v12189_v28 = vrot.slane %v9376_v23, %v12711_v56  ;;  %v12712_v47 = vld [vmem:[#allocation11_spill] sm:$0xff] }
0x1185   :  { %12705 = vst [vmem:[#allocation33_spill] sm:$0xff] %v12174_v57  ;;  %12706 = vst [vmem:[#allocation34_spill] sm:$0xff] %v12176_v49  ;;  %v12184_v52 = vpop.f32.mrb[111].mxu0  ;;  %v12186_v33 = vpop.f32.mrb[111].mxu1  ;;  %v12192_v2 = vrot.slane %v9376_v23, %v12712_v47  ;;  %v6113_v57 = vadd.f32 %v12075_v5, %v12179_v48 }
0x1186   :  { %12709 = vst [vmem:[#allocation35_spill] sm:$0xff] %v12184_v52  ;;  %12710 = vst [vmem:[#allocation36_spill] sm:$0xff] %v12186_v33  ;;  %v6115_v6 = vadd.f32 %v12079_v61, %v12189_v28 }
0x1187   :  { %v6188_v52 = vadd.f32 %v12081_v20, %v12192_v2 }
0x118a   :  { %v6492_v49 = vpop.f32.mrb[112].mxu0  ;;  %v6533_v33 = vpop.f32.mrb[112].mxu1 }
0x118b   :  { %v6540_v27 = vadd.f32 %v6492_v49, %v6113_v57  ;;  %v6542_v56 = vadd.f32 %v6533_v33, %v6186_v14  ;;  %v6494_v19 = vpop.f32.mrb[113].mxu0  ;;  %v6535_v12 = vpop.f32.mrb[113].mxu1 }
0x118c   :  { %v6541_v23 = vadd.f32 %v6494_v19, %v6115_v6  ;;  %v6543_v47 = vadd.f32 %v6535_v12, %v6188_v52  ;;  %v6496_v3 = vpop.f32.mrb[114].mxu0  ;;  %v6537_v0 = vpop.f32.mrb[114].mxu1  ;;  %v6117_v6 = vadd.f32 %v12083_v53, %v12179_v48 }
0x118d   :  { %v9443_v5 = vmul.f32 -1.442695, %v6540_v27  ;;  %v6497_v1 = vpop.f32.mrb[115].mxu0  ;;  %v6538_v46 = vpop.f32.mrb[115].mxu1  ;;  %v9410_v0 = vld [vmem:[%s12581_s6 + $0x10] sm:$0xff] }
0x118e   :  { %v9444_v7 = vmul.f32 -1.442695, %v6541_v23  ;;  %v9445_v61 = vmul.f32 -1.442695, %v6543_v47  ;;  %v6119_v23 = vadd.f32 %v12087_v51, %v12189_v28  ;;  %v6192_v47 = vadd.f32 %v12089_v44, %v12192_v2 }
0x118f   :  { %10395 = vpow2.f32 %v9443_v5 }
0x1190   :  { %10397 = vpow2.f32 %v9444_v7 }
0x1191   :  { %10399 = vpow2.f32 %v9445_v61 }
0x1192   :  { %10401 = vtanh.f32 %v6542_v56  ;;  %v6190_v56 = vadd.f32 %v12085_v35, %v12182_v17 }
0x1199   :  { %v10396_v11 = vpop.eup %10395 }
0x119a   :  { %v10398_v16 = vpop.eup %10397  ;;  %v6547_v20 = vadd.f32 1.0, %v10396_v11 }
0x119b   :  { %v6553_v57 = vadd.f32 1.0, %v10398_v16  ;;  %v10400_v33 = vpop.eup %10399 }
0x119c   :  { %10403 = vrcp.f32 %v6547_v20  ;;  %v10402_v19 = vpop.eup %10401  ;;  %v6560_v12 = vadd.f32 1.0, %v10400_v33 }
0x119d   :  { %10405 = vrcp.f32 %v6553_v57 }
0x119e   :  { %10407 = vrcp.f32 %v6560_v12 }
0x11a6   :  { %v10404_v1 = vpop.eup %10403 }
0x11a7   :  { %v10406_v46 = vpop.eup %10405  ;;  %v6564_v3 = vmul.f32 %v10404_v1, %v10402_v19 }
0x11a8   :  { %v6563_v52 = vmul.f32 %v10406_v46, %v9410_v0  ;;  %v10408_v11 = vpop.eup %10407 }
0x11aa   :  { %v12205_v27 = vadd.f32 %v6564_v3, %v6563_v52 }
0x11ac   :  { %10409 = vtanh.f32 %v12205_v27 }
0x11b6   :  { %v10410_v16 = vpop.eup %10409 }
0x11b7   :  { %v6567_v49 = vmul.f32 %v10410_v16, %v10408_v11 }
0x11b9   :  { %6568 = vst [vmem:[%s12582_s7] sm:$0xff] %v6567_v49  ;;  %v6573_v14 = vpack.c.bf16 %v6567_v49, %v6567_v49 }
0x11bb   :  { %6799 = vmatmul.mubr.bf16.vlgmr.msra.gmra.mrb[116].mxu0 %v6573_v14  ;;  %6840 = vmatmul.mubr.bf16.vlgmr.msra.gmra.mrb[116].mxu1 %v6573_v14 }
0x11bc   :  { %7076 = vmatpush1.bf16.msra.mxu0 %v11972_v8  ;;  %7117 = vmatpush1.bf16.msra.mxu1 %v11974_v45 }
0x11bd   :  { %7077 = vmatprep.subr.bf16.mxu0 %v11980_v4  ;;  %7118 = vmatprep.subr.bf16.mxu1 %v11982_v50 }
0x11be   :  { %7107 = vmatprep.mubr.bf16.mxu0 %v12616_v32  ;;  %7148 = vmatprep.mubr.bf16.mxu1 %v12616_v32 }
0x11c0   :  { %7078 = vmatpush1.bf16.msra.mxu0 %v11984_v22  ;;  %7119 = vmatpush1.bf16.msra.mxu1 %v11986_v13 }
0x11c1   :  { %7079 = vmatprep.subr.bf16.mxu0 %v11992_v24  ;;  %7120 = vmatprep.subr.bf16.mxu1 %v11994_v26 }
0x11c4   :  { %7080 = vmatpush1.bf16.msra.mxu0 %v11996_v31  ;;  %7121 = vmatpush1.bf16.msra.mxu1 %v11998_v10 }
0x11c5   :  { %7081 = vmatprep.subr.bf16.mxu0 %v12006_v34  ;;  %7122 = vmatprep.subr.bf16.mxu1 %v12010_v42 }
0x11c8   :  { %7082 = vmatpush1.bf16.msra.mxu0 %v12004_v62  ;;  %7123 = vmatpush1.bf16.msra.mxu1 %v12008_v36 }
0x11c9   :  { %7083 = vmatprep.subr.bf16.mxu0 %v12016_v37  ;;  %7124 = vmatprep.subr.bf16.mxu1 %v12018_v39 }
0x11cc   :  { %7084 = vmatpush1.bf16.msra.mxu0 %v12020_v41  ;;  %7125 = vmatpush1.bf16.msra.mxu1 %v12022_v40 }
0x11cd   :  { %7085 = vmatprep.subr.bf16.mxu0 %v12030_v38  ;;  %7126 = vmatprep.subr.bf16.mxu1 %v12034_v63 }
0x11d0   :  { %7086 = vmatpush1.bf16.msra.mxu0 %v12028_v58  ;;  %7127 = vmatpush1.bf16.msra.mxu1 %v12032_v60 }
0x11d1   :  { %7087 = vmatprep.subr.bf16.mxu0 %v12040_v54  ;;  %7128 = vmatprep.subr.bf16.mxu1 %v12042_v43 }
0x11d4   :  { %7088 = vmatpush1.bf16.msra.mxu0 %v12044_v25  ;;  %7129 = vmatpush1.bf16.msra.mxu1 %v12046_v18 }
0x11d5   :  { %7089 = vmatprep.subr.bf16.mxu0 %v12054_v9  ;;  %7130 = vmatprep.subr.bf16.mxu1 %v12058_v30 }
0x11d8   :  { %7090 = vmatpush1.bf16.msra.mxu0 %v12052_v55  ;;  %7131 = vmatpush1.bf16.msra.mxu1 %v12056_v15 }
0x11d9   :  { %7384 = vmatprep.subr.bf16.mxu0 %v11968_v21  ;;  %7425 = vmatprep.subr.bf16.mxu1 %v11970_v29 }
0x128e   :  { %v6800_v5 = vpop.f32.mrb[116].mxu0  ;;  %v6841_v7 = vpop.f32.mrb[116].mxu1 }
0x128f   :  { %v6848_v61 = vadd.f32 %v6800_v5, %v6117_v6  ;;  %v6850_v20 = vadd.f32 %v6841_v7, %v6190_v56  ;;  %v6802_v57 = vpop.f32.mrb[117].mxu0  ;;  %v6843_v21 = vpop.f32.mrb[117].mxu1 }
0x1290   :  { %v6849_v33 = vadd.f32 %v6802_v57, %v6119_v23  ;;  %v6851_v29 = vadd.f32 %v6843_v21, %v6192_v47  ;;  %v6804_v19 = vpop.f32.mrb[118].mxu0  ;;  %v6845_v0 = vpop.f32.mrb[118].mxu1 }
0x1291   :  { %v9478_v53 = vmul.f32 -1.442695, %v6848_v61  ;;  %v6805_v1 = vpop.f32.mrb[119].mxu0  ;;  %v6846_v46 = vpop.f32.mrb[119].mxu1 }
0x1292   :  { %v9479_v35 = vmul.f32 -1.442695, %v6849_v33  ;;  %v9480_v51 = vmul.f32 -1.442695, %v6851_v29  ;;  %v12311_v1 = vld [vmem:[#allocation6 + $0x20c] ss:$16 sps:$4 sm:$0xff]  }
0x1293   :  { %10411 = vpow2.f32 %v9478_v53  ;;  %v12309_v53 = vld [vmem:[#allocation6 + $0x204] ss:$16 sps:$4 sm:$0xff]   ;;  %v12313_v46 = vld [vmem:[#allocation6 + $0x200] ss:$16 sps:$4 sm:$0xff]  }
0x1294   :  { %10413 = vpow2.f32 %v9479_v35  ;;  %v12315_v35 = vld [vmem:[#allocation6 + $0x208] ss:$16 sps:$4 sm:$0xff]  }
0x1295   :  { %10415 = vpow2.f32 %v9480_v51  ;;  %v12321_v51 = vld [vmem:[#allocation6 + $0x224] ss:$16 sps:$4 sm:$0xff]  }
0x1296   :  { %10417 = vtanh.f32 %v6850_v20 }
0x129d   :  { %v10412_v3 = vpop.eup %10411 }
0x129e   :  { %v10414_v12 = vpop.eup %10413  ;;  %v6855_v44 = vadd.f32 1.0, %v10412_v3  ;;  %v12323_v3 = vld [vmem:[#allocation6 + $0x22c] ss:$16 sps:$4 sm:$0xff]  }
0x129f   :  { %v6861_v52 = vadd.f32 1.0, %v10414_v12  ;;  %v10416_v11 = vpop.eup %10415  ;;  %v12325_v12 = vld [vmem:[#allocation6 + $0x220] ss:$16 sps:$4 sm:$0xff]  }
0x12a0   :  { %10419 = vrcp.f32 %v6855_v44  ;;  %v10418_v16 = vpop.eup %10417  ;;  %v6868_v56 = vadd.f32 1.0, %v10416_v11  ;;  %v12327_v44 = vld [vmem:[#allocation6 + $0x228] ss:$16 sps:$4 sm:$0xff]   ;;  %v12335_v11 = vld [vmem:[#allocation6 + $0x24c] ss:$16 sps:$4 sm:$0xff]  }
0x12a1   :  { %10421 = vrcp.f32 %v6861_v52  ;;  %v12333_v52 = vld [vmem:[#allocation6 + $0x244] ss:$16 sps:$4 sm:$0xff]  }
0x12a2   :  { %10423 = vrcp.f32 %v6868_v56  ;;  %v12349_v56 = vld [vmem:[#allocation6 + $0x260] ss:$16 sps:$4 sm:$0xff]  }
0x12aa   :  { %v10420_v49 = vpop.eup %10419 }
0x12ab   :  { %v10422_v14 = vpop.eup %10421  ;;  %v6872_v6 = vmul.f32 %v10420_v49, %v10418_v16  ;;  %v12337_v16 = vld [vmem:[#allocation6 + $0x240] ss:$16 sps:$4 sm:$0xff]   ;;  %v12339_v49 = vld [vmem:[#allocation6 + $0x248] ss:$16 sps:$4 sm:$0xff]  }
0x12ac   :  { %v6871_v23 = vmul.f32 %v10422_v14, %v12205_v27  ;;  %v10424_v5 = vpop.eup %10423  ;;  %v12345_v14 = vld [vmem:[#allocation6 + $0x264] ss:$16 sps:$4 sm:$0xff]  }
0x12ae   :  { %v12254_v47 = vadd.f32 %v6872_v6, %v6871_v23  ;;  %v12347_v6 = vld [vmem:[#allocation6 + $0x26c] ss:$16 sps:$4 sm:$0xff]   ;;  %v12351_v23 = vld [vmem:[#allocation6 + $0x268] ss:$16 sps:$4 sm:$0xff]  }
0x12b0   :  { %10425 = vtanh.f32 %v12254_v47 }
0x12ba   :  { %v10426_v7 = vpop.eup %10425 }
0x12bb   :  { %v6875_v61 = vmul.f32 %v10426_v7, %v10424_v5  ;;  %v12359_v5 = vld [vmem:[#allocation6 + $0x28c] ss:$16 sps:$4 sm:$0xff]   ;;  %v12361_v7 = vld [vmem:[#allocation6 + $0x280] ss:$16 sps:$4 sm:$0xff]  }
0x12bd   :  { %9481 = vst [vmem:[%s12582_s7 + $0x8] sm:$0xff] %v6875_v61  ;;  %v6882_v20 = vpack.c.bf16 %v6875_v61, %v6875_v61  ;;  %v12363_v61 = vld [vmem:[#allocation6 + $0x288] ss:$16 sps:$4 sm:$0xff]  }
0x12bf   :  { %7108 = vmatmul.mubr.bf16.vlgmr.msra.gmra.mrb[120].mxu0 %v6882_v20  ;;  %7149 = vmatmul.mubr.bf16.vlgmr.msra.gmra.mrb[120].mxu1 %v6882_v20  ;;  %v12367_v20 = vld [vmem:[#allocation6 + $0x2a4] ss:$16 sps:$4 sm:$0xff]  }
0x12c0   :  { %7385 = vmatpush1.bf16.msra.mxu0 %v11972_v8  ;;  %7426 = vmatpush1.bf16.msra.mxu1 %v11974_v45  ;;  %v6123_v8 = vadd.f32 %v12091_v59, %v12179_v48  ;;  %v12713_v45 = vld [vmem:[#allocation14_spill] sm:$0xff] }
0x12c1   :  { %7386 = vmatprep.subr.bf16.mxu0 %v11980_v4  ;;  %7427 = vmatprep.subr.bf16.mxu1 %v11982_v50  ;;  %v6196_v4 = vadd.f32 %v12713_v45, %v12182_v17  ;;  %v12714_v50 = vld [vmem:[#allocation15_spill] sm:$0xff] }
0x12c2   :  { %7416 = vmatprep.mubr.bf16.mxu0 %v12616_v32  ;;  %7457 = vmatprep.mubr.bf16.mxu1 %v12616_v32  ;;  %v12373_v45 = vld [vmem:[#allocation6 + $0x2a8] ss:$16 sps:$4 sm:$0xff]  }
0x12c4   :  { %7387 = vmatpush1.bf16.msra.mxu0 %v11984_v22  ;;  %7428 = vmatpush1.bf16.msra.mxu1 %v11986_v13  ;;  %v6125_v22 = vadd.f32 %v12714_v50, %v12189_v28  ;;  %v12715_v13 = vld [vmem:[#allocation16_spill] sm:$0xff] }
0x12c5   :  { %7388 = vmatprep.subr.bf16.mxu0 %v11992_v24  ;;  %7429 = vmatprep.subr.bf16.mxu1 %v11994_v26  ;;  %v6198_v24 = vadd.f32 %v12715_v13, %v12192_v2  ;;  %v12378_v50 = vld [vmem:[#allocation6 + $0x2c4] ss:$16 sps:$4 sm:$0xff]   ;;  %v12385_v13 = vld [vmem:[#allocation6 + $0x2c0] ss:$16 sps:$4 sm:$0xff]  }
0x12c8   :  { %7389 = vmatpush1.bf16.msra.mxu0 %v11996_v31  ;;  %7430 = vmatpush1.bf16.msra.mxu1 %v11998_v10 }
0x12c9   :  { %7390 = vmatprep.subr.bf16.mxu0 %v12006_v34  ;;  %7431 = vmatprep.subr.bf16.mxu1 %v12010_v42 }
0x12cc   :  { %7391 = vmatpush1.bf16.msra.mxu0 %v12004_v62  ;;  %7432 = vmatpush1.bf16.msra.mxu1 %v12008_v36 }
0x12cd   :  { %7392 = vmatprep.subr.bf16.mxu0 %v12016_v37  ;;  %7433 = vmatprep.subr.bf16.mxu1 %v12018_v39 }
0x12d0   :  { %7393 = vmatpush1.bf16.msra.mxu0 %v12020_v41  ;;  %7434 = vmatpush1.bf16.msra.mxu1 %v12022_v40 }
0x12d1   :  { %7394 = vmatprep.subr.bf16.mxu0 %v12030_v38  ;;  %7435 = vmatprep.subr.bf16.mxu1 %v12034_v63 }
0x12d4   :  { %7395 = vmatpush1.bf16.msra.mxu0 %v12028_v58  ;;  %7436 = vmatpush1.bf16.msra.mxu1 %v12032_v60 }
0x12d5   :  { %7396 = vmatprep.subr.bf16.mxu0 %v12040_v54  ;;  %7437 = vmatprep.subr.bf16.mxu1 %v12042_v43 }
0x12d8   :  { %7397 = vmatpush1.bf16.msra.mxu0 %v12044_v25  ;;  %7438 = vmatpush1.bf16.msra.mxu1 %v12046_v18 }
0x12d9   :  { %7398 = vmatprep.subr.bf16.mxu0 %v12054_v9  ;;  %7439 = vmatprep.subr.bf16.mxu1 %v12058_v30 }
0x12dc   :  { %7399 = vmatpush1.bf16.msra.mxu0 %v12052_v55  ;;  %7440 = vmatpush1.bf16.msra.mxu1 %v12056_v15 }
0x12dd   :  { %7693 = vmatprep.subr.bf16.mxu0 %v12309_v53  ;;  %7734 = vmatprep.subr.bf16.mxu1 %v12311_v1 }
0x1392   :  { %v7109_v26 = vpop.f32.mrb[120].mxu0  ;;  %v7150_v31 = vpop.f32.mrb[120].mxu1 }
0x1393   :  { %v7157_v10 = vadd.f32 %v7109_v26, %v6123_v8  ;;  %v7159_v62 = vadd.f32 %v7150_v31, %v6196_v4  ;;  %v7111_v34 = vpop.f32.mrb[121].mxu0  ;;  %v7152_v36 = vpop.f32.mrb[121].mxu1  ;;  %v12371_v8 = vld [vmem:[#allocation6 + $0x2a0] ss:$16 sps:$4 sm:$0xff]   ;;  %v12375_v4 = vld [vmem:[#allocation6 + $0x2ac] ss:$16 sps:$4 sm:$0xff]  }
0x1394   :  { %v7158_v42 = vadd.f32 %v7111_v34, %v6125_v22  ;;  %v7160_v37 = vadd.f32 %v7152_v36, %v6198_v24  ;;  %v7113_v39 = vpop.f32.mrb[122].mxu0  ;;  %v7154_v41 = vpop.f32.mrb[122].mxu1  ;;  %v12380_v22 = vld [vmem:[#allocation6 + $0x2cc] ss:$16 sps:$4 sm:$0xff]   ;;  %v12387_v24 = vld [vmem:[#allocation6 + $0x2c8] ss:$16 sps:$4 sm:$0xff]  }
0x1395   :  { %v9514_v40 = vmul.f32 -1.442695, %v7157_v10  ;;  %v7114_v58 = vpop.f32.mrb[123].mxu0  ;;  %v7155_v38 = vpop.f32.mrb[123].mxu1  ;;  %v12391_v26 = vld [vmem:[#allocation6 + $0x2e4] ss:$16 sps:$4 sm:$0xff]  }
0x1396   :  { %v9515_v60 = vmul.f32 -1.442695, %v7158_v42  ;;  %v9516_v63 = vmul.f32 -1.442695, %v7160_v37  ;;  %v12393_v31 = vld [vmem:[#allocation6 + $0x2ec] ss:$16 sps:$4 sm:$0xff]  }
0x1397   :  { %10427 = vpow2.f32 %v9514_v40  ;;  %v12397_v10 = vld [vmem:[#allocation6 + $0x2e0] ss:$16 sps:$4 sm:$0xff]   ;;  %v12716_v34 = vld [vmem:[#allocation17_spill] sm:$0xff]  ;;  %v12718_v39 = vld [vmem:[#allocation19_spill] sm:$0xff] }
0x1398   :  { %10429 = vpow2.f32 %v9515_v60  ;;  %v6127_v36 = vadd.f32 %v12716_v34, %v12179_v48  ;;  %v12717_v42 = vld [vmem:[#allocation18_spill] sm:$0xff]  ;;  %v6129_v41 = vadd.f32 %v12718_v39, %v12189_v28  ;;  %v12719_v40 = vld [vmem:[#allocation20_spill] sm:$0xff] }
0x1399   :  { %10431 = vpow2.f32 %v9516_v63  ;;  %v6200_v37 = vadd.f32 %v12717_v42, %v12182_v17  ;;  %v6202_v58 = vadd.f32 %v12719_v40, %v12192_v2 }
0x139a   :  { %10433 = vtanh.f32 %v7159_v62  ;;  %v12399_v62 = vld [vmem:[#allocation6 + $0x2e8] ss:$16 sps:$4 sm:$0xff]  }
0x13a1   :  { %v10428_v54 = vpop.eup %10427 }
0x13a2   :  { %v10430_v43 = vpop.eup %10429  ;;  %v7164_v25 = vadd.f32 1.0, %v10428_v54 }
0x13a3   :  { %v7170_v18 = vadd.f32 1.0, %v10430_v43  ;;  %v10432_v55 = vpop.eup %10431 }
0x13a4   :  { %10435 = vrcp.f32 %v7164_v25  ;;  %v10434_v9 = vpop.eup %10433  ;;  %v7177_v27 = vadd.f32 1.0, %v10432_v55 }
0x13a5   :  { %10437 = vrcp.f32 %v7170_v18 }
0x13a6   :  { %10439 = vrcp.f32 %v7177_v27 }
0x13ae   :  { %v10436_v15 = vpop.eup %10435 }
0x13af   :  { %v10438_v30 = vpop.eup %10437  ;;  %v7181_v59 = vmul.f32 %v10436_v15, %v10434_v9 }
0x13b0   :  { %v7180_v57 = vmul.f32 %v10438_v30, %v12254_v47  ;;  %v10440_v33 = vpop.eup %10439  ;;  %v12357_v47 = vld [vmem:[#allocation6 + $0x284] ss:$16 sps:$4 sm:$0xff]  }
0x13b2   :  { %v12301_v21 = vadd.f32 %v7181_v59, %v7180_v57 }
0x13b4   :  { %10441 = vtanh.f32 %v12301_v21 }
0x13be   :  { %v10442_v29 = vpop.eup %10441 }
0x13bf   :  { %v7184_v19 = vmul.f32 %v10442_v29, %v10440_v33 }
0x13c1   :  { %9517 = vst [vmem:[%s12582_s7 + $0x10] sm:$0xff] %v7184_v19  ;;  %v7191_v0 = vpack.c.bf16 %v7184_v19, %v7184_v19 }
0x13c3   :  { %7417 = vmatmul.mubr.bf16.vlgmr.msra.gmra.mrb[124].mxu0 %v7191_v0  ;;  %7458 = vmatmul.mubr.bf16.vlgmr.msra.gmra.mrb[124].mxu1 %v7191_v0 }
0x13c4   :  { %7725 = vmatprep.mubr.bf16.mxu0 %v12616_v32  ;;  %7766 = vmatprep.mubr.bf16.mxu1 %v12616_v32 }
0x13c5   :  { %7694 = vmatpush1.bf16.msra.mxu0 %v12313_v46  ;;  %7735 = vmatpush1.bf16.msra.mxu1 %v12315_v35 }
0x13c6   :  { %7695 = vmatprep.subr.bf16.mxu0 %v12321_v51  ;;  %7736 = vmatprep.subr.bf16.mxu1 %v12323_v3 }
0x13c9   :  { %7696 = vmatpush1.bf16.msra.mxu0 %v12325_v12  ;;  %7737 = vmatpush1.bf16.msra.mxu1 %v12327_v44 }
0x13ca   :  { %7697 = vmatprep.subr.bf16.mxu0 %v12333_v52  ;;  %7738 = vmatprep.subr.bf16.mxu1 %v12335_v11 }
0x13cd   :  { %7698 = vmatpush1.bf16.msra.mxu0 %v12337_v16  ;;  %7739 = vmatpush1.bf16.msra.mxu1 %v12339_v49 }
0x13ce   :  { %7699 = vmatprep.subr.bf16.mxu0 %v12345_v14  ;;  %7740 = vmatprep.subr.bf16.mxu1 %v12347_v6 }
0x13d1   :  { %7700 = vmatpush1.bf16.msra.mxu0 %v12349_v56  ;;  %7741 = vmatpush1.bf16.msra.mxu1 %v12351_v23 }
0x13d2   :  { %7701 = vmatprep.subr.bf16.mxu0 %v12357_v47  ;;  %7742 = vmatprep.subr.bf16.mxu1 %v12359_v5 }
0x13d5   :  { %7702 = vmatpush1.bf16.msra.mxu0 %v12361_v7  ;;  %7743 = vmatpush1.bf16.msra.mxu1 %v12363_v61 }
0x13d6   :  { %7703 = vmatprep.subr.bf16.mxu0 %v12367_v20  ;;  %7744 = vmatprep.subr.bf16.mxu1 %v12375_v4 }
0x13d9   :  { %7704 = vmatpush1.bf16.msra.mxu0 %v12371_v8  ;;  %7745 = vmatpush1.bf16.msra.mxu1 %v12373_v45 }
0x13da   :  { %7705 = vmatprep.subr.bf16.mxu0 %v12378_v50  ;;  %7746 = vmatprep.subr.bf16.mxu1 %v12380_v22 }
0x13dd   :  { %7706 = vmatpush1.bf16.msra.mxu0 %v12385_v13  ;;  %7747 = vmatpush1.bf16.msra.mxu1 %v12387_v24 }
0x13de   :  { %7707 = vmatprep.subr.bf16.mxu0 %v12391_v26  ;;  %7748 = vmatprep.subr.bf16.mxu1 %v12393_v31 }
0x13e1   :  { %7708 = vmatpush1.bf16.msra.mxu0 %v12397_v10  ;;  %7749 = vmatpush1.bf16.msra.mxu1 %v12399_v62 }
0x13e2   :  { %8002 = vmatprep.subr.bf16.mxu0 %v12309_v53  ;;  %8043 = vmatprep.subr.bf16.mxu1 %v12311_v1 }
0x1496   :  { %v7418_v38 = vpop.f32.mrb[124].mxu0  ;;  %v7459_v60 = vpop.f32.mrb[124].mxu1 }
0x1497   :  { %v7466_v63 = vadd.f32 %v7418_v38, %v6127_v36  ;;  %v7468_v54 = vadd.f32 %v7459_v60, %v6200_v37  ;;  %v7420_v43 = vpop.f32.mrb[125].mxu0  ;;  %v7461_v25 = vpop.f32.mrb[125].mxu1 }
0x1498   :  { %v7467_v18 = vadd.f32 %v7420_v43, %v6129_v41  ;;  %v7469_v55 = vadd.f32 %v7461_v25, %v6202_v58  ;;  %v7422_v9 = vpop.f32.mrb[126].mxu0  ;;  %v7463_v15 = vpop.f32.mrb[126].mxu1 }
0x1499   :  { %v9550_v30 = vmul.f32 -1.442695, %v7466_v63  ;;  %v7423_v59 = vpop.f32.mrb[127].mxu0  ;;  %v7464_v27 = vpop.f32.mrb[127].mxu1  ;;  %v12722_v9 = vld [vmem:[#allocation23_spill] sm:$0xff] }
0x149a   :  { %v9551_v57 = vmul.f32 -1.442695, %v7467_v18  ;;  %v9552_v33 = vmul.f32 -1.442695, %v7469_v55  ;;  %v12721_v18 = vld [vmem:[#allocation22_spill] sm:$0xff]  ;;  %v6135_v15 = vadd.f32 %v12722_v9, %v12189_v28 }
0x149b   :  { %10443 = vpow2.f32 %v9550_v30  ;;  %v6206_v55 = vadd.f32 %v12721_v18, %v12182_v17  ;;  %v12723_v30 = vld [vmem:[#allocation24_spill] sm:$0xff] }
0x149c   :  { %10445 = vpow2.f32 %v9551_v57  ;;  %v6208_v59 = vadd.f32 %v12723_v30, %v12192_v2 }
0x149d   :  { %10447 = vpow2.f32 %v9552_v33 }
0x149e   :  { %10449 = vtanh.f32 %v7468_v54 }
0x14a5   :  { %v10444_v29 = vpop.eup %10443 }
0x14a6   :  { %v10446_v19 = vpop.eup %10445  ;;  %v7473_v0 = vadd.f32 1.0, %v10444_v29 }
0x14a7   :  { %v7479_v34 = vadd.f32 1.0, %v10446_v19  ;;  %v10448_v36 = vpop.eup %10447 }
0x14a8   :  { %10451 = vrcp.f32 %v7473_v0  ;;  %v10450_v42 = vpop.eup %10449  ;;  %v7486_v40 = vadd.f32 1.0, %v10448_v36 }
0x14a9   :  { %10453 = vrcp.f32 %v7479_v34 }
0x14aa   :  { %10455 = vrcp.f32 %v7486_v40 }
0x14b2   :  { %v10452_v37 = vpop.eup %10451 }
0x14b3   :  { %v10454_v39 = vpop.eup %10453  ;;  %v7490_v41 = vmul.f32 %v10452_v37, %v10450_v42 }
0x14b4   :  { %v7489_v58 = vmul.f32 %v10454_v39, %v12301_v21  ;;  %v10456_v60 = vpop.eup %10455  ;;  %v12720_v21 = vld [vmem:[#allocation21_spill] sm:$0xff] }
0x14b5   :  { %v6133_v25 = vadd.f32 %v12720_v21, %v12179_v48 }
0x14b6   :  { %v12416_v38 = vadd.f32 %v7490_v41, %v7489_v58 }
0x14b8   :  { %10457 = vtanh.f32 %v12416_v38 }
0x14c2   :  { %v10458_v63 = vpop.eup %10457 }
0x14c3   :  { %v7493_v43 = vmul.f32 %v10458_v63, %v10456_v60 }
0x14c5   :  { %9553 = vst [vmem:[%s12582_s7 + $0x18] sm:$0xff] %v7493_v43  ;;  %v7500_v54 = vpack.c.bf16 %v7493_v43, %v7493_v43 }
0x14c7   :  { %7726 = vmatmul.mubr.bf16.vlgmr.msra.gmra.mrb[128].mxu0 %v7500_v54  ;;  %7767 = vmatmul.mubr.bf16.vlgmr.msra.gmra.mrb[128].mxu1 %v7500_v54 }
0x14c8   :  { %8003 = vmatpush1.bf16.msra.mxu0 %v12313_v46  ;;  %8044 = vmatpush1.bf16.msra.mxu1 %v12315_v35 }
0x14c9   :  { %8004 = vmatprep.subr.bf16.mxu0 %v12321_v51  ;;  %8045 = vmatprep.subr.bf16.mxu1 %v12323_v3 }
0x14ca   :  { %8034 = vmatprep.mubr.bf16.mxu0 %v12616_v32  ;;  %8075 = vmatprep.mubr.bf16.mxu1 %v12616_v32 }
0x14cc   :  { %8005 = vmatpush1.bf16.msra.mxu0 %v12325_v12  ;;  %8046 = vmatpush1.bf16.msra.mxu1 %v12327_v44 }
0x14cd   :  { %8006 = vmatprep.subr.bf16.mxu0 %v12333_v52  ;;  %8047 = vmatprep.subr.bf16.mxu1 %v12335_v11 }
0x14d0   :  { %8007 = vmatpush1.bf16.msra.mxu0 %v12337_v16  ;;  %8048 = vmatpush1.bf16.msra.mxu1 %v12339_v49 }
0x14d1   :  { %8008 = vmatprep.subr.bf16.mxu0 %v12345_v14  ;;  %8049 = vmatprep.subr.bf16.mxu1 %v12347_v6 }
0x14d4   :  { %8009 = vmatpush1.bf16.msra.mxu0 %v12349_v56  ;;  %8050 = vmatpush1.bf16.msra.mxu1 %v12351_v23 }
0x14d5   :  { %8010 = vmatprep.subr.bf16.mxu0 %v12357_v47  ;;  %8051 = vmatprep.subr.bf16.mxu1 %v12359_v5 }
0x14d8   :  { %8011 = vmatpush1.bf16.msra.mxu0 %v12361_v7  ;;  %8052 = vmatpush1.bf16.msra.mxu1 %v12363_v61 }
0x14d9   :  { %8012 = vmatprep.subr.bf16.mxu0 %v12367_v20  ;;  %8053 = vmatprep.subr.bf16.mxu1 %v12375_v4 }
0x14dc   :  { %8013 = vmatpush1.bf16.msra.mxu0 %v12371_v8  ;;  %8054 = vmatpush1.bf16.msra.mxu1 %v12373_v45 }
0x14dd   :  { %8014 = vmatprep.subr.bf16.mxu0 %v12378_v50  ;;  %8055 = vmatprep.subr.bf16.mxu1 %v12380_v22 }
0x14e0   :  { %8015 = vmatpush1.bf16.msra.mxu0 %v12385_v13  ;;  %8056 = vmatpush1.bf16.msra.mxu1 %v12387_v24 }
0x14e1   :  { %8016 = vmatprep.subr.bf16.mxu0 %v12391_v26  ;;  %8057 = vmatprep.subr.bf16.mxu1 %v12393_v31 }
0x14e4   :  { %8017 = vmatpush1.bf16.msra.mxu0 %v12397_v10  ;;  %8058 = vmatpush1.bf16.msra.mxu1 %v12399_v62 }
0x14e5   :  { %8311 = vmatprep.subr.bf16.mxu0 %v12309_v53  ;;  %8352 = vmatprep.subr.bf16.mxu1 %v12311_v1 }
0x159a   :  { %v7727_v27 = vpop.f32.mrb[128].mxu0  ;;  %v7768_v57 = vpop.f32.mrb[128].mxu1 }
0x159b   :  { %v7775_v33 = vadd.f32 %v7727_v27, %v6133_v25  ;;  %v7777_v29 = vadd.f32 %v7768_v57, %v6206_v55  ;;  %v7729_v19 = vpop.f32.mrb[129].mxu0  ;;  %v7770_v0 = vpop.f32.mrb[129].mxu1 }
0x159c   :  { %v7776_v34 = vadd.f32 %v7729_v19, %v6135_v15  ;;  %v7778_v36 = vadd.f32 %v7770_v0, %v6208_v59  ;;  %v7731_v42 = vpop.f32.mrb[130].mxu0  ;;  %v7772_v37 = vpop.f32.mrb[130].mxu1 }
0x159d   :  { %v9586_v39 = vmul.f32 -1.442695, %v7775_v33  ;;  %v7732_v41 = vpop.f32.mrb[131].mxu0  ;;  %v7773_v40 = vpop.f32.mrb[131].mxu1  ;;  %v12726_v42 = vld [vmem:[#allocation27_spill] sm:$0xff] }
0x159e   :  { %v9587_v58 = vmul.f32 -1.442695, %v7776_v34  ;;  %v9588_v60 = vmul.f32 -1.442695, %v7778_v36  ;;  %v12725_v34 = vld [vmem:[#allocation26_spill] sm:$0xff]  ;;  %v6139_v37 = vadd.f32 %v12726_v42, %v12189_v28 }
0x159f   :  { %10459 = vpow2.f32 %v9586_v39  ;;  %v6210_v36 = vadd.f32 %v12725_v34, %v12182_v17  ;;  %v12727_v39 = vld [vmem:[#allocation28_spill] sm:$0xff] }
0x15a0   :  { %10461 = vpow2.f32 %v9587_v58  ;;  %v6212_v41 = vadd.f32 %v12727_v39, %v12192_v2 }
0x15a1   :  { %10463 = vpow2.f32 %v9588_v60 }
0x15a2   :  { %10465 = vtanh.f32 %v7777_v29 }
0x15a9   :  { %v10460_v63 = vpop.eup %10459 }
0x15aa   :  { %v10462_v43 = vpop.eup %10461  ;;  %v7782_v54 = vadd.f32 1.0, %v10460_v63 }
0x15ab   :  { %v7788_v21 = vadd.f32 1.0, %v10462_v43  ;;  %v10464_v25 = vpop.eup %10463 }
0x15ac   :  { %10467 = vrcp.f32 %v7782_v54  ;;  %v10466_v18 = vpop.eup %10465  ;;  %v7795_v30 = vadd.f32 1.0, %v10464_v25 }
0x15ad   :  { %10469 = vrcp.f32 %v7788_v21 }
0x15ae   :  { %10471 = vrcp.f32 %v7795_v30 }
0x15b6   :  { %v10468_v55 = vpop.eup %10467 }
0x15b7   :  { %v10470_v9 = vpop.eup %10469  ;;  %v7799_v15 = vmul.f32 %v10468_v55, %v10466_v18 }
0x15b8   :  { %v7798_v59 = vmul.f32 %v10470_v9, %v12416_v38  ;;  %v10472_v57 = vpop.eup %10471  ;;  %v12724_v38 = vld [vmem:[#allocation25_spill] sm:$0xff] }
0x15b9   :  { %v6137_v0 = vadd.f32 %v12724_v38, %v12179_v48 }
0x15ba   :  { %v12465_v27 = vadd.f32 %v7799_v15, %v7798_v59 }
0x15bc   :  { %10473 = vtanh.f32 %v12465_v27 }
0x15c6   :  { %v10474_v33 = vpop.eup %10473 }
0x15c7   :  { %v7802_v19 = vmul.f32 %v10474_v33, %v10472_v57 }
0x15c9   :  { %9589 = vst [vmem:[%s12582_s7 + $0x20] sm:$0xff] %v7802_v19  ;;  %v7809_v29 = vpack.c.bf16 %v7802_v19, %v7802_v19 }
0x15cb   :  { %8035 = vmatmul.mubr.bf16.vlgmr.msra.gmra.mrb[132].mxu0 %v7809_v29  ;;  %8076 = vmatmul.mubr.bf16.vlgmr.msra.gmra.mrb[132].mxu1 %v7809_v29 }
0x15cc   :  { %8312 = vmatpush1.bf16.msra.mxu0 %v12313_v46  ;;  %8353 = vmatpush1.bf16.msra.mxu1 %v12315_v35 }
0x15cd   :  { %8313 = vmatprep.subr.bf16.mxu0 %v12321_v51  ;;  %8354 = vmatprep.subr.bf16.mxu1 %v12323_v3 }
0x15ce   :  { %8343 = vmatprep.mubr.bf16.mxu0 %v12616_v32  ;;  %8384 = vmatprep.mubr.bf16.mxu1 %v12616_v32 }
0x15d0   :  { %8314 = vmatpush1.bf16.msra.mxu0 %v12325_v12  ;;  %8355 = vmatpush1.bf16.msra.mxu1 %v12327_v44 }
0x15d1   :  { %8315 = vmatprep.subr.bf16.mxu0 %v12333_v52  ;;  %8356 = vmatprep.subr.bf16.mxu1 %v12335_v11 }
0x15d4   :  { %8316 = vmatpush1.bf16.msra.mxu0 %v12337_v16  ;;  %8357 = vmatpush1.bf16.msra.mxu1 %v12339_v49 }
0x15d5   :  { %8317 = vmatprep.subr.bf16.mxu0 %v12345_v14  ;;  %8358 = vmatprep.subr.bf16.mxu1 %v12347_v6 }
0x15d8   :  { %8318 = vmatpush1.bf16.msra.mxu0 %v12349_v56  ;;  %8359 = vmatpush1.bf16.msra.mxu1 %v12351_v23 }
0x15d9   :  { %8319 = vmatprep.subr.bf16.mxu0 %v12357_v47  ;;  %8360 = vmatprep.subr.bf16.mxu1 %v12359_v5 }
0x15dc   :  { %8320 = vmatpush1.bf16.msra.mxu0 %v12361_v7  ;;  %8361 = vmatpush1.bf16.msra.mxu1 %v12363_v61 }
0x15dd   :  { %8321 = vmatprep.subr.bf16.mxu0 %v12367_v20  ;;  %8362 = vmatprep.subr.bf16.mxu1 %v12375_v4 }
0x15e0   :  { %8322 = vmatpush1.bf16.msra.mxu0 %v12371_v8  ;;  %8363 = vmatpush1.bf16.msra.mxu1 %v12373_v45 }
0x15e1   :  { %8323 = vmatprep.subr.bf16.mxu0 %v12378_v50  ;;  %8364 = vmatprep.subr.bf16.mxu1 %v12380_v22 }
0x15e4   :  { %8324 = vmatpush1.bf16.msra.mxu0 %v12385_v13  ;;  %8365 = vmatpush1.bf16.msra.mxu1 %v12387_v24 }
0x15e5   :  { %8325 = vmatprep.subr.bf16.mxu0 %v12391_v26  ;;  %8366 = vmatprep.subr.bf16.mxu1 %v12393_v31 }
0x15e8   :  { %8326 = vmatpush1.bf16.msra.mxu0 %v12397_v10  ;;  %8367 = vmatpush1.bf16.msra.mxu1 %v12399_v62 }
0x15e9   :  { %8620 = vmatprep.subr.bf16.mxu0 %v12309_v53  ;;  %8661 = vmatprep.subr.bf16.mxu1 %v12311_v1 }
0x169e   :  { %v8036_v40 = vpop.f32.mrb[132].mxu0  ;;  %v8077_v58 = vpop.f32.mrb[132].mxu1 }
0x169f   :  { %v8084_v60 = vadd.f32 %v8036_v40, %v6137_v0  ;;  %v8086_v63 = vadd.f32 %v8077_v58, %v6210_v36  ;;  %v8038_v43 = vpop.f32.mrb[133].mxu0  ;;  %v8079_v53 = vpop.f32.mrb[133].mxu1 }
0x16a0   :  { %v8085_v54 = vadd.f32 %v8038_v43, %v6139_v37  ;;  %v8087_v1 = vadd.f32 %v8079_v53, %v6212_v41  ;;  %v8040_v21 = vpop.f32.mrb[134].mxu0  ;;  %v8081_v25 = vpop.f32.mrb[134].mxu1 }
0x16a1   :  { %v9622_v18 = vmul.f32 -1.442695, %v8084_v60  ;;  %v8041_v55 = vpop.f32.mrb[135].mxu0  ;;  %v8082_v9 = vpop.f32.mrb[135].mxu1 }
0x16a2   :  { %v9623_v15 = vmul.f32 -1.442695, %v8085_v54  ;;  %v9624_v30 = vmul.f32 -1.442695, %v8087_v1  ;;  %v12733_v9 = vld [vmem:[#allocation34_spill] sm:$0xff] }
0x16a3   :  { %10475 = vpow2.f32 %v9622_v18  ;;  %v12732_v18 = vld [vmem:[#allocation33_spill] sm:$0xff] }
0x16a4   :  { %10477 = vpow2.f32 %v9623_v15  ;;  %v6147_v55 = vadd.f32 %v12732_v18, %v12179_v48  ;;  %v6220_v15 = vadd.f32 %v12733_v9, %v12182_v17 }
0x16a5   :  { %10479 = vpow2.f32 %v9624_v30  ;;  %v12734_v30 = vld [vmem:[#allocation35_spill] sm:$0xff] }
0x16a6   :  { %10481 = vtanh.f32 %v8086_v63 }
0x16ad   :  { %v10476_v59 = vpop.eup %10475 }
0x16ae   :  { %v10478_v57 = vpop.eup %10477  ;;  %v8091_v33 = vadd.f32 1.0, %v10476_v59  ;;  %v6149_v59 = vadd.f32 %v12734_v30, %v12189_v28 }
0x16af   :  { %v8097_v19 = vadd.f32 1.0, %v10478_v57  ;;  %v10480_v29 = vpop.eup %10479  ;;  %v12735_v57 = vld [vmem:[#allocation36_spill] sm:$0xff] }
0x16b0   :  { %10483 = vrcp.f32 %v8091_v33  ;;  %v10482_v38 = vpop.eup %10481  ;;  %v8104_v42 = vadd.f32 1.0, %v10480_v29  ;;  %v6222_v33 = vadd.f32 %v12735_v57, %v12192_v2 }
0x16b1   :  { %10485 = vrcp.f32 %v8097_v19 }
0x16b2   :  { %10487 = vrcp.f32 %v8104_v42 }
0x16ba   :  { %v10484_v0 = vpop.eup %10483 }
0x16bb   :  { %v10486_v34 = vpop.eup %10485  ;;  %v8108_v36 = vmul.f32 %v10484_v0, %v10482_v38 }
0x16bc   :  { %v8107_v37 = vmul.f32 %v10486_v34, %v12465_v27  ;;  %v10488_v41 = vpop.eup %10487 }
0x16be   :  { %v12514_v39 = vadd.f32 %v8108_v36, %v8107_v37 }
0x16c0   :  { %10489 = vtanh.f32 %v12514_v39 }
0x16ca   :  { %v10490_v40 = vpop.eup %10489 }
0x16cb   :  { %v8111_v58 = vmul.f32 %v10490_v40, %v10488_v41 }
0x16cd   :  { %9625 = vst [vmem:[%s12582_s7 + $0x28] sm:$0xff] %v8111_v58  ;;  %v8118_v60 = vpack.c.bf16 %v8111_v58, %v8111_v58 }
0x16cf   :  { %8344 = vmatmul.mubr.bf16.vlgmr.msra.gmra.mrb[136].mxu0 %v8118_v60  ;;  %8385 = vmatmul.mubr.bf16.vlgmr.msra.gmra.mrb[136].mxu1 %v8118_v60 }
0x16d0   :  { %8621 = vmatpush1.bf16.msra.mxu0 %v12313_v46  ;;  %8662 = vmatpush1.bf16.msra.mxu1 %v12315_v35  ;;  %v12729_v35 = vld [vmem:[#allocation30_spill] sm:$0xff] }
0x16d1   :  { %8622 = vmatprep.subr.bf16.mxu0 %v12321_v51  ;;  %8663 = vmatprep.subr.bf16.mxu1 %v12323_v3  ;;  %v6216_v51 = vadd.f32 %v12729_v35, %v12182_v17  ;;  %v12730_v3 = vld [vmem:[#allocation31_spill] sm:$0xff] }
0x16d2   :  { %8652 = vmatprep.mubr.bf16.mxu0 %v12616_v32  ;;  %8693 = vmatprep.mubr.bf16.mxu1 %v12616_v32  ;;  %v12728_v32 = vld [vmem:[#allocation29_spill] sm:$0xff] }
0x16d3   :  { %v6143_v46 = vadd.f32 %v12728_v32, %v12179_v48 }
0x16d4   :  { %8623 = vmatpush1.bf16.msra.mxu0 %v12325_v12  ;;  %8664 = vmatpush1.bf16.msra.mxu1 %v12327_v44  ;;  %v6145_v12 = vadd.f32 %v12730_v3, %v12189_v28  ;;  %v12731_v44 = vld [vmem:[#allocation32_spill] sm:$0xff] }
0x16d5   :  { %8624 = vmatprep.subr.bf16.mxu0 %v12333_v52  ;;  %8665 = vmatprep.subr.bf16.mxu1 %v12335_v11  ;;  %v6218_v52 = vadd.f32 %v12731_v44, %v12192_v2 }
0x16d8   :  { %8625 = vmatpush1.bf16.msra.mxu0 %v12337_v16  ;;  %8666 = vmatpush1.bf16.msra.mxu1 %v12339_v49 }
0x16d9   :  { %8626 = vmatprep.subr.bf16.mxu0 %v12345_v14  ;;  %8667 = vmatprep.subr.bf16.mxu1 %v12347_v6 }
0x16dc   :  { %8627 = vmatpush1.bf16.msra.mxu0 %v12349_v56  ;;  %8668 = vmatpush1.bf16.msra.mxu1 %v12351_v23 }
0x16dd   :  { %8628 = vmatprep.subr.bf16.mxu0 %v12357_v47  ;;  %8669 = vmatprep.subr.bf16.mxu1 %v12359_v5 }
0x16e0   :  { %8629 = vmatpush1.bf16.msra.mxu0 %v12361_v7  ;;  %8670 = vmatpush1.bf16.msra.mxu1 %v12363_v61 }
0x16e1   :  { %8630 = vmatprep.subr.bf16.mxu0 %v12367_v20  ;;  %8671 = vmatprep.subr.bf16.mxu1 %v12375_v4 }
0x16e4   :  { %8631 = vmatpush1.bf16.msra.mxu0 %v12371_v8  ;;  %8672 = vmatpush1.bf16.msra.mxu1 %v12373_v45 }
0x16e5   :  { %8632 = vmatprep.subr.bf16.mxu0 %v12378_v50  ;;  %8673 = vmatprep.subr.bf16.mxu1 %v12380_v22 }
0x16e8   :  { %8633 = vmatpush1.bf16.msra.mxu0 %v12385_v13  ;;  %8674 = vmatpush1.bf16.msra.mxu1 %v12387_v24 }
0x16e9   :  { %8634 = vmatprep.subr.bf16.mxu0 %v12391_v26  ;;  %8675 = vmatprep.subr.bf16.mxu1 %v12393_v31 }
0x16ec   :  { %8635 = vmatpush1.bf16.msra.mxu0 %v12397_v10  ;;  %8676 = vmatpush1.bf16.msra.mxu1 %v12399_v62 }
0x17a2   :  { %v8345_v11 = vpop.f32.mrb[136].mxu0  ;;  %v8386_v16 = vpop.f32.mrb[136].mxu1 }
0x17a3   :  { %v8393_v49 = vadd.f32 %v8345_v11, %v6143_v46  ;;  %v8395_v14 = vadd.f32 %v8386_v16, %v6216_v51  ;;  %v8347_v6 = vpop.f32.mrb[137].mxu0  ;;  %v8388_v56 = vpop.f32.mrb[137].mxu1 }
0x17a4   :  { %v8394_v23 = vadd.f32 %v8347_v6, %v6145_v12  ;;  %v8396_v47 = vadd.f32 %v8388_v56, %v6218_v52  ;;  %v8349_v5 = vpop.f32.mrb[138].mxu0  ;;  %v8390_v7 = vpop.f32.mrb[138].mxu1 }
0x17a5   :  { %v9658_v61 = vmul.f32 -1.442695, %v8393_v49  ;;  %v8350_v20 = vpop.f32.mrb[139].mxu0  ;;  %v8391_v8 = vpop.f32.mrb[139].mxu1 }
0x17a6   :  { %v9659_v45 = vmul.f32 -1.442695, %v8394_v23  ;;  %v9660_v4 = vmul.f32 -1.442695, %v8396_v47 }
0x17a7   :  { %10491 = vpow2.f32 %v9658_v61 }
0x17a8   :  { %10493 = vpow2.f32 %v9659_v45 }
0x17a9   :  { %10495 = vpow2.f32 %v9660_v4 }
0x17aa   :  { %10497 = vtanh.f32 %v8395_v14 }
0x17b1   :  { %v10492_v50 = vpop.eup %10491 }
0x17b2   :  { %v10494_v22 = vpop.eup %10493  ;;  %v8400_v13 = vadd.f32 1.0, %v10492_v50 }
0x17b3   :  { %v8406_v24 = vadd.f32 1.0, %v10494_v22  ;;  %v10496_v26 = vpop.eup %10495 }
0x17b4   :  { %10499 = vrcp.f32 %v8400_v13  ;;  %v10498_v31 = vpop.eup %10497  ;;  %v8413_v63 = vadd.f32 1.0, %v10496_v26 }
0x17b5   :  { %10501 = vrcp.f32 %v8406_v24 }
0x17b6   :  { %10503 = vrcp.f32 %v8413_v63 }
0x17be   :  { %v10500_v10 = vpop.eup %10499 }
0x17bf   :  { %v10502_v62 = vpop.eup %10501  ;;  %v8417_v27 = vmul.f32 %v10500_v10, %v10498_v31 }
0x17c0   :  { %v8416_v43 = vmul.f32 %v10502_v62, %v12514_v39  ;;  %v10504_v54 = vpop.eup %10503 }
0x17c2   :  { %v8418_v53 = vadd.f32 %v8417_v27, %v8416_v43 }
0x17c4   :  { %10505 = vtanh.f32 %v8418_v53 }
0x17ce   :  { %v10506_v1 = vpop.eup %10505 }
0x17cf   :  { %v8420_v21 = vmul.f32 %v10506_v1, %v10504_v54 }
0x17d1   :  { %9661 = vst [vmem:[%s12582_s7 + $0x30] sm:$0xff] %v8420_v21  ;;  %v8427_v25 = vpack.c.bf16 %v8420_v21, %v8420_v21 }
0x17d3   :  { %8653 = vmatmul.mubr.bf16.vlgmr.msra.gmra.mrb[140].mxu0 %v8427_v25  ;;  %8694 = vmatmul.mubr.bf16.vlgmr.msra.gmra.mrb[140].mxu1 %v8427_v25 }
0x18a6   :  { %v8654_v19 = vpop.f32.mrb[140].mxu0  ;;  %v8695_v29 = vpop.f32.mrb[140].mxu1 }
0x18a7   :  { %v8702_v38 = vadd.f32 %v8654_v19, %v6147_v55  ;;  %v8704_v0 = vadd.f32 %v8695_v29, %v6220_v15  ;;  %v8656_v34 = vpop.f32.mrb[141].mxu0  ;;  %v8697_v36 = vpop.f32.mrb[141].mxu1 }
0x18a8   :  { %v8703_v42 = vadd.f32 %v8656_v34, %v6149_v59  ;;  %v8705_v37 = vadd.f32 %v8697_v36, %v6222_v33  ;;  %v8658_v39 = vpop.f32.mrb[142].mxu0  ;;  %v8699_v41 = vpop.f32.mrb[142].mxu1 }
0x18a9   :  { %v9694_v48 = vmul.f32 -1.442695, %v8702_v38  ;;  %v8659_v40 = vpop.f32.mrb[143].mxu0  ;;  %v8700_v58 = vpop.f32.mrb[143].mxu1 }
0x18aa   :  { %v9695_v17 = vmul.f32 -1.442695, %v8703_v42  ;;  %v9696_v28 = vmul.f32 -1.442695, %v8705_v37 }
0x18ab   :  { %10507 = vpow2.f32 %v9694_v48 }
0x18ac   :  { %10509 = vpow2.f32 %v9695_v17 }
0x18ad   :  { %10511 = vpow2.f32 %v9696_v28 }
0x18ae   :  { %10513 = vtanh.f32 %v8704_v0 }
0x18b5   :  { %v10508_v60 = vpop.eup %10507 }
0x18b6   :  { %v10510_v32 = vpop.eup %10509  ;;  %v8709_v2 = vadd.f32 1.0, %v10508_v60 }
0x18b7   :  { %v8715_v46 = vadd.f32 1.0, %v10510_v32  ;;  %v10512_v35 = vpop.eup %10511 }
0x18b8   :  { %10515 = vrcp.f32 %v8709_v2  ;;  %v10514_v51 = vpop.eup %10513  ;;  %v8722_v52 = vadd.f32 1.0, %v10512_v35 }
0x18b9   :  { %10517 = vrcp.f32 %v8715_v46 }
0x18ba   :  { %10519 = vrcp.f32 %v8722_v52 }
0x18c2   :  { %v10516_v3 = vpop.eup %10515 }
0x18c3   :  { %v10518_v12 = vpop.eup %10517  ;;  %v8726_v44 = vmul.f32 %v10516_v3, %v10514_v51 }
0x18c4   :  { %v8725_v11 = vmul.f32 %v10518_v12, %v8418_v53  ;;  %v10520_v49 = vpop.eup %10519 }
0x18c6   :  { %v8727_v16 = vadd.f32 %v8726_v44, %v8725_v11 }
0x18c8   :  { %10521 = vtanh.f32 %v8727_v16 }
0x18d2   :  { %v10522_v14 = vpop.eup %10521 }
0x18d3   :  { %v8729_v6 = vmul.f32 %v10522_v14, %v10520_v49 }
0x18d5   :  { %9697 = vst [vmem:[%s12582_s7 + $0x38] sm:$0xff] %v8729_v6 }
0x18d6   :  { %8736 = vsyncpa [#allocation5], 1 }
0x18d7   :  { %8737 = vsyncpa [#allocation7], 1 }

</bundles_post_ra>
